<compile_context>
chip_gen: v7x
topology: tpu7x:2x2x1
jax: 0.10.0
libtpu: 0.0.40
codegen_flags: <defaults>
</compile_context>

<pallas_src>
import jax
import jax.numpy as jnp
import numpy as np
from jax import lax
from jax.experimental import pallas as pl
from jax.experimental.pallas import tpu as pltpu

# ---- small hyper-parameters (stand-ins for hp.*) ----
N_LAYERS = 2               # hp.decoder_layer
N_HEAD   = 2               # hp.decoder_head
D_MODEL  = 32              # hp.decoder_hidden
D_K      = D_MODEL // N_HEAD
D_V      = D_MODEL // N_HEAD
D_INNER  = 64              # hp.fft_conv1d_filter_size
K1, K2   = 9, 1            # hp.fft_conv1d_kernel (FastSpeech default)
PAD1     = (K1 - 1) // 2
LN_EPS   = 1e-5
NEG_INF  = -1e9

B, T = 2, 8

LANE      = 128
LANE_PACK = LANE // D_MODEL          # 4 activation rows packed into one 128-lane row
R_SLAB    = (B * T) // LANE_PACK     # 4 rows in the lane-dense activation slab


def _layer_norm(x, g, b):
    # one-pass LN: var = E[x^2] - mu^2 (shorter XLU-reduce -> VPU dependency chain)
    mu = jnp.mean(x, axis=-1, keepdims=True)
    ms = jnp.mean(x * x, axis=-1, keepdims=True)
    return (x - mu) * lax.rsqrt(ms - mu * mu + LN_EPS) * g + b


# ----------------------------- Pallas kernel ------------------------------ #
def prosody_kernel(len_ref, x_ref, wqkv_ref, bqkv_ref, wfc_ref, w1_ref, b1_ref,
                   w2_ref, vecd_ref, out_ref):
    """Whole ProsodyEncoder forward: all layers, all batch elements, one call.

    x_ref / out_ref are lane-dense (R_SLAB, 128) slabs: lane block j of slab row
    r holds row j*R_SLAB + r of the flattened (B*T, D_MODEL) activations.
    """
    # ---------- unpack lane-dense input slab -> (B*T, D) ----------
    xin = x_ref[...]
    x = jnp.concatenate(
        [xin[:, j * D_MODEL:(j + 1) * D_MODEL] for j in range(LANE_PACK)],
        axis=0).astype(jnp.float32)                                     # (B*T, D)

    # ---------- padding masks from SMEM sequence lengths (no mask DMAs) ----------
    tq = lax.broadcasted_iota(jnp.int32, (T, 1), 0)                     # query/time index
    tk = lax.broadcasted_iota(jnp.int32, (1, 1, T), 2)                  # key index
    pad_q = jnp.concatenate([tq - len_ref[b] for b in range(B)], axis=0) >= 0   # (B*T, 1)
    attn_bias = jnp.concatenate(
        [jnp.where(tk >= len_ref[b], NEG_INF, 0.0) for b in range(B)],
        axis=0)                                                         # (B, 1, T) additive
    tpos = lax.broadcasted_iota(jnp.int32, (1, T, 1), 1)                # conv edge mask iota

    inv_temp = 1.0 / float(np.sqrt(D_K))

    for l in range(N_LAYERS):                 # static unroll; all weights VMEM-resident
        vecd = vecd_ref[l]                    # (6, D): fcb, b2, g1, be1, g2, be2
        fcb, b2  = vecd[0:1, :], vecd[1:2, :]
        g1,  be1 = vecd[2:3, :], vecd[3:4, :]
        g2,  be2 = vecd[4:5, :], vecd[5:6, :]

        # ---- multi-head self-attention: per-(role, head) weights, so no lane
        #      slicing of activations and no head-concat; output projection is
        #      accumulated per head: o = sum_h head_h @ fc_h ----
        o = None
        for h in range(N_HEAD):
            iq = (l * 3 + 0) * N_HEAD + h
            ik = (l * 3 + 1) * N_HEAD + h
            iv = (l * 3 + 2) * N_HEAD + h
            qh = jnp.dot(x, wqkv_ref[iq], preferred_element_type=jnp.float32) + bqkv_ref[iq]
            kh = jnp.dot(x, wqkv_ref[ik], preferred_element_type=jnp.float32) + bqkv_ref[ik]
            vh = jnp.dot(x, wqkv_ref[iv], preferred_element_type=jnp.float32) + bqkv_ref[iv]
            q3 = qh.reshape(B, T, D_K)
            k3 = kh.reshape(B, T, D_K)
            v3 = vh.reshape(B, T, D_V)
            s = jnp.einsum('bqd,bkd->bqk', q3, k3,
                           preferred_element_type=jnp.float32) * inv_temp + attn_bias
            m = jnp.max(s, axis=-1, keepdims=True)
            e = jnp.exp(s - m)
            denom = jnp.sum(e, axis=-1, keepdims=True)
            attn = e * pl.reciprocal(denom, approx=True)                # softmax (EUP recip)
            head = jnp.einsum('bqk,bkd->bqd', attn, v3,
                              preferred_element_type=jnp.float32)
            contrib = jnp.dot(head.reshape(B * T, D_V), wfc_ref[l * N_HEAD + h],
                              preferred_element_type=jnp.float32)
            o = contrib if o is None else o + contrib
        # dropout: identity (eval)
        y = _layer_norm(o + fcb + x, g1, be1)
        y = jnp.where(pad_q, 0.0, y)                                    # masked_fill(mask, 0)

        # ---- position-wise FFN: Conv1d(k=9) -> ReLU -> Conv1d(k=1) ----
        # k=9 conv as K1 accumulating matmuls over sublane-rolled y (XLU roll +
        # iota edge mask); no im2col slab, no 288-lane concat.
        y3 = y.reshape(B, T, D_MODEL)
        h1 = None
        for kk in range(K1):
            off = kk - PAD1                      # tap reads y[:, t + off, :]
            if off == 0:
                tap = y3
            else:
                tap = pltpu.roll(y3, (-off) % T, 1)      # rolled[t] = y[(t + off) mod T]
                valid = ((tpos + off) >= 0) & ((tpos + off) < T)
                tap = jnp.where(valid, tap, 0.0)
            c = jnp.dot(tap.reshape(B * T, D_MODEL), w1_ref[l * K1 + kk],
                        preferred_element_type=jnp.float32)
            h1 = c if h1 is None else h1 + c
        h1 = jnp.maximum(h1 + b1_ref[l], 0.0)
        z = jnp.dot(h1, w2_ref[l], preferred_element_type=jnp.float32) + b2
        # dropout: identity (eval)
        z = _layer_norm(z + y, g2, be2)
        z = jnp.where(pad_q, 0.0, z)
        x = z

    # ---------- pack (B*T, D) -> lane-dense output slab (full-width stores) ----------
    out_ref[...] = jnp.concatenate(
        [x[j * R_SLAB:(j + 1) * R_SLAB, :] for j in range(LANE_PACK)],
        axis=-1).astype(out_ref.dtype)


# ----------------------------- wrapper ------------------------------------ #
def prosody_encoder_pallas(dec_output, lengths, packed):
    """dec_output: (B, T, D_MODEL) float32; lengths: (B,) int32 valid lengths.

    The original module takes a 0/1 padding mask; for the standard length-prefix
    padding mask used by FastSpeech the two are equivalent, and SMEM lengths
    avoid DMA'ing two padded mask tensors.
    """
    Bc, Tc, Dc = dec_output.shape
    assert LANE % Dc == 0 and (Bc * Tc) % (LANE // Dc) == 0
    lp = LANE // Dc
    rs = (Bc * Tc) // lp
    # lane-dense slab: slab[:, j*D:(j+1)*D] = flattened rows [j*rs, (j+1)*rs)
    x_slab = (dec_output.reshape(Bc * Tc, Dc)
              .reshape(lp, rs, Dc).transpose(1, 0, 2).reshape(rs, LANE))
    out_slab = pl.pallas_call(
        prosody_kernel,
        out_shape=jax.ShapeDtypeStruct((rs, LANE), dec_output.dtype),
        in_specs=[pl.BlockSpec(memory_space=pltpu.MemorySpace.SMEM)]      # lengths
                 + [pl.BlockSpec(memory_space=pltpu.MemorySpace.VMEM)] * 8,
        out_specs=pl.BlockSpec(memory_space=pltpu.MemorySpace.VMEM),
    )(lengths.astype(jnp.int32), x_slab,
      packed['wqkv'], packed['bqkv'], packed['wfc'],
      packed['w1'], packed['b1'], packed['w2'], packed['vecd'])
    return (out_slab.reshape(rs, lp, Dc).transpose(1, 0, 2)
            .reshape(Bc * Tc, Dc).reshape(Bc, Tc, Dc))


# ----------------------- plain-JAX reference (check) ----------------------- #
def _ref_layer_norm(x, g, b):
    mu = jnp.mean(x, axis=-1, keepdims=True)
    var = jnp.mean(jnp.square(x - mu), axis=-1, keepdims=True)
    return (x - mu) * lax.rsqrt(var + LN_EPS) * g + b


def _ref_fft_block(x, mask, p):
    Bc, Tc, _ = x.shape
    q = (x @ p['wq'] + p['bq']).reshape(Bc, Tc, N_HEAD, D_K)
    k = (x @ p['wk'] + p['bk']).reshape(Bc, Tc, N_HEAD, D_K)
    v = (x @ p['wv'] + p['bv']).reshape(Bc, Tc, N_HEAD, D_V)
    scores = jnp.einsum('bqhd,bkhd->bhqk', q, k) / np.sqrt(D_K)
    scores = jnp.where(mask[:, None, None, :] > 0.0, NEG_INF, scores)
    attn = jax.nn.softmax(scores, axis=-1)
    o = jnp.einsum('bhqk,bkhd->bqhd', attn, v).reshape(Bc, Tc, N_HEAD * D_V)
    o = o @ p['fc'] + p['fcb']
    y = _ref_layer_norm(o + x, p['g1'], p['be1'])
    y = jnp.where(mask[:, :, None] > 0.0, 0.0, y)
    res = y
    xp = jnp.pad(y, ((0, 0), (PAD1, PAD1), (0, 0)))
    h = jnp.zeros((Bc, Tc, D_INNER), jnp.float32) + p['b1']
    for kk in range(K1):
        h = h + jnp.einsum('btd,df->btf', xp[:, kk:kk + Tc, :], p['w1'][kk])
    h = jnp.maximum(h, 0.0)
    z = h @ p['w2'][0] + p['b2']
    z = _ref_layer_norm(z + res, p['g2'], p['be2'])
    z = jnp.where(mask[:, :, None] > 0.0, 0.0, z)
    return z


def prosody_encoder_ref(x, mask, params):
    for p in params:
        x = _ref_fft_block(x, mask, p)
    return x


# ----------------------------- params ------------------------------------- #
def init_params(key):
    """Deterministic synthetic weights (already transposed for x @ W form)."""
    params = []
    for l in range(N_LAYERS):
        ks = jax.random.split(jax.random.fold_in(key, l), 16)
        n = lambda kk, s, sc=0.08: jax.random.normal(kk, s, jnp.float32) * sc
        params.append(dict(
            wq=n(ks[0], (D_MODEL, N_HEAD * D_K)), bq=n(ks[1], (1, N_HEAD * D_K), 0.02),
            wk=n(ks[2], (D_MODEL, N_HEAD * D_K)), bk=n(ks[3], (1, N_HEAD * D_K), 0.02),
            wv=n(ks[4], (D_MODEL, N_HEAD * D_V)), bv=n(ks[5], (1, N_HEAD * D_V), 0.02),
            fc=n(ks[6], (N_HEAD * D_V, D_MODEL)), fcb=n(ks[7], (1, D_MODEL), 0.02),
            g1=1.0 + n(ks[8], (1, D_MODEL), 0.02), be1=n(ks[9], (1, D_MODEL), 0.02),
            # Conv1d weights permuted from PyTorch (out, in, k) -> (k, in, out)
            w1=n(ks[10], (K1, D_MODEL, D_INNER)), b1=n(ks[11], (1, D_INNER), 0.02),
            w2=n(ks[12], (K2, D_INNER, D_MODEL)), b2=n(ks[13], (1, D_MODEL), 0.02),
            g2=1.0 + n(ks[14], (1, D_MODEL), 0.02), be2=n(ks[15], (1, D_MODEL), 0.02),
        ))
    return params


def pack_params(params):
    """Pack weights into a few stacked arrays for the fused kernel.

    wqkv/bqkv are stacked per (layer, role q/k/v, head) at index
    (l*3 + role)*N_HEAD + h; wfc per (layer, head); w1 per (layer, conv tap).
    """
    wqkv, bqkv, wfc, w1 = [], [], [], []
    for p in params:
        for wname, bname in (('wq', 'bq'), ('wk', 'bk'), ('wv', 'bv')):
            for h in range(N_HEAD):
                wqkv.append(p[wname][:, h * D_K:(h + 1) * D_K])
                bqkv.append(p[bname][:, h * D_K:(h + 1) * D_K])
        for h in range(N_HEAD):
            wfc.append(p['fc'][h * D_V:(h + 1) * D_V, :])
        for kk in range(K1):
            w1.append(p['w1'][kk])
    vecd = [jnp.concatenate([p['fcb'], p['b2'], p['g1'], p['be1'],
                             p['g2'], p['be2']], axis=0) for p in params]
    return dict(wqkv=jnp.stack(wqkv), bqkv=jnp.stack(bqkv), wfc=jnp.stack(wfc),
                w1=jnp.stack(w1),
                b1=jnp.stack([p['b1'] for p in params]),
                w2=jnp.stack([p['w2'][0] for p in params]),
                vecd=jnp.stack(vecd))


if __name__ == "__main__":
    key = jax.random.PRNGKey(0)
    kx, kp = jax.random.split(key)
    x = jax.random.normal(kx, (B, T, D_MODEL), jnp.float32)
    lengths = jnp.array([T, 5], jnp.int32)
    # padding mask (for the reference): 1.0 where position is padded
    mask = (jnp.arange(T)[None, :] >= lengths[:, None]).astype(jnp.float32)

    params = init_params(kp)
    packed = pack_params(params)

    out = prosody_encoder_pallas(x, lengths, packed)
    out = jax.block_until_ready(out)

    ref = prosody_encoder_ref(x, mask, params)
    assert out.shape == (B, T, D_MODEL)
    # Tolerance covers the EUP approximate reciprocal and the one-pass LayerNorm.
    np.testing.assert_allclose(np.asarray(out), np.asarray(ref), rtol=5e-3, atol=5e-3)
    print("KERNEL_OK")
</pallas_src>

<mosaic_0001>
module attributes {stable_mosaic.version = 11 : i64} {
  func.func @prosody_kernel(%arg0: memref<2xi32, #tpu.memory_space<smem>>, %arg1: memref<4x128xf32, #tpu.memory_space<vmem>>, %arg2: memref<12x32x16xf32, #tpu.memory_space<vmem>>, %arg3: memref<12x1x16xf32, #tpu.memory_space<vmem>>, %arg4: memref<4x16x32xf32, #tpu.memory_space<vmem>>, %arg5: memref<18x32x64xf32, #tpu.memory_space<vmem>>, %arg6: memref<2x1x64xf32, #tpu.memory_space<vmem>>, %arg7: memref<2x64x32xf32, #tpu.memory_space<vmem>>, %arg8: memref<2x6x32xf32, #tpu.memory_space<vmem>>, %arg9: memref<4x128xf32, #tpu.memory_space<vmem>>) attributes {dimension_semantics = [], scalar_prefetch = 0 : i64, scratch_operands = 0 : i64, tpu.core_type = #tpu.core_type<tc>} {
    %c0 = arith.constant 0 : index
    %c0_0 = arith.constant 0 : index
    %0 = vector.load %arg1[%c0, %c0_0] : memref<4x128xf32, #tpu.memory_space<vmem>>, vector<4x128xf32>
    %1 = vector.extract_strided_slice %0 {offsets = [0, 0], sizes = [4, 32], strides = [1, 1]} : vector<4x128xf32> to vector<4x32xf32>
    %2 = vector.extract_strided_slice %0 {offsets = [0, 32], sizes = [4, 32], strides = [1, 1]} : vector<4x128xf32> to vector<4x32xf32>
    %3 = vector.extract_strided_slice %0 {offsets = [0, 64], sizes = [4, 32], strides = [1, 1]} : vector<4x128xf32> to vector<4x32xf32>
    %4 = vector.extract_strided_slice %0 {offsets = [0, 96], sizes = [4, 32], strides = [1, 1]} : vector<4x128xf32> to vector<4x32xf32>
    %5 = tpu.concatenate %1, %2, %3, %4 in 0 : vector<4x32xf32>, vector<4x32xf32>, vector<4x32xf32>, vector<4x32xf32> -> vector<16x32xf32>
    %6 = tpu.iota {dimensions = array<i32: 0>} : vector<8x1xi32>
    %7 = tpu.iota {dimensions = array<i32: 2>} : vector<1x1x8xi32>
    %c0_1 = arith.constant 0 : index
    %8 = memref.load %arg0[%c0_1] : memref<2xi32, #tpu.memory_space<smem>>
    %9 = vector.broadcast %8 : i32 to vector<8x1xi32>
    %10 = arith.subi %6, %9 : vector<8x1xi32>
    %c1 = arith.constant 1 : index
    %11 = memref.load %arg0[%c1] : memref<2xi32, #tpu.memory_space<smem>>
    %12 = vector.broadcast %11 : i32 to vector<8x1xi32>
    %13 = arith.subi %6, %12 : vector<8x1xi32>
    %14 = tpu.concatenate %10, %13 in 0 : vector<8x1xi32>, vector<8x1xi32> -> vector<16x1xi32>
    %c0_i32 = arith.constant 0 : i32
    %15 = vector.broadcast %c0_i32 : i32 to vector<16x1xi32>
    %16 = arith.cmpi sge, %14, %15 : vector<16x1xi32>
    %c0_2 = arith.constant 0 : index
    %17 = memref.load %arg0[%c0_2] : memref<2xi32, #tpu.memory_space<smem>>
    %18 = vector.broadcast %17 : i32 to vector<1x1x8xi32>
    %19 = arith.cmpi sge, %7, %18 : vector<1x1x8xi32>
    %cst = arith.constant -1.000000e+09 : f32
    %cst_3 = arith.constant 0.000000e+00 : f32
    %20 = vector.broadcast %cst : f32 to vector<1x1x8xf32>
    %21 = vector.broadcast %cst_3 : f32 to vector<1x1x8xf32>
    %22 = arith.select %19, %20, %21 : vector<1x1x8xi1>, vector<1x1x8xf32>
    %c1_4 = arith.constant 1 : index
    %23 = memref.load %arg0[%c1_4] : memref<2xi32, #tpu.memory_space<smem>>
    %24 = vector.broadcast %23 : i32 to vector<1x1x8xi32>
    %25 = arith.cmpi sge, %7, %24 : vector<1x1x8xi32>
    %cst_5 = arith.constant -1.000000e+09 : f32
    %cst_6 = arith.constant 0.000000e+00 : f32
    %26 = vector.broadcast %cst_5 : f32 to vector<1x1x8xf32>
    %27 = vector.broadcast %cst_6 : f32 to vector<1x1x8xf32>
    %28 = arith.select %25, %26, %27 : vector<1x1x8xi1>, vector<1x1x8xf32>
    %29 = tpu.concatenate %22, %28 in 0 : vector<1x1x8xf32>, vector<1x1x8xf32> -> vector<2x1x8xf32>
    %30 = tpu.iota {dimensions = array<i32: 1>} : vector<1x8x1xi32>
    %c0_7 = arith.constant 0 : index
    %c0_8 = arith.constant 0 : index
    %c0_9 = arith.constant 0 : index
    %31 = vector.load %arg8[%c0_7, %c0_8, %c0_9] : memref<2x6x32xf32, #tpu.memory_space<vmem>>, vector<1x6x32xf32>
    %32 = vector.shape_cast %31 : vector<1x6x32xf32> to vector<6x32xf32>
    %33 = vector.extract_strided_slice %32 {offsets = [0, 0], sizes = [1, 32], strides = [1, 1]} : vector<6x32xf32> to vector<1x32xf32>
    %34 = vector.extract_strided_slice %32 {offsets = [1, 0], sizes = [1, 32], strides = [1, 1]} : vector<6x32xf32> to vector<1x32xf32>
    %35 = vector.extract_strided_slice %32 {offsets = [2, 0], sizes = [1, 32], strides = [1, 1]} : vector<6x32xf32> to vector<1x32xf32>
    %36 = vector.extract_strided_slice %32 {offsets = [3, 0], sizes = [1, 32], strides = [1, 1]} : vector<6x32xf32> to vector<1x32xf32>
    %37 = vector.extract_strided_slice %32 {offsets = [4, 0], sizes = [1, 32], strides = [1, 1]} : vector<6x32xf32> to vector<1x32xf32>
    %38 = vector.extract_strided_slice %32 {offsets = [5, 0], sizes = [1, 32], strides = [1, 1]} : vector<6x32xf32> to vector<1x32xf32>
    %c0_10 = arith.constant 0 : index
    %c0_11 = arith.constant 0 : index
    %c0_12 = arith.constant 0 : index
    %39 = vector.load %arg2[%c0_10, %c0_11, %c0_12] : memref<12x32x16xf32, #tpu.memory_space<vmem>>, vector<1x32x16xf32>
    %40 = vector.shape_cast %39 : vector<1x32x16xf32> to vector<32x16xf32>
    %cst_13 = arith.constant dense<0.000000e+00> : vector<16x16xf32>
    %41 = tpu.matmul %5, %40, %cst_13 {dimension_numbers = #tpu.dot_dimension_numbers<[1], [0], [0], [1], [0, 0, 1, 1], [], []>} : vector<16x32xf32>, vector<32x16xf32>, vector<16x16xf32> -> vector<16x16xf32>
    %c0_14 = arith.constant 0 : index
    %c0_15 = arith.constant 0 : index
    %c0_16 = arith.constant 0 : index
    %42 = vector.load %arg3[%c0_14, %c0_15, %c0_16] : memref<12x1x16xf32, #tpu.memory_space<vmem>>, vector<1x1x16xf32>
    %43 = vector.shape_cast %42 : vector<1x1x16xf32> to vector<1x16xf32>
    %44 = vector.broadcast %43 : vector<1x16xf32> to vector<16x16xf32>
    %45 = arith.addf %41, %44 : vector<16x16xf32>
    %c2 = arith.constant 2 : index
    %c0_17 = arith.constant 0 : index
    %c0_18 = arith.constant 0 : index
    %46 = vector.load %arg2[%c2, %c0_17, %c0_18] : memref<12x32x16xf32, #tpu.memory_space<vmem>>, vector<1x32x16xf32>
    %47 = vector.shape_cast %46 : vector<1x32x16xf32> to vector<32x16xf32>
    %cst_19 = arith.constant dense<0.000000e+00> : vector<16x16xf32>
    %48 = tpu.matmul %5, %47, %cst_19 {dimension_numbers = #tpu.dot_dimension_numbers<[1], [0], [0], [1], [0, 0, 1, 1], [], []>} : vector<16x32xf32>, vector<32x16xf32>, vector<16x16xf32> -> vector<16x16xf32>
    %c2_20 = arith.constant 2 : index
    %c0_21 = arith.constant 0 : index
    %c0_22 = arith.constant 0 : index
    %49 = vector.load %arg3[%c2_20, %c0_21, %c0_22] : memref<12x1x16xf32, #tpu.memory_space<vmem>>, vector<1x1x16xf32>
    %50 = vector.shape_cast %49 : vector<1x1x16xf32> to vector<1x16xf32>
    %51 = vector.broadcast %50 : vector<1x16xf32> to vector<16x16xf32>
    %52 = arith.addf %48, %51 : vector<16x16xf32>
    %c4 = arith.constant 4 : index
    %c0_23 = arith.constant 0 : index
    %c0_24 = arith.constant 0 : index
    %53 = vector.load %arg2[%c4, %c0_23, %c0_24] : memref<12x32x16xf32, #tpu.memory_space<vmem>>, vector<1x32x16xf32>
    %54 = vector.shape_cast %53 : vector<1x32x16xf32> to vector<32x16xf32>
    %cst_25 = arith.constant dense<0.000000e+00> : vector<16x16xf32>
    %55 = tpu.matmul %5, %54, %cst_25 {dimension_numbers = #tpu.dot_dimension_numbers<[1], [0], [0], [1], [0, 0, 1, 1], [], []>} : vector<16x32xf32>, vector<32x16xf32>, vector<16x16xf32> -> vector<16x16xf32>
    %c4_26 = arith.constant 4 : index
    %c0_27 = arith.constant 0 : index
    %c0_28 = arith.constant 0 : index
    %56 = vector.load %arg3[%c4_26, %c0_27, %c0_28] : memref<12x1x16xf32, #tpu.memory_space<vmem>>, vector<1x1x16xf32>
    %57 = vector.shape_cast %56 : vector<1x1x16xf32> to vector<1x16xf32>
    %58 = vector.broadcast %57 : vector<1x16xf32> to vector<16x16xf32>
    %59 = arith.addf %55, %58 : vector<16x16xf32>
    %60 = vector.shape_cast %45 : vector<16x16xf32> to vector<2x8x16xf32>
    %61 = vector.shape_cast %52 : vector<16x16xf32> to vector<2x8x16xf32>
    %62 = vector.shape_cast %59 : vector<16x16xf32> to vector<2x8x16xf32>
    "tpu.trace_start"() <{level = 10 : i32, message = "bqd,bkd->bqk"}> : () -> ()
    %cst_29 = arith.constant dense<0.000000e+00> : vector<2x8x8xf32>
    %63 = tpu.matmul %60, %61, %cst_29 {dimension_numbers = #tpu.dot_dimension_numbers<[2], [2], [1], [1], [0, 0, 0, 1, 1, 1], [0], [0]>} : vector<2x8x16xf32>, vector<2x8x16xf32>, vector<2x8x8xf32> -> vector<2x8x8xf32>
    "tpu.trace_stop"() : () -> ()
    %cst_30 = arith.constant 2.500000e-01 : f32
    %64 = vector.broadcast %cst_30 : f32 to vector<2x8x8xf32>
    %65 = arith.mulf %63, %64 : vector<2x8x8xf32>
    %66 = vector.broadcast %29 : vector<2x1x8xf32> to vector<2x8x8xf32>
    %67 = arith.addf %65, %66 : vector<2x8x8xf32>
    %cst_31 = arith.constant dense<0xFF800000> : vector<2x8xf32>
    %68 = vector.multi_reduction <maximumf>, %67, %cst_31 [2] : vector<2x8x8xf32> to vector<2x8xf32>
    %69 = vector.shape_cast %68 : vector<2x8xf32> to vector<2x8x1xf32>
    %70 = vector.broadcast %69 : vector<2x8x1xf32> to vector<2x8x8xf32>
    %71 = arith.subf %67, %70 : vector<2x8x8xf32>
    %72 = math.exp %71 : vector<2x8x8xf32>
    %cst_32 = arith.constant dense<0.000000e+00> : vector<2x8xf32>
    %73 = vector.multi_reduction <add>, %72, %cst_32 [2] : vector<2x8x8xf32> to vector<2x8xf32>
    %74 = vector.shape_cast %73 : vector<2x8xf32> to vector<2x8x1xf32>
    %75 = tpu.reciprocal %74 {approx = true} : vector<2x8x1xf32> -> vector<2x8x1xf32>
    %76 = vector.broadcast %75 : vector<2x8x1xf32> to vector<2x8x8xf32>
    %77 = arith.mulf %72, %76 : vector<2x8x8xf32>
    "tpu.trace_start"() <{level = 10 : i32, message = "bqk,bkd->bqd"}> : () -> ()
    %cst_33 = arith.constant dense<0.000000e+00> : vector<2x8x16xf32>
    %78 = tpu.matmul %77, %62, %cst_33 {dimension_numbers = #tpu.dot_dimension_numbers<[2], [1], [1], [2], [0, 0, 0, 1, 1, 2], [0], [0]>} : vector<2x8x8xf32>, vector<2x8x16xf32>, vector<2x8x16xf32> -> vector<2x8x16xf32>
    "tpu.trace_stop"() : () -> ()
    %79 = vector.shape_cast %78 : vector<2x8x16xf32> to vector<16x16xf32>
    %c0_34 = arith.constant 0 : index
    %c0_35 = arith.constant 0 : index
    %c0_36 = arith.constant 0 : index
    %80 = vector.load %arg4[%c0_34, %c0_35, %c0_36] : memref<4x16x32xf32, #tpu.memory_space<vmem>>, vector<1x16x32xf32>
    %81 = vector.shape_cast %80 : vector<1x16x32xf32> to vector<16x32xf32>
    %cst_37 = arith.constant dense<0.000000e+00> : vector<16x32xf32>
    %82 = tpu.matmul %79, %81, %cst_37 {dimension_numbers = #tpu.dot_dimension_numbers<[1], [0], [0], [1], [0, 0, 1, 1], [], []>} : vector<16x16xf32>, vector<16x32xf32>, vector<16x32xf32> -> vector<16x32xf32>
    %c1_38 = arith.constant 1 : index
    %c0_39 = arith.constant 0 : index
    %c0_40 = arith.constant 0 : index
    %83 = vector.load %arg2[%c1_38, %c0_39, %c0_40] : memref<12x32x16xf32, #tpu.memory_space<vmem>>, vector<1x32x16xf32>
    %84 = vector.shape_cast %83 : vector<1x32x16xf32> to vector<32x16xf32>
    %cst_41 = arith.constant dense<0.000000e+00> : vector<16x16xf32>
    %85 = tpu.matmul %5, %84, %cst_41 {dimension_numbers = #tpu.dot_dimension_numbers<[1], [0], [0], [1], [0, 0, 1, 1], [], []>} : vector<16x32xf32>, vector<32x16xf32>, vector<16x16xf32> -> vector<16x16xf32>
    %c1_42 = arith.constant 1 : index
    %c0_43 = arith.constant 0 : index
    %c0_44 = arith.constant 0 : index
    %86 = vector.load %arg3[%c1_42, %c0_43, %c0_44] : memref<12x1x16xf32, #tpu.memory_space<vmem>>, vector<1x1x16xf32>
    %87 = vector.shape_cast %86 : vector<1x1x16xf32> to vector<1x16xf32>
    %88 = vector.broadcast %87 : vector<1x16xf32> to vector<16x16xf32>
    %89 = arith.addf %85, %88 : vector<16x16xf32>
    %c3 = arith.constant 3 : index
    %c0_45 = arith.constant 0 : index
    %c0_46 = arith.constant 0 : index
    %90 = vector.load %arg2[%c3, %c0_45, %c0_46] : memref<12x32x16xf32, #tpu.memory_space<vmem>>, vector<1x32x16xf32>
    %91 = vector.shape_cast %90 : vector<1x32x16xf32> to vector<32x16xf32>
    %cst_47 = arith.constant dense<0.000000e+00> : vector<16x16xf32>
    %92 = tpu.matmul %5, %91, %cst_47 {dimension_numbers = #tpu.dot_dimension_numbers<[1], [0], [0], [1], [0, 0, 1, 1], [], []>} : vector<16x32xf32>, vector<32x16xf32>, vector<16x16xf32> -> vector<16x16xf32>
    %c3_48 = arith.constant 3 : index
    %c0_49 = arith.constant 0 : index
    %c0_50 = arith.constant 0 : index
    %93 = vector.load %arg3[%c3_48, %c0_49, %c0_50] : memref<12x1x16xf32, #tpu.memory_space<vmem>>, vector<1x1x16xf32>
    %94 = vector.shape_cast %93 : vector<1x1x16xf32> to vector<1x16xf32>
    %95 = vector.broadcast %94 : vector<1x16xf32> to vector<16x16xf32>
    %96 = arith.addf %92, %95 : vector<16x16xf32>
    %c5 = arith.constant 5 : index
    %c0_51 = arith.constant 0 : index
    %c0_52 = arith.constant 0 : index
    %97 = vector.load %arg2[%c5, %c0_51, %c0_52] : memref<12x32x16xf32, #tpu.memory_space<vmem>>, vector<1x32x16xf32>
    %98 = vector.shape_cast %97 : vector<1x32x16xf32> to vector<32x16xf32>
    %cst_53 = arith.constant dense<0.000000e+00> : vector<16x16xf32>
    %99 = tpu.matmul %5, %98, %cst_53 {dimension_numbers = #tpu.dot_dimension_numbers<[1], [0], [0], [1], [0, 0, 1, 1], [], []>} : vector<16x32xf32>, vector<32x16xf32>, vector<16x16xf32> -> vector<16x16xf32>
    %c5_54 = arith.constant 5 : index
    %c0_55 = arith.constant 0 : index
    %c0_56 = arith.constant 0 : index
    %100 = vector.load %arg3[%c5_54, %c0_55, %c0_56] : memref<12x1x16xf32, #tpu.memory_space<vmem>>, vector<1x1x16xf32>
    %101 = vector.shape_cast %100 : vector<1x1x16xf32> to vector<1x16xf32>
    %102 = vector.broadcast %101 : vector<1x16xf32> to vector<16x16xf32>
    %103 = arith.addf %99, %102 : vector<16x16xf32>
    %104 = vector.shape_cast %89 : vector<16x16xf32> to vector<2x8x16xf32>
    %105 = vector.shape_cast %96 : vector<16x16xf32> to vector<2x8x16xf32>
    %106 = vector.shape_cast %103 : vector<16x16xf32> to vector<2x8x16xf32>
    "tpu.trace_start"() <{level = 10 : i32, message = "bqd,bkd->bqk"}> : () -> ()
    %cst_57 = arith.constant dense<0.000000e+00> : vector<2x8x8xf32>
    %107 = tpu.matmul %104, %105, %cst_57 {dimension_numbers = #tpu.dot_dimension_numbers<[2], [2], [1], [1], [0, 0, 0, 1, 1, 1], [0], [0]>} : vector<2x8x16xf32>, vector<2x8x16xf32>, vector<2x8x8xf32> -> vector<2x8x8xf32>
    "tpu.trace_stop"() : () -> ()
    %cst_58 = arith.constant 2.500000e-01 : f32
    %108 = vector.broadcast %cst_58 : f32 to vector<2x8x8xf32>
    %109 = arith.mulf %107, %108 : vector<2x8x8xf32>
    %110 = vector.broadcast %29 : vector<2x1x8xf32> to vector<2x8x8xf32>
    %111 = arith.addf %109, %110 : vector<2x8x8xf32>
    %cst_59 = arith.constant dense<0xFF800000> : vector<2x8xf32>
    %112 = vector.multi_reduction <maximumf>, %111, %cst_59 [2] : vector<2x8x8xf32> to vector<2x8xf32>
    %113 = vector.shape_cast %112 : vector<2x8xf32> to vector<2x8x1xf32>
    %114 = vector.broadcast %113 : vector<2x8x1xf32> to vector<2x8x8xf32>
    %115 = arith.subf %111, %114 : vector<2x8x8xf32>
    %116 = math.exp %115 : vector<2x8x8xf32>
    %cst_60 = arith.constant dense<0.000000e+00> : vector<2x8xf32>
    %117 = vector.multi_reduction <add>, %116, %cst_60 [2] : vector<2x8x8xf32> to vector<2x8xf32>
    %118 = vector.shape_cast %117 : vector<2x8xf32> to vector<2x8x1xf32>
    %119 = tpu.reciprocal %118 {approx = true} : vector<2x8x1xf32> -> vector<2x8x1xf32>
    %120 = vector.broadcast %119 : vector<2x8x1xf32> to vector<2x8x8xf32>
    %121 = arith.mulf %116, %120 : vector<2x8x8xf32>
    "tpu.trace_start"() <{level = 10 : i32, message = "bqk,bkd->bqd"}> : () -> ()
    %cst_61 = arith.constant dense<0.000000e+00> : vector<2x8x16xf32>
    %122 = tpu.matmul %121, %106, %cst_61 {dimension_numbers = #tpu.dot_dimension_numbers<[2], [1], [1], [2], [0, 0, 0, 1, 1, 2], [0], [0]>} : vector<2x8x8xf32>, vector<2x8x16xf32>, vector<2x8x16xf32> -> vector<2x8x16xf32>
    "tpu.trace_stop"() : () -> ()
    %123 = vector.shape_cast %122 : vector<2x8x16xf32> to vector<16x16xf32>
    %c1_62 = arith.constant 1 : index
    %c0_63 = arith.constant 0 : index
    %c0_64 = arith.constant 0 : index
    %124 = vector.load %arg4[%c1_62, %c0_63, %c0_64] : memref<4x16x32xf32, #tpu.memory_space<vmem>>, vector<1x16x32xf32>
    %125 = vector.shape_cast %124 : vector<1x16x32xf32> to vector<16x32xf32>
    %cst_65 = arith.constant dense<0.000000e+00> : vector<16x32xf32>
    %126 = tpu.matmul %123, %125, %cst_65 {dimension_numbers = #tpu.dot_dimension_numbers<[1], [0], [0], [1], [0, 0, 1, 1], [], []>} : vector<16x16xf32>, vector<16x32xf32>, vector<16x32xf32> -> vector<16x32xf32>
    %127 = arith.addf %82, %126 : vector<16x32xf32>
    %128 = vector.broadcast %33 : vector<1x32xf32> to vector<16x32xf32>
    %129 = arith.addf %127, %128 : vector<16x32xf32>
    %130 = arith.addf %129, %5 : vector<16x32xf32>
    %cst_66 = arith.constant dense<0.000000e+00> : vector<16xf32>
    %131 = vector.multi_reduction <add>, %130, %cst_66 [1] : vector<16x32xf32> to vector<16xf32>
    %132 = vector.shape_cast %131 : vector<16xf32> to vector<16x1xf32>
    %cst_67 = arith.constant 3.200000e+01 : f32
    %133 = vector.broadcast %cst_67 : f32 to vector<16x1xf32>
    %134 = arith.divf %132, %133 : vector<16x1xf32>
    %135 = arith.mulf %130, %130 : vector<16x32xf32>
    %cst_68 = arith.constant dense<0.000000e+00> : vector<16xf32>
    %136 = vector.multi_reduction <add>, %135, %cst_68 [1] : vector<16x32xf32> to vector<16xf32>
    %137 = vector.shape_cast %136 : vector<16xf32> to vector<16x1xf32>
    %cst_69 = arith.constant 3.200000e+01 : f32
    %138 = vector.broadcast %cst_69 : f32 to vector<16x1xf32>
    %139 = arith.divf %137, %138 : vector<16x1xf32>
    %140 = vector.broadcast %134 : vector<16x1xf32> to vector<16x32xf32>
    %141 = arith.subf %130, %140 : vector<16x32xf32>
    %142 = arith.mulf %134, %134 : vector<16x1xf32>
    %143 = arith.subf %139, %142 : vector<16x1xf32>
    %cst_70 = arith.constant 9.99999974E-6 : f32
    %144 = vector.broadcast %cst_70 : f32 to vector<16x1xf32>
    %145 = arith.addf %143, %144 : vector<16x1xf32>
    %146 = math.rsqrt %145 : vector<16x1xf32>
    %147 = vector.broadcast %146 : vector<16x1xf32> to vector<16x32xf32>
    %148 = arith.mulf %141, %147 : vector<16x32xf32>
    %149 = vector.broadcast %35 : vector<1x32xf32> to vector<16x32xf32>
    %150 = arith.mulf %148, %149 : vector<16x32xf32>
    %151 = vector.broadcast %36 : vector<1x32xf32> to vector<16x32xf32>
    %152 = arith.addf %150, %151 : vector<16x32xf32>
    %cst_71 = arith.constant 0.000000e+00 : f32
    %153 = vector.shape_cast %16 : vector<16x1xi1> to vector<16x1xi1>
    %154 = vector.broadcast %153 : vector<16x1xi1> to vector<16x32xi1>
    %155 = vector.broadcast %cst_71 : f32 to vector<16x32xf32>
    %156 = arith.select %154, %155, %152 : vector<16x32xi1>, vector<16x32xf32>
    %157 = vector.shape_cast %156 : vector<16x32xf32> to vector<2x8x32xf32>
    %c4_i32 = arith.constant 4 : i32
    %158 = tpu.dynamic_rotate %157 by %c4_i32 dim 1 : vector<2x8x32xf32>, i32 -> vector<2x8x32xf32>
    %c-4_i32 = arith.constant -4 : i32
    %159 = vector.broadcast %c-4_i32 : i32 to vector<1x8x1xi32>
    %160 = arith.addi %30, %159 : vector<1x8x1xi32>
    %c0_i32_72 = arith.constant 0 : i32
    %161 = vector.broadcast %c0_i32_72 : i32 to vector<1x8x1xi32>
    %162 = arith.cmpi sge, %160, %161 : vector<1x8x1xi32>
    %c-4_i32_73 = arith.constant -4 : i32
    %163 = vector.broadcast %c-4_i32_73 : i32 to vector<1x8x1xi32>
    %164 = arith.addi %30, %163 : vector<1x8x1xi32>
    %c8_i32 = arith.constant 8 : i32
    %165 = vector.broadcast %c8_i32 : i32 to vector<1x8x1xi32>
    %166 = arith.cmpi slt, %164, %165 : vector<1x8x1xi32>
    %167 = arith.andi %162, %166 : vector<1x8x1xi1>
    %cst_74 = arith.constant 0.000000e+00 : f32
    %168 = vector.shape_cast %167 : vector<1x8x1xi1> to vector<1x8x1xi1>
    %169 = vector.broadcast %168 : vector<1x8x1xi1> to vector<2x8x32xi1>
    %170 = vector.broadcast %cst_74 : f32 to vector<2x8x32xf32>
    %171 = arith.select %169, %158, %170 : vector<2x8x32xi1>, vector<2x8x32xf32>
    %172 = vector.shape_cast %171 : vector<2x8x32xf32> to vector<16x32xf32>
    %c0_75 = arith.constant 0 : index
    %c0_76 = arith.constant 0 : index
    %c0_77 = arith.constant 0 : index
    %173 = vector.load %arg5[%c0_75, %c0_76, %c0_77] : memref<18x32x64xf32, #tpu.memory_space<vmem>>, vector<1x32x64xf32>
    %174 = vector.shape_cast %173 : vector<1x32x64xf32> to vector<32x64xf32>
    %cst_78 = arith.constant dense<0.000000e+00> : vector<16x64xf32>
    %175 = tpu.matmul %172, %174, %cst_78 {dimension_numbers = #tpu.dot_dimension_numbers<[1], [0], [0], [1], [0, 0, 1, 1], [], []>} : vector<16x32xf32>, vector<32x64xf32>, vector<16x64xf32> -> vector<16x64xf32>
    %c3_i32 = arith.constant 3 : i32
    %176 = tpu.dynamic_rotate %157 by %c3_i32 dim 1 : vector<2x8x32xf32>, i32 -> vector<2x8x32xf32>
    %c-3_i32 = arith.constant -3 : i32
    %177 = vector.broadcast %c-3_i32 : i32 to vector<1x8x1xi32>
    %178 = arith.addi %30, %177 : vector<1x8x1xi32>
    %c0_i32_79 = arith.constant 0 : i32
    %179 = vector.broadcast %c0_i32_79 : i32 to vector<1x8x1xi32>
    %180 = arith.cmpi sge, %178, %179 : vector<1x8x1xi32>
    %c-3_i32_80 = arith.constant -3 : i32
    %181 = vector.broadcast %c-3_i32_80 : i32 to vector<1x8x1xi32>
    %182 = arith.addi %30, %181 : vector<1x8x1xi32>
    %c8_i32_81 = arith.constant 8 : i32
    %183 = vector.broadcast %c8_i32_81 : i32 to vector<1x8x1xi32>
    %184 = arith.cmpi slt, %182, %183 : vector<1x8x1xi32>
    %185 = arith.andi %180, %184 : vector<1x8x1xi1>
    %cst_82 = arith.constant 0.000000e+00 : f32
    %186 = vector.shape_cast %185 : vector<1x8x1xi1> to vector<1x8x1xi1>
    %187 = vector.broadcast %186 : vector<1x8x1xi1> to vector<2x8x32xi1>
    %188 = vector.broadcast %cst_82 : f32 to vector<2x8x32xf32>
    %189 = arith.select %187, %176, %188 : vector<2x8x32xi1>, vector<2x8x32xf32>
    %190 = vector.shape_cast %189 : vector<2x8x32xf32> to vector<16x32xf32>
    %c1_83 = arith.constant 1 : index
    %c0_84 = arith.constant 0 : index
    %c0_85 = arith.constant 0 : index
    %191 = vector.load %arg5[%c1_83, %c0_84, %c0_85] : memref<18x32x64xf32, #tpu.memory_space<vmem>>, vector<1x32x64xf32>
    %192 = vector.shape_cast %191 : vector<1x32x64xf32> to vector<32x64xf32>
    %cst_86 = arith.constant dense<0.000000e+00> : vector<16x64xf32>
    %193 = tpu.matmul %190, %192, %cst_86 {dimension_numbers = #tpu.dot_dimension_numbers<[1], [0], [0], [1], [0, 0, 1, 1], [], []>} : vector<16x32xf32>, vector<32x64xf32>, vector<16x64xf32> -> vector<16x64xf32>
    %194 = arith.addf %175, %193 : vector<16x64xf32>
    %c2_i32 = arith.constant 2 : i32
    %195 = tpu.dynamic_rotate %157 by %c2_i32 dim 1 : vector<2x8x32xf32>, i32 -> vector<2x8x32xf32>
    %c-2_i32 = arith.constant -2 : i32
    %196 = vector.broadcast %c-2_i32 : i32 to vector<1x8x1xi32>
    %197 = arith.addi %30, %196 : vector<1x8x1xi32>
    %c0_i32_87 = arith.constant 0 : i32
    %198 = vector.broadcast %c0_i32_87 : i32 to vector<1x8x1xi32>
    %199 = arith.cmpi sge, %197, %198 : vector<1x8x1xi32>
    %c-2_i32_88 = arith.constant -2 : i32
    %200 = vector.broadcast %c-2_i32_88 : i32 to vector<1x8x1xi32>
    %201 = arith.addi %30, %200 : vector<1x8x1xi32>
    %c8_i32_89 = arith.constant 8 : i32
    %202 = vector.broadcast %c8_i32_89 : i32 to vector<1x8x1xi32>
    %203 = arith.cmpi slt, %201, %202 : vector<1x8x1xi32>
    %204 = arith.andi %199, %203 : vector<1x8x1xi1>
    %cst_90 = arith.constant 0.000000e+00 : f32
    %205 = vector.shape_cast %204 : vector<1x8x1xi1> to vector<1x8x1xi1>
    %206 = vector.broadcast %205 : vector<1x8x1xi1> to vector<2x8x32xi1>
    %207 = vector.broadcast %cst_90 : f32 to vector<2x8x32xf32>
    %208 = arith.select %206, %195, %207 : vector<2x8x32xi1>, vector<2x8x32xf32>
    %209 = vector.shape_cast %208 : vector<2x8x32xf32> to vector<16x32xf32>
    %c2_91 = arith.constant 2 : index
    %c0_92 = arith.constant 0 : index
    %c0_93 = arith.constant 0 : index
    %210 = vector.load %arg5[%c2_91, %c0_92, %c0_93] : memref<18x32x64xf32, #tpu.memory_space<vmem>>, vector<1x32x64xf32>
    %211 = vector.shape_cast %210 : vector<1x32x64xf32> to vector<32x64xf32>
    %cst_94 = arith.constant dense<0.000000e+00> : vector<16x64xf32>
    %212 = tpu.matmul %209, %211, %cst_94 {dimension_numbers = #tpu.dot_dimension_numbers<[1], [0], [0], [1], [0, 0, 1, 1], [], []>} : vector<16x32xf32>, vector<32x64xf32>, vector<16x64xf32> -> vector<16x64xf32>
    %213 = arith.addf %194, %212 : vector<16x64xf32>
    %c1_i32 = arith.constant 1 : i32
    %214 = tpu.dynamic_rotate %157 by %c1_i32 dim 1 : vector<2x8x32xf32>, i32 -> vector<2x8x32xf32>
    %c-1_i32 = arith.constant -1 : i32
    %215 = vector.broadcast %c-1_i32 : i32 to vector<1x8x1xi32>
    %216 = arith.addi %30, %215 : vector<1x8x1xi32>
    %c0_i32_95 = arith.constant 0 : i32
    %217 = vector.broadcast %c0_i32_95 : i32 to vector<1x8x1xi32>
    %218 = arith.cmpi sge, %216, %217 : vector<1x8x1xi32>
    %c-1_i32_96 = arith.constant -1 : i32
    %219 = vector.broadcast %c-1_i32_96 : i32 to vector<1x8x1xi32>
    %220 = arith.addi %30, %219 : vector<1x8x1xi32>
    %c8_i32_97 = arith.constant 8 : i32
    %221 = vector.broadcast %c8_i32_97 : i32 to vector<1x8x1xi32>
    %222 = arith.cmpi slt, %220, %221 : vector<1x8x1xi32>
    %223 = arith.andi %218, %222 : vector<1x8x1xi1>
    %cst_98 = arith.constant 0.000000e+00 : f32
    %224 = vector.shape_cast %223 : vector<1x8x1xi1> to vector<1x8x1xi1>
    %225 = vector.broadcast %224 : vector<1x8x1xi1> to vector<2x8x32xi1>
    %226 = vector.broadcast %cst_98 : f32 to vector<2x8x32xf32>
    %227 = arith.select %225, %214, %226 : vector<2x8x32xi1>, vector<2x8x32xf32>
    %228 = vector.shape_cast %227 : vector<2x8x32xf32> to vector<16x32xf32>
    %c3_99 = arith.constant 3 : index
    %c0_100 = arith.constant 0 : index
    %c0_101 = arith.constant 0 : index
    %229 = vector.load %arg5[%c3_99, %c0_100, %c0_101] : memref<18x32x64xf32, #tpu.memory_space<vmem>>, vector<1x32x64xf32>
    %230 = vector.shape_cast %229 : vector<1x32x64xf32> to vector<32x64xf32>
    %cst_102 = arith.constant dense<0.000000e+00> : vector<16x64xf32>
    %231 = tpu.matmul %228, %230, %cst_102 {dimension_numbers = #tpu.dot_dimension_numbers<[1], [0], [0], [1], [0, 0, 1, 1], [], []>} : vector<16x32xf32>, vector<32x64xf32>, vector<16x64xf32> -> vector<16x64xf32>
    %232 = arith.addf %213, %231 : vector<16x64xf32>
    %233 = vector.shape_cast %157 : vector<2x8x32xf32> to vector<16x32xf32>
    %c4_103 = arith.constant 4 : index
    %c0_104 = arith.constant 0 : index
    %c0_105 = arith.constant 0 : index
    %234 = vector.load %arg5[%c4_103, %c0_104, %c0_105] : memref<18x32x64xf32, #tpu.memory_space<vmem>>, vector<1x32x64xf32>
    %235 = vector.shape_cast %234 : vector<1x32x64xf32> to vector<32x64xf32>
    %cst_106 = arith.constant dense<0.000000e+00> : vector<16x64xf32>
    %236 = tpu.matmul %233, %235, %cst_106 {dimension_numbers = #tpu.dot_dimension_numbers<[1], [0], [0], [1], [0, 0, 1, 1], [], []>} : vector<16x32xf32>, vector<32x64xf32>, vector<16x64xf32> -> vector<16x64xf32>
    %237 = arith.addf %232, %236 : vector<16x64xf32>
    %c7_i32 = arith.constant 7 : i32
    %238 = tpu.dynamic_rotate %157 by %c7_i32 dim 1 : vector<2x8x32xf32>, i32 -> vector<2x8x32xf32>
    %c1_i32_107 = arith.constant 1 : i32
    %239 = vector.broadcast %c1_i32_107 : i32 to vector<1x8x1xi32>
    %240 = arith.addi %30, %239 : vector<1x8x1xi32>
    %c0_i32_108 = arith.constant 0 : i32
    %241 = vector.broadcast %c0_i32_108 : i32 to vector<1x8x1xi32>
    %242 = arith.cmpi sge, %240, %241 : vector<1x8x1xi32>
    %c1_i32_109 = arith.constant 1 : i32
    %243 = vector.broadcast %c1_i32_109 : i32 to vector<1x8x1xi32>
    %244 = arith.addi %30, %243 : vector<1x8x1xi32>
    %c8_i32_110 = arith.constant 8 : i32
    %245 = vector.broadcast %c8_i32_110 : i32 to vector<1x8x1xi32>
    %246 = arith.cmpi slt, %244, %245 : vector<1x8x1xi32>
    %247 = arith.andi %242, %246 : vector<1x8x1xi1>
    %cst_111 = arith.constant 0.000000e+00 : f32
    %248 = vector.shape_cast %247 : vector<1x8x1xi1> to vector<1x8x1xi1>
    %249 = vector.broadcast %248 : vector<1x8x1xi1> to vector<2x8x32xi1>
    %250 = vector.broadcast %cst_111 : f32 to vector<2x8x32xf32>
    %251 = arith.select %249, %238, %250 : vector<2x8x32xi1>, vector<2x8x32xf32>
    %252 = vector.shape_cast %251 : vector<2x8x32xf32> to vector<16x32xf32>
    %c5_112 = arith.constant 5 : index
    %c0_113 = arith.constant 0 : index
    %c0_114 = arith.constant 0 : index
    %253 = vector.load %arg5[%c5_112, %c0_113, %c0_114] : memref<18x32x64xf32, #tpu.memory_space<vmem>>, vector<1x32x64xf32>
    %254 = vector.shape_cast %253 : vector<1x32x64xf32> to vector<32x64xf32>
    %cst_115 = arith.constant dense<0.000000e+00> : vector<16x64xf32>
    %255 = tpu.matmul %252, %254, %cst_115 {dimension_numbers = #tpu.dot_dimension_numbers<[1], [0], [0], [1], [0, 0, 1, 1], [], []>} : vector<16x32xf32>, vector<32x64xf32>, vector<16x64xf32> -> vector<16x64xf32>
    %256 = arith.addf %237, %255 : vector<16x64xf32>
    %c6_i32 = arith.constant 6 : i32
    %257 = tpu.dynamic_rotate %157 by %c6_i32 dim 1 : vector<2x8x32xf32>, i32 -> vector<2x8x32xf32>
    %c2_i32_116 = arith.constant 2 : i32
    %258 = vector.broadcast %c2_i32_116 : i32 to vector<1x8x1xi32>
    %259 = arith.addi %30, %258 : vector<1x8x1xi32>
    %c0_i32_117 = arith.constant 0 : i32
    %260 = vector.broadcast %c0_i32_117 : i32 to vector<1x8x1xi32>
    %261 = arith.cmpi sge, %259, %260 : vector<1x8x1xi32>
    %c2_i32_118 = arith.constant 2 : i32
    %262 = vector.broadcast %c2_i32_118 : i32 to vector<1x8x1xi32>
    %263 = arith.addi %30, %262 : vector<1x8x1xi32>
    %c8_i32_119 = arith.constant 8 : i32
    %264 = vector.broadcast %c8_i32_119 : i32 to vector<1x8x1xi32>
    %265 = arith.cmpi slt, %263, %264 : vector<1x8x1xi32>
    %266 = arith.andi %261, %265 : vector<1x8x1xi1>
    %cst_120 = arith.constant 0.000000e+00 : f32
    %267 = vector.shape_cast %266 : vector<1x8x1xi1> to vector<1x8x1xi1>
    %268 = vector.broadcast %267 : vector<1x8x1xi1> to vector<2x8x32xi1>
    %269 = vector.broadcast %cst_120 : f32 to vector<2x8x32xf32>
    %270 = arith.select %268, %257, %269 : vector<2x8x32xi1>, vector<2x8x32xf32>
    %271 = vector.shape_cast %270 : vector<2x8x32xf32> to vector<16x32xf32>
    %c6 = arith.constant 6 : index
    %c0_121 = arith.constant 0 : index
    %c0_122 = arith.constant 0 : index
    %272 = vector.load %arg5[%c6, %c0_121, %c0_122] : memref<18x32x64xf32, #tpu.memory_space<vmem>>, vector<1x32x64xf32>
    %273 = vector.shape_cast %272 : vector<1x32x64xf32> to vector<32x64xf32>
    %cst_123 = arith.constant dense<0.000000e+00> : vector<16x64xf32>
    %274 = tpu.matmul %271, %273, %cst_123 {dimension_numbers = #tpu.dot_dimension_numbers<[1], [0], [0], [1], [0, 0, 1, 1], [], []>} : vector<16x32xf32>, vector<32x64xf32>, vector<16x64xf32> -> vector<16x64xf32>
    %275 = arith.addf %256, %274 : vector<16x64xf32>
    %c5_i32 = arith.constant 5 : i32
    %276 = tpu.dynamic_rotate %157 by %c5_i32 dim 1 : vector<2x8x32xf32>, i32 -> vector<2x8x32xf32>
    %c3_i32_124 = arith.constant 3 : i32
    %277 = vector.broadcast %c3_i32_124 : i32 to vector<1x8x1xi32>
    %278 = arith.addi %30, %277 : vector<1x8x1xi32>
    %c0_i32_125 = arith.constant 0 : i32
    %279 = vector.broadcast %c0_i32_125 : i32 to vector<1x8x1xi32>
    %280 = arith.cmpi sge, %278, %279 : vector<1x8x1xi32>
    %c3_i32_126 = arith.constant 3 : i32
    %281 = vector.broadcast %c3_i32_126 : i32 to vector<1x8x1xi32>
    %282 = arith.addi %30, %281 : vector<1x8x1xi32>
    %c8_i32_127 = arith.constant 8 : i32
    %283 = vector.broadcast %c8_i32_127 : i32 to vector<1x8x1xi32>
    %284 = arith.cmpi slt, %282, %283 : vector<1x8x1xi32>
    %285 = arith.andi %280, %284 : vector<1x8x1xi1>
    %cst_128 = arith.constant 0.000000e+00 : f32
    %286 = vector.shape_cast %285 : vector<1x8x1xi1> to vector<1x8x1xi1>
    %287 = vector.broadcast %286 : vector<1x8x1xi1> to vector<2x8x32xi1>
    %288 = vector.broadcast %cst_128 : f32 to vector<2x8x32xf32>
    %289 = arith.select %287, %276, %288 : vector<2x8x32xi1>, vector<2x8x32xf32>
    %290 = vector.shape_cast %289 : vector<2x8x32xf32> to vector<16x32xf32>
    %c7 = arith.constant 7 : index
    %c0_129 = arith.constant 0 : index
    %c0_130 = arith.constant 0 : index
    %291 = vector.load %arg5[%c7, %c0_129, %c0_130] : memref<18x32x64xf32, #tpu.memory_space<vmem>>, vector<1x32x64xf32>
    %292 = vector.shape_cast %291 : vector<1x32x64xf32> to vector<32x64xf32>
    %cst_131 = arith.constant dense<0.000000e+00> : vector<16x64xf32>
    %293 = tpu.matmul %290, %292, %cst_131 {dimension_numbers = #tpu.dot_dimension_numbers<[1], [0], [0], [1], [0, 0, 1, 1], [], []>} : vector<16x32xf32>, vector<32x64xf32>, vector<16x64xf32> -> vector<16x64xf32>
    %294 = arith.addf %275, %293 : vector<16x64xf32>
    %c4_i32_132 = arith.constant 4 : i32
    %295 = tpu.dynamic_rotate %157 by %c4_i32_132 dim 1 : vector<2x8x32xf32>, i32 -> vector<2x8x32xf32>
    %c4_i32_133 = arith.constant 4 : i32
    %296 = vector.broadcast %c4_i32_133 : i32 to vector<1x8x1xi32>
    %297 = arith.addi %30, %296 : vector<1x8x1xi32>
    %c0_i32_134 = arith.constant 0 : i32
    %298 = vector.broadcast %c0_i32_134 : i32 to vector<1x8x1xi32>
    %299 = arith.cmpi sge, %297, %298 : vector<1x8x1xi32>
    %c4_i32_135 = arith.constant 4 : i32
    %300 = vector.broadcast %c4_i32_135 : i32 to vector<1x8x1xi32>
    %301 = arith.addi %30, %300 : vector<1x8x1xi32>
    %c8_i32_136 = arith.constant 8 : i32
    %302 = vector.broadcast %c8_i32_136 : i32 to vector<1x8x1xi32>
    %303 = arith.cmpi slt, %301, %302 : vector<1x8x1xi32>
    %304 = arith.andi %299, %303 : vector<1x8x1xi1>
    %cst_137 = arith.constant 0.000000e+00 : f32
    %305 = vector.shape_cast %304 : vector<1x8x1xi1> to vector<1x8x1xi1>
    %306 = vector.broadcast %305 : vector<1x8x1xi1> to vector<2x8x32xi1>
    %307 = vector.broadcast %cst_137 : f32 to vector<2x8x32xf32>
    %308 = arith.select %306, %295, %307 : vector<2x8x32xi1>, vector<2x8x32xf32>
    %309 = vector.shape_cast %308 : vector<2x8x32xf32> to vector<16x32xf32>
    %c8 = arith.constant 8 : index
    %c0_138 = arith.constant 0 : index
    %c0_139 = arith.constant 0 : index
    %310 = vector.load %arg5[%c8, %c0_138, %c0_139] : memref<18x32x64xf32, #tpu.memory_space<vmem>>, vector<1x32x64xf32>
    %311 = vector.shape_cast %310 : vector<1x32x64xf32> to vector<32x64xf32>
    %cst_140 = arith.constant dense<0.000000e+00> : vector<16x64xf32>
    %312 = tpu.matmul %309, %311, %cst_140 {dimension_numbers = #tpu.dot_dimension_numbers<[1], [0], [0], [1], [0, 0, 1, 1], [], []>} : vector<16x32xf32>, vector<32x64xf32>, vector<16x64xf32> -> vector<16x64xf32>
    %313 = arith.addf %294, %312 : vector<16x64xf32>
    %c0_141 = arith.constant 0 : index
    %c0_142 = arith.constant 0 : index
    %c0_143 = arith.constant 0 : index
    %314 = vector.load %arg6[%c0_141, %c0_142, %c0_143] : memref<2x1x64xf32, #tpu.memory_space<vmem>>, vector<1x1x64xf32>
    %315 = vector.shape_cast %314 : vector<1x1x64xf32> to vector<1x64xf32>
    %316 = vector.broadcast %315 : vector<1x64xf32> to vector<16x64xf32>
    %317 = arith.addf %313, %316 : vector<16x64xf32>
    %cst_144 = arith.constant 0.000000e+00 : f32
    %318 = vector.broadcast %cst_144 : f32 to vector<16x64xf32>
    %319 = arith.maximumf %317, %318 : vector<16x64xf32>
    %c0_145 = arith.constant 0 : index
    %c0_146 = arith.constant 0 : index
    %c0_147 = arith.constant 0 : index
    %320 = vector.load %arg7[%c0_145, %c0_146, %c0_147] : memref<2x64x32xf32, #tpu.memory_space<vmem>>, vector<1x64x32xf32>
    %321 = vector.shape_cast %320 : vector<1x64x32xf32> to vector<64x32xf32>
    %cst_148 = arith.constant dense<0.000000e+00> : vector<16x32xf32>
    %322 = tpu.matmul %319, %321, %cst_148 {dimension_numbers = #tpu.dot_dimension_numbers<[1], [0], [0], [1], [0, 0, 1, 1], [], []>} : vector<16x64xf32>, vector<64x32xf32>, vector<16x32xf32> -> vector<16x32xf32>
    %323 = vector.broadcast %34 : vector<1x32xf32> to vector<16x32xf32>
    %324 = arith.addf %322, %323 : vector<16x32xf32>
    %325 = arith.addf %324, %156 : vector<16x32xf32>
    %cst_149 = arith.constant dense<0.000000e+00> : vector<16xf32>
    %326 = vector.multi_reduction <add>, %325, %cst_149 [1] : vector<16x32xf32> to vector<16xf32>
    %327 = vector.shape_cast %326 : vector<16xf32> to vector<16x1xf32>
    %cst_150 = arith.constant 3.200000e+01 : f32
    %328 = vector.broadcast %cst_150 : f32 to vector<16x1xf32>
    %329 = arith.divf %327, %328 : vector<16x1xf32>
    %330 = arith.mulf %325, %325 : vector<16x32xf32>
    %cst_151 = arith.constant dense<0.000000e+00> : vector<16xf32>
    %331 = vector.multi_reduction <add>, %330, %cst_151 [1] : vector<16x32xf32> to vector<16xf32>
    %332 = vector.shape_cast %331 : vector<16xf32> to vector<16x1xf32>
    %cst_152 = arith.constant 3.200000e+01 : f32
    %333 = vector.broadcast %cst_152 : f32 to vector<16x1xf32>
    %334 = arith.divf %332, %333 : vector<16x1xf32>
    %335 = vector.broadcast %329 : vector<16x1xf32> to vector<16x32xf32>
    %336 = arith.subf %325, %335 : vector<16x32xf32>
    %337 = arith.mulf %329, %329 : vector<16x1xf32>
    %338 = arith.subf %334, %337 : vector<16x1xf32>
    %cst_153 = arith.constant 9.99999974E-6 : f32
    %339 = vector.broadcast %cst_153 : f32 to vector<16x1xf32>
    %340 = arith.addf %338, %339 : vector<16x1xf32>
    %341 = math.rsqrt %340 : vector<16x1xf32>
    %342 = vector.broadcast %341 : vector<16x1xf32> to vector<16x32xf32>
    %343 = arith.mulf %336, %342 : vector<16x32xf32>
    %344 = vector.broadcast %37 : vector<1x32xf32> to vector<16x32xf32>
    %345 = arith.mulf %343, %344 : vector<16x32xf32>
    %346 = vector.broadcast %38 : vector<1x32xf32> to vector<16x32xf32>
    %347 = arith.addf %345, %346 : vector<16x32xf32>
    %cst_154 = arith.constant 0.000000e+00 : f32
    %348 = vector.shape_cast %16 : vector<16x1xi1> to vector<16x1xi1>
    %349 = vector.broadcast %348 : vector<16x1xi1> to vector<16x32xi1>
    %350 = vector.broadcast %cst_154 : f32 to vector<16x32xf32>
    %351 = arith.select %349, %350, %347 : vector<16x32xi1>, vector<16x32xf32>
    %c1_155 = arith.constant 1 : index
    %c0_156 = arith.constant 0 : index
    %c0_157 = arith.constant 0 : index
    %352 = vector.load %arg8[%c1_155, %c0_156, %c0_157] : memref<2x6x32xf32, #tpu.memory_space<vmem>>, vector<1x6x32xf32>
    %353 = vector.shape_cast %352 : vector<1x6x32xf32> to vector<6x32xf32>
    %354 = vector.extract_strided_slice %353 {offsets = [0, 0], sizes = [1, 32], strides = [1, 1]} : vector<6x32xf32> to vector<1x32xf32>
    %355 = vector.extract_strided_slice %353 {offsets = [1, 0], sizes = [1, 32], strides = [1, 1]} : vector<6x32xf32> to vector<1x32xf32>
    %356 = vector.extract_strided_slice %353 {offsets = [2, 0], sizes = [1, 32], strides = [1, 1]} : vector<6x32xf32> to vector<1x32xf32>
    %357 = vector.extract_strided_slice %353 {offsets = [3, 0], sizes = [1, 32], strides = [1, 1]} : vector<6x32xf32> to vector<1x32xf32>
    %358 = vector.extract_strided_slice %353 {offsets = [4, 0], sizes = [1, 32], strides = [1, 1]} : vector<6x32xf32> to vector<1x32xf32>
    %359 = vector.extract_strided_slice %353 {offsets = [5, 0], sizes = [1, 32], strides = [1, 1]} : vector<6x32xf32> to vector<1x32xf32>
    %c6_158 = arith.constant 6 : index
    %c0_159 = arith.constant 0 : index
    %c0_160 = arith.constant 0 : index
    %360 = vector.load %arg2[%c6_158, %c0_159, %c0_160] : memref<12x32x16xf32, #tpu.memory_space<vmem>>, vector<1x32x16xf32>
    %361 = vector.shape_cast %360 : vector<1x32x16xf32> to vector<32x16xf32>
    %cst_161 = arith.constant dense<0.000000e+00> : vector<16x16xf32>
    %362 = tpu.matmul %351, %361, %cst_161 {dimension_numbers = #tpu.dot_dimension_numbers<[1], [0], [0], [1], [0, 0, 1, 1], [], []>} : vector<16x32xf32>, vector<32x16xf32>, vector<16x16xf32> -> vector<16x16xf32>
    %c6_162 = arith.constant 6 : index
    %c0_163 = arith.constant 0 : index
    %c0_164 = arith.constant 0 : index
    %363 = vector.load %arg3[%c6_162, %c0_163, %c0_164] : memref<12x1x16xf32, #tpu.memory_space<vmem>>, vector<1x1x16xf32>
    %364 = vector.shape_cast %363 : vector<1x1x16xf32> to vector<1x16xf32>
    %365 = vector.broadcast %364 : vector<1x16xf32> to vector<16x16xf32>
    %366 = arith.addf %362, %365 : vector<16x16xf32>
    %c8_165 = arith.constant 8 : index
    %c0_166 = arith.constant 0 : index
    %c0_167 = arith.constant 0 : index
    %367 = vector.load %arg2[%c8_165, %c0_166, %c0_167] : memref<12x32x16xf32, #tpu.memory_space<vmem>>, vector<1x32x16xf32>
    %368 = vector.shape_cast %367 : vector<1x32x16xf32> to vector<32x16xf32>
    %cst_168 = arith.constant dense<0.000000e+00> : vector<16x16xf32>
    %369 = tpu.matmul %351, %368, %cst_168 {dimension_numbers = #tpu.dot_dimension_numbers<[1], [0], [0], [1], [0, 0, 1, 1], [], []>} : vector<16x32xf32>, vector<32x16xf32>, vector<16x16xf32> -> vector<16x16xf32>
    %c8_169 = arith.constant 8 : index
    %c0_170 = arith.constant 0 : index
    %c0_171 = arith.constant 0 : index
    %370 = vector.load %arg3[%c8_169, %c0_170, %c0_171] : memref<12x1x16xf32, #tpu.memory_space<vmem>>, vector<1x1x16xf32>
    %371 = vector.shape_cast %370 : vector<1x1x16xf32> to vector<1x16xf32>
    %372 = vector.broadcast %371 : vector<1x16xf32> to vector<16x16xf32>
    %373 = arith.addf %369, %372 : vector<16x16xf32>
    %c10 = arith.constant 10 : index
    %c0_172 = arith.constant 0 : index
    %c0_173 = arith.constant 0 : index
    %374 = vector.load %arg2[%c10, %c0_172, %c0_173] : memref<12x32x16xf32, #tpu.memory_space<vmem>>, vector<1x32x16xf32>
    %375 = vector.shape_cast %374 : vector<1x32x16xf32> to vector<32x16xf32>
    %cst_174 = arith.constant dense<0.000000e+00> : vector<16x16xf32>
    %376 = tpu.matmul %351, %375, %cst_174 {dimension_numbers = #tpu.dot_dimension_numbers<[1], [0], [0], [1], [0, 0, 1, 1], [], []>} : vector<16x32xf32>, vector<32x16xf32>, vector<16x16xf32> -> vector<16x16xf32>
    %c10_175 = arith.constant 10 : index
    %c0_176 = arith.constant 0 : index
    %c0_177 = arith.constant 0 : index
    %377 = vector.load %arg3[%c10_175, %c0_176, %c0_177] : memref<12x1x16xf32, #tpu.memory_space<vmem>>, vector<1x1x16xf32>
    %378 = vector.shape_cast %377 : vector<1x1x16xf32> to vector<1x16xf32>
    %379 = vector.broadcast %378 : vector<1x16xf32> to vector<16x16xf32>
    %380 = arith.addf %376, %379 : vector<16x16xf32>
    %381 = vector.shape_cast %366 : vector<16x16xf32> to vector<2x8x16xf32>
    %382 = vector.shape_cast %373 : vector<16x16xf32> to vector<2x8x16xf32>
    %383 = vector.shape_cast %380 : vector<16x16xf32> to vector<2x8x16xf32>
    "tpu.trace_start"() <{level = 10 : i32, message = "bqd,bkd->bqk"}> : () -> ()
    %cst_178 = arith.constant dense<0.000000e+00> : vector<2x8x8xf32>
    %384 = tpu.matmul %381, %382, %cst_178 {dimension_numbers = #tpu.dot_dimension_numbers<[2], [2], [1], [1], [0, 0, 0, 1, 1, 1], [0], [0]>} : vector<2x8x16xf32>, vector<2x8x16xf32>, vector<2x8x8xf32> -> vector<2x8x8xf32>
    "tpu.trace_stop"() : () -> ()
    %cst_179 = arith.constant 2.500000e-01 : f32
    %385 = vector.broadcast %cst_179 : f32 to vector<2x8x8xf32>
    %386 = arith.mulf %384, %385 : vector<2x8x8xf32>
    %387 = vector.broadcast %29 : vector<2x1x8xf32> to vector<2x8x8xf32>
    %388 = arith.addf %386, %387 : vector<2x8x8xf32>
    %cst_180 = arith.constant dense<0xFF800000> : vector<2x8xf32>
    %389 = vector.multi_reduction <maximumf>, %388, %cst_180 [2] : vector<2x8x8xf32> to vector<2x8xf32>
    %390 = vector.shape_cast %389 : vector<2x8xf32> to vector<2x8x1xf32>
    %391 = vector.broadcast %390 : vector<2x8x1xf32> to vector<2x8x8xf32>
    %392 = arith.subf %388, %391 : vector<2x8x8xf32>
    %393 = math.exp %392 : vector<2x8x8xf32>
    %cst_181 = arith.constant dense<0.000000e+00> : vector<2x8xf32>
    %394 = vector.multi_reduction <add>, %393, %cst_181 [2] : vector<2x8x8xf32> to vector<2x8xf32>
    %395 = vector.shape_cast %394 : vector<2x8xf32> to vector<2x8x1xf32>
    %396 = tpu.reciprocal %395 {approx = true} : vector<2x8x1xf32> -> vector<2x8x1xf32>
    %397 = vector.broadcast %396 : vector<2x8x1xf32> to vector<2x8x8xf32>
    %398 = arith.mulf %393, %397 : vector<2x8x8xf32>
    "tpu.trace_start"() <{level = 10 : i32, message = "bqk,bkd->bqd"}> : () -> ()
    %cst_182 = arith.constant dense<0.000000e+00> : vector<2x8x16xf32>
    %399 = tpu.matmul %398, %383, %cst_182 {dimension_numbers = #tpu.dot_dimension_numbers<[2], [1], [1], [2], [0, 0, 0, 1, 1, 2], [0], [0]>} : vector<2x8x8xf32>, vector<2x8x16xf32>, vector<2x8x16xf32> -> vector<2x8x16xf32>
    "tpu.trace_stop"() : () -> ()
    %400 = vector.shape_cast %399 : vector<2x8x16xf32> to vector<16x16xf32>
    %c2_183 = arith.constant 2 : index
    %c0_184 = arith.constant 0 : index
    %c0_185 = arith.constant 0 : index
    %401 = vector.load %arg4[%c2_183, %c0_184, %c0_185] : memref<4x16x32xf32, #tpu.memory_space<vmem>>, vector<1x16x32xf32>
    %402 = vector.shape_cast %401 : vector<1x16x32xf32> to vector<16x32xf32>
    %cst_186 = arith.constant dense<0.000000e+00> : vector<16x32xf32>
    %403 = tpu.matmul %400, %402, %cst_186 {dimension_numbers = #tpu.dot_dimension_numbers<[1], [0], [0], [1], [0, 0, 1, 1], [], []>} : vector<16x16xf32>, vector<16x32xf32>, vector<16x32xf32> -> vector<16x32xf32>
    %c7_187 = arith.constant 7 : index
    %c0_188 = arith.constant 0 : index
    %c0_189 = arith.constant 0 : index
    %404 = vector.load %arg2[%c7_187, %c0_188, %c0_189] : memref<12x32x16xf32, #tpu.memory_space<vmem>>, vector<1x32x16xf32>
    %405 = vector.shape_cast %404 : vector<1x32x16xf32> to vector<32x16xf32>
    %cst_190 = arith.constant dense<0.000000e+00> : vector<16x16xf32>
    %406 = tpu.matmul %351, %405, %cst_190 {dimension_numbers = #tpu.dot_dimension_numbers<[1], [0], [0], [1], [0, 0, 1, 1], [], []>} : vector<16x32xf32>, vector<32x16xf32>, vector<16x16xf32> -> vector<16x16xf32>
    %c7_191 = arith.constant 7 : index
    %c0_192 = arith.constant 0 : index
    %c0_193 = arith.constant 0 : index
    %407 = vector.load %arg3[%c7_191, %c0_192, %c0_193] : memref<12x1x16xf32, #tpu.memory_space<vmem>>, vector<1x1x16xf32>
    %408 = vector.shape_cast %407 : vector<1x1x16xf32> to vector<1x16xf32>
    %409 = vector.broadcast %408 : vector<1x16xf32> to vector<16x16xf32>
    %410 = arith.addf %406, %409 : vector<16x16xf32>
    %c9 = arith.constant 9 : index
    %c0_194 = arith.constant 0 : index
    %c0_195 = arith.constant 0 : index
    %411 = vector.load %arg2[%c9, %c0_194, %c0_195] : memref<12x32x16xf32, #tpu.memory_space<vmem>>, vector<1x32x16xf32>
    %412 = vector.shape_cast %411 : vector<1x32x16xf32> to vector<32x16xf32>
    %cst_196 = arith.constant dense<0.000000e+00> : vector<16x16xf32>
    %413 = tpu.matmul %351, %412, %cst_196 {dimension_numbers = #tpu.dot_dimension_numbers<[1], [0], [0], [1], [0, 0, 1, 1], [], []>} : vector<16x32xf32>, vector<32x16xf32>, vector<16x16xf32> -> vector<16x16xf32>
    %c9_197 = arith.constant 9 : index
    %c0_198 = arith.constant 0 : index
    %c0_199 = arith.constant 0 : index
    %414 = vector.load %arg3[%c9_197, %c0_198, %c0_199] : memref<12x1x16xf32, #tpu.memory_space<vmem>>, vector<1x1x16xf32>
    %415 = vector.shape_cast %414 : vector<1x1x16xf32> to vector<1x16xf32>
    %416 = vector.broadcast %415 : vector<1x16xf32> to vector<16x16xf32>
    %417 = arith.addf %413, %416 : vector<16x16xf32>
    %c11 = arith.constant 11 : index
    %c0_200 = arith.constant 0 : index
    %c0_201 = arith.constant 0 : index
    %418 = vector.load %arg2[%c11, %c0_200, %c0_201] : memref<12x32x16xf32, #tpu.memory_space<vmem>>, vector<1x32x16xf32>
    %419 = vector.shape_cast %418 : vector<1x32x16xf32> to vector<32x16xf32>
    %cst_202 = arith.constant dense<0.000000e+00> : vector<16x16xf32>
    %420 = tpu.matmul %351, %419, %cst_202 {dimension_numbers = #tpu.dot_dimension_numbers<[1], [0], [0], [1], [0, 0, 1, 1], [], []>} : vector<16x32xf32>, vector<32x16xf32>, vector<16x16xf32> -> vector<16x16xf32>
    %c11_203 = arith.constant 11 : index
    %c0_204 = arith.constant 0 : index
    %c0_205 = arith.constant 0 : index
    %421 = vector.load %arg3[%c11_203, %c0_204, %c0_205] : memref<12x1x16xf32, #tpu.memory_space<vmem>>, vector<1x1x16xf32>
    %422 = vector.shape_cast %421 : vector<1x1x16xf32> to vector<1x16xf32>
    %423 = vector.broadcast %422 : vector<1x16xf32> to vector<16x16xf32>
    %424 = arith.addf %420, %423 : vector<16x16xf32>
    %425 = vector.shape_cast %410 : vector<16x16xf32> to vector<2x8x16xf32>
    %426 = vector.shape_cast %417 : vector<16x16xf32> to vector<2x8x16xf32>
    %427 = vector.shape_cast %424 : vector<16x16xf32> to vector<2x8x16xf32>
    "tpu.trace_start"() <{level = 10 : i32, message = "bqd,bkd->bqk"}> : () -> ()
    %cst_206 = arith.constant dense<0.000000e+00> : vector<2x8x8xf32>
    %428 = tpu.matmul %425, %426, %cst_206 {dimension_numbers = #tpu.dot_dimension_numbers<[2], [2], [1], [1], [0, 0, 0, 1, 1, 1], [0], [0]>} : vector<2x8x16xf32>, vector<2x8x16xf32>, vector<2x8x8xf32> -> vector<2x8x8xf32>
    "tpu.trace_stop"() : () -> ()
    %cst_207 = arith.constant 2.500000e-01 : f32
    %429 = vector.broadcast %cst_207 : f32 to vector<2x8x8xf32>
    %430 = arith.mulf %428, %429 : vector<2x8x8xf32>
    %431 = vector.broadcast %29 : vector<2x1x8xf32> to vector<2x8x8xf32>
    %432 = arith.addf %430, %431 : vector<2x8x8xf32>
    %cst_208 = arith.constant dense<0xFF800000> : vector<2x8xf32>
    %433 = vector.multi_reduction <maximumf>, %432, %cst_208 [2] : vector<2x8x8xf32> to vector<2x8xf32>
    %434 = vector.shape_cast %433 : vector<2x8xf32> to vector<2x8x1xf32>
    %435 = vector.broadcast %434 : vector<2x8x1xf32> to vector<2x8x8xf32>
    %436 = arith.subf %432, %435 : vector<2x8x8xf32>
    %437 = math.exp %436 : vector<2x8x8xf32>
    %cst_209 = arith.constant dense<0.000000e+00> : vector<2x8xf32>
    %438 = vector.multi_reduction <add>, %437, %cst_209 [2] : vector<2x8x8xf32> to vector<2x8xf32>
    %439 = vector.shape_cast %438 : vector<2x8xf32> to vector<2x8x1xf32>
    %440 = tpu.reciprocal %439 {approx = true} : vector<2x8x1xf32> -> vector<2x8x1xf32>
    %441 = vector.broadcast %440 : vector<2x8x1xf32> to vector<2x8x8xf32>
    %442 = arith.mulf %437, %441 : vector<2x8x8xf32>
    "tpu.trace_start"() <{level = 10 : i32, message = "bqk,bkd->bqd"}> : () -> ()
    %cst_210 = arith.constant dense<0.000000e+00> : vector<2x8x16xf32>
    %443 = tpu.matmul %442, %427, %cst_210 {dimension_numbers = #tpu.dot_dimension_numbers<[2], [1], [1], [2], [0, 0, 0, 1, 1, 2], [0], [0]>} : vector<2x8x8xf32>, vector<2x8x16xf32>, vector<2x8x16xf32> -> vector<2x8x16xf32>
    "tpu.trace_stop"() : () -> ()
    %444 = vector.shape_cast %443 : vector<2x8x16xf32> to vector<16x16xf32>
    %c3_211 = arith.constant 3 : index
    %c0_212 = arith.constant 0 : index
    %c0_213 = arith.constant 0 : index
    %445 = vector.load %arg4[%c3_211, %c0_212, %c0_213] : memref<4x16x32xf32, #tpu.memory_space<vmem>>, vector<1x16x32xf32>
    %446 = vector.shape_cast %445 : vector<1x16x32xf32> to vector<16x32xf32>
    %cst_214 = arith.constant dense<0.000000e+00> : vector<16x32xf32>
    %447 = tpu.matmul %444, %446, %cst_214 {dimension_numbers = #tpu.dot_dimension_numbers<[1], [0], [0], [1], [0, 0, 1, 1], [], []>} : vector<16x16xf32>, vector<16x32xf32>, vector<16x32xf32> -> vector<16x32xf32>
    %448 = arith.addf %403, %447 : vector<16x32xf32>
    %449 = vector.broadcast %354 : vector<1x32xf32> to vector<16x32xf32>
    %450 = arith.addf %448, %449 : vector<16x32xf32>
    %451 = arith.addf %450, %351 : vector<16x32xf32>
    %cst_215 = arith.constant dense<0.000000e+00> : vector<16xf32>
    %452 = vector.multi_reduction <add>, %451, %cst_215 [1] : vector<16x32xf32> to vector<16xf32>
    %453 = vector.shape_cast %452 : vector<16xf32> to vector<16x1xf32>
    %cst_216 = arith.constant 3.200000e+01 : f32
    %454 = vector.broadcast %cst_216 : f32 to vector<16x1xf32>
    %455 = arith.divf %453, %454 : vector<16x1xf32>
    %456 = arith.mulf %451, %451 : vector<16x32xf32>
    %cst_217 = arith.constant dense<0.000000e+00> : vector<16xf32>
    %457 = vector.multi_reduction <add>, %456, %cst_217 [1] : vector<16x32xf32> to vector<16xf32>
    %458 = vector.shape_cast %457 : vector<16xf32> to vector<16x1xf32>
    %cst_218 = arith.constant 3.200000e+01 : f32
    %459 = vector.broadcast %cst_218 : f32 to vector<16x1xf32>
    %460 = arith.divf %458, %459 : vector<16x1xf32>
    %461 = vector.broadcast %455 : vector<16x1xf32> to vector<16x32xf32>
    %462 = arith.subf %451, %461 : vector<16x32xf32>
    %463 = arith.mulf %455, %455 : vector<16x1xf32>
    %464 = arith.subf %460, %463 : vector<16x1xf32>
    %cst_219 = arith.constant 9.99999974E-6 : f32
    %465 = vector.broadcast %cst_219 : f32 to vector<16x1xf32>
    %466 = arith.addf %464, %465 : vector<16x1xf32>
    %467 = math.rsqrt %466 : vector<16x1xf32>
    %468 = vector.broadcast %467 : vector<16x1xf32> to vector<16x32xf32>
    %469 = arith.mulf %462, %468 : vector<16x32xf32>
    %470 = vector.broadcast %356 : vector<1x32xf32> to vector<16x32xf32>
    %471 = arith.mulf %469, %470 : vector<16x32xf32>
    %472 = vector.broadcast %357 : vector<1x32xf32> to vector<16x32xf32>
    %473 = arith.addf %471, %472 : vector<16x32xf32>
    %cst_220 = arith.constant 0.000000e+00 : f32
    %474 = vector.shape_cast %16 : vector<16x1xi1> to vector<16x1xi1>
    %475 = vector.broadcast %474 : vector<16x1xi1> to vector<16x32xi1>
    %476 = vector.broadcast %cst_220 : f32 to vector<16x32xf32>
    %477 = arith.select %475, %476, %473 : vector<16x32xi1>, vector<16x32xf32>
    %478 = vector.shape_cast %477 : vector<16x32xf32> to vector<2x8x32xf32>
    %c4_i32_221 = arith.constant 4 : i32
    %479 = tpu.dynamic_rotate %478 by %c4_i32_221 dim 1 : vector<2x8x32xf32>, i32 -> vector<2x8x32xf32>
    %c-4_i32_222 = arith.constant -4 : i32
    %480 = vector.broadcast %c-4_i32_222 : i32 to vector<1x8x1xi32>
    %481 = arith.addi %30, %480 : vector<1x8x1xi32>
    %c0_i32_223 = arith.constant 0 : i32
    %482 = vector.broadcast %c0_i32_223 : i32 to vector<1x8x1xi32>
    %483 = arith.cmpi sge, %481, %482 : vector<1x8x1xi32>
    %c-4_i32_224 = arith.constant -4 : i32
    %484 = vector.broadcast %c-4_i32_224 : i32 to vector<1x8x1xi32>
    %485 = arith.addi %30, %484 : vector<1x8x1xi32>
    %c8_i32_225 = arith.constant 8 : i32
    %486 = vector.broadcast %c8_i32_225 : i32 to vector<1x8x1xi32>
    %487 = arith.cmpi slt, %485, %486 : vector<1x8x1xi32>
    %488 = arith.andi %483, %487 : vector<1x8x1xi1>
    %cst_226 = arith.constant 0.000000e+00 : f32
    %489 = vector.shape_cast %488 : vector<1x8x1xi1> to vector<1x8x1xi1>
    %490 = vector.broadcast %489 : vector<1x8x1xi1> to vector<2x8x32xi1>
    %491 = vector.broadcast %cst_226 : f32 to vector<2x8x32xf32>
    %492 = arith.select %490, %479, %491 : vector<2x8x32xi1>, vector<2x8x32xf32>
    %493 = vector.shape_cast %492 : vector<2x8x32xf32> to vector<16x32xf32>
    %c9_227 = arith.constant 9 : index
    %c0_228 = arith.constant 0 : index
    %c0_229 = arith.constant 0 : index
    %494 = vector.load %arg5[%c9_227, %c0_228, %c0_229] : memref<18x32x64xf32, #tpu.memory_space<vmem>>, vector<1x32x64xf32>
    %495 = vector.shape_cast %494 : vector<1x32x64xf32> to vector<32x64xf32>
    %cst_230 = arith.constant dense<0.000000e+00> : vector<16x64xf32>
    %496 = tpu.matmul %493, %495, %cst_230 {dimension_numbers = #tpu.dot_dimension_numbers<[1], [0], [0], [1], [0, 0, 1, 1], [], []>} : vector<16x32xf32>, vector<32x64xf32>, vector<16x64xf32> -> vector<16x64xf32>
    %c3_i32_231 = arith.constant 3 : i32
    %497 = tpu.dynamic_rotate %478 by %c3_i32_231 dim 1 : vector<2x8x32xf32>, i32 -> vector<2x8x32xf32>
    %c-3_i32_232 = arith.constant -3 : i32
    %498 = vector.broadcast %c-3_i32_232 : i32 to vector<1x8x1xi32>
    %499 = arith.addi %30, %498 : vector<1x8x1xi32>
    %c0_i32_233 = arith.constant 0 : i32
    %500 = vector.broadcast %c0_i32_233 : i32 to vector<1x8x1xi32>
    %501 = arith.cmpi sge, %499, %500 : vector<1x8x1xi32>
    %c-3_i32_234 = arith.constant -3 : i32
    %502 = vector.broadcast %c-3_i32_234 : i32 to vector<1x8x1xi32>
    %503 = arith.addi %30, %502 : vector<1x8x1xi32>
    %c8_i32_235 = arith.constant 8 : i32
    %504 = vector.broadcast %c8_i32_235 : i32 to vector<1x8x1xi32>
    %505 = arith.cmpi slt, %503, %504 : vector<1x8x1xi32>
    %506 = arith.andi %501, %505 : vector<1x8x1xi1>
    %cst_236 = arith.constant 0.000000e+00 : f32
    %507 = vector.shape_cast %506 : vector<1x8x1xi1> to vector<1x8x1xi1>
    %508 = vector.broadcast %507 : vector<1x8x1xi1> to vector<2x8x32xi1>
    %509 = vector.broadcast %cst_236 : f32 to vector<2x8x32xf32>
    %510 = arith.select %508, %497, %509 : vector<2x8x32xi1>, vector<2x8x32xf32>
    %511 = vector.shape_cast %510 : vector<2x8x32xf32> to vector<16x32xf32>
    %c10_237 = arith.constant 10 : index
    %c0_238 = arith.constant 0 : index
    %c0_239 = arith.constant 0 : index
    %512 = vector.load %arg5[%c10_237, %c0_238, %c0_239] : memref<18x32x64xf32, #tpu.memory_space<vmem>>, vector<1x32x64xf32>
    %513 = vector.shape_cast %512 : vector<1x32x64xf32> to vector<32x64xf32>
    %cst_240 = arith.constant dense<0.000000e+00> : vector<16x64xf32>
    %514 = tpu.matmul %511, %513, %cst_240 {dimension_numbers = #tpu.dot_dimension_numbers<[1], [0], [0], [1], [0, 0, 1, 1], [], []>} : vector<16x32xf32>, vector<32x64xf32>, vector<16x64xf32> -> vector<16x64xf32>
    %515 = arith.addf %496, %514 : vector<16x64xf32>
    %c2_i32_241 = arith.constant 2 : i32
    %516 = tpu.dynamic_rotate %478 by %c2_i32_241 dim 1 : vector<2x8x32xf32>, i32 -> vector<2x8x32xf32>
    %c-2_i32_242 = arith.constant -2 : i32
    %517 = vector.broadcast %c-2_i32_242 : i32 to vector<1x8x1xi32>
    %518 = arith.addi %30, %517 : vector<1x8x1xi32>
    %c0_i32_243 = arith.constant 0 : i32
    %519 = vector.broadcast %c0_i32_243 : i32 to vector<1x8x1xi32>
    %520 = arith.cmpi sge, %518, %519 : vector<1x8x1xi32>
    %c-2_i32_244 = arith.constant -2 : i32
    %521 = vector.broadcast %c-2_i32_244 : i32 to vector<1x8x1xi32>
    %522 = arith.addi %30, %521 : vector<1x8x1xi32>
    %c8_i32_245 = arith.constant 8 : i32
    %523 = vector.broadcast %c8_i32_245 : i32 to vector<1x8x1xi32>
    %524 = arith.cmpi slt, %522, %523 : vector<1x8x1xi32>
    %525 = arith.andi %520, %524 : vector<1x8x1xi1>
    %cst_246 = arith.constant 0.000000e+00 : f32
    %526 = vector.shape_cast %525 : vector<1x8x1xi1> to vector<1x8x1xi1>
    %527 = vector.broadcast %526 : vector<1x8x1xi1> to vector<2x8x32xi1>
    %528 = vector.broadcast %cst_246 : f32 to vector<2x8x32xf32>
    %529 = arith.select %527, %516, %528 : vector<2x8x32xi1>, vector<2x8x32xf32>
    %530 = vector.shape_cast %529 : vector<2x8x32xf32> to vector<16x32xf32>
    %c11_247 = arith.constant 11 : index
    %c0_248 = arith.constant 0 : index
    %c0_249 = arith.constant 0 : index
    %531 = vector.load %arg5[%c11_247, %c0_248, %c0_249] : memref<18x32x64xf32, #tpu.memory_space<vmem>>, vector<1x32x64xf32>
    %532 = vector.shape_cast %531 : vector<1x32x64xf32> to vector<32x64xf32>
    %cst_250 = arith.constant dense<0.000000e+00> : vector<16x64xf32>
    %533 = tpu.matmul %530, %532, %cst_250 {dimension_numbers = #tpu.dot_dimension_numbers<[1], [0], [0], [1], [0, 0, 1, 1], [], []>} : vector<16x32xf32>, vector<32x64xf32>, vector<16x64xf32> -> vector<16x64xf32>
    %534 = arith.addf %515, %533 : vector<16x64xf32>
    %c1_i32_251 = arith.constant 1 : i32
    %535 = tpu.dynamic_rotate %478 by %c1_i32_251 dim 1 : vector<2x8x32xf32>, i32 -> vector<2x8x32xf32>
    %c-1_i32_252 = arith.constant -1 : i32
    %536 = vector.broadcast %c-1_i32_252 : i32 to vector<1x8x1xi32>
    %537 = arith.addi %30, %536 : vector<1x8x1xi32>
    %c0_i32_253 = arith.constant 0 : i32
    %538 = vector.broadcast %c0_i32_253 : i32 to vector<1x8x1xi32>
    %539 = arith.cmpi sge, %537, %538 : vector<1x8x1xi32>
    %c-1_i32_254 = arith.constant -1 : i32
    %540 = vector.broadcast %c-1_i32_254 : i32 to vector<1x8x1xi32>
    %541 = arith.addi %30, %540 : vector<1x8x1xi32>
    %c8_i32_255 = arith.constant 8 : i32
    %542 = vector.broadcast %c8_i32_255 : i32 to vector<1x8x1xi32>
    %543 = arith.cmpi slt, %541, %542 : vector<1x8x1xi32>
    %544 = arith.andi %539, %543 : vector<1x8x1xi1>
    %cst_256 = arith.constant 0.000000e+00 : f32
    %545 = vector.shape_cast %544 : vector<1x8x1xi1> to vector<1x8x1xi1>
    %546 = vector.broadcast %545 : vector<1x8x1xi1> to vector<2x8x32xi1>
    %547 = vector.broadcast %cst_256 : f32 to vector<2x8x32xf32>
    %548 = arith.select %546, %535, %547 : vector<2x8x32xi1>, vector<2x8x32xf32>
    %549 = vector.shape_cast %548 : vector<2x8x32xf32> to vector<16x32xf32>
    %c12 = arith.constant 12 : index
    %c0_257 = arith.constant 0 : index
    %c0_258 = arith.constant 0 : index
    %550 = vector.load %arg5[%c12, %c0_257, %c0_258] : memref<18x32x64xf32, #tpu.memory_space<vmem>>, vector<1x32x64xf32>
    %551 = vector.shape_cast %550 : vector<1x32x64xf32> to vector<32x64xf32>
    %cst_259 = arith.constant dense<0.000000e+00> : vector<16x64xf32>
    %552 = tpu.matmul %549, %551, %cst_259 {dimension_numbers = #tpu.dot_dimension_numbers<[1], [0], [0], [1], [0, 0, 1, 1], [], []>} : vector<16x32xf32>, vector<32x64xf32>, vector<16x64xf32> -> vector<16x64xf32>
    %553 = arith.addf %534, %552 : vector<16x64xf32>
    %554 = vector.shape_cast %478 : vector<2x8x32xf32> to vector<16x32xf32>
    %c13 = arith.constant 13 : index
    %c0_260 = arith.constant 0 : index
    %c0_261 = arith.constant 0 : index
    %555 = vector.load %arg5[%c13, %c0_260, %c0_261] : memref<18x32x64xf32, #tpu.memory_space<vmem>>, vector<1x32x64xf32>
    %556 = vector.shape_cast %555 : vector<1x32x64xf32> to vector<32x64xf32>
    %cst_262 = arith.constant dense<0.000000e+00> : vector<16x64xf32>
    %557 = tpu.matmul %554, %556, %cst_262 {dimension_numbers = #tpu.dot_dimension_numbers<[1], [0], [0], [1], [0, 0, 1, 1], [], []>} : vector<16x32xf32>, vector<32x64xf32>, vector<16x64xf32> -> vector<16x64xf32>
    %558 = arith.addf %553, %557 : vector<16x64xf32>
    %c7_i32_263 = arith.constant 7 : i32
    %559 = tpu.dynamic_rotate %478 by %c7_i32_263 dim 1 : vector<2x8x32xf32>, i32 -> vector<2x8x32xf32>
    %c1_i32_264 = arith.constant 1 : i32
    %560 = vector.broadcast %c1_i32_264 : i32 to vector<1x8x1xi32>
    %561 = arith.addi %30, %560 : vector<1x8x1xi32>
    %c0_i32_265 = arith.constant 0 : i32
    %562 = vector.broadcast %c0_i32_265 : i32 to vector<1x8x1xi32>
    %563 = arith.cmpi sge, %561, %562 : vector<1x8x1xi32>
    %c1_i32_266 = arith.constant 1 : i32
    %564 = vector.broadcast %c1_i32_266 : i32 to vector<1x8x1xi32>
    %565 = arith.addi %30, %564 : vector<1x8x1xi32>
    %c8_i32_267 = arith.constant 8 : i32
    %566 = vector.broadcast %c8_i32_267 : i32 to vector<1x8x1xi32>
    %567 = arith.cmpi slt, %565, %566 : vector<1x8x1xi32>
    %568 = arith.andi %563, %567 : vector<1x8x1xi1>
    %cst_268 = arith.constant 0.000000e+00 : f32
    %569 = vector.shape_cast %568 : vector<1x8x1xi1> to vector<1x8x1xi1>
    %570 = vector.broadcast %569 : vector<1x8x1xi1> to vector<2x8x32xi1>
    %571 = vector.broadcast %cst_268 : f32 to vector<2x8x32xf32>
    %572 = arith.select %570, %559, %571 : vector<2x8x32xi1>, vector<2x8x32xf32>
    %573 = vector.shape_cast %572 : vector<2x8x32xf32> to vector<16x32xf32>
    %c14 = arith.constant 14 : index
    %c0_269 = arith.constant 0 : index
    %c0_270 = arith.constant 0 : index
    %574 = vector.load %arg5[%c14, %c0_269, %c0_270] : memref<18x32x64xf32, #tpu.memory_space<vmem>>, vector<1x32x64xf32>
    %575 = vector.shape_cast %574 : vector<1x32x64xf32> to vector<32x64xf32>
    %cst_271 = arith.constant dense<0.000000e+00> : vector<16x64xf32>
    %576 = tpu.matmul %573, %575, %cst_271 {dimension_numbers = #tpu.dot_dimension_numbers<[1], [0], [0], [1], [0, 0, 1, 1], [], []>} : vector<16x32xf32>, vector<32x64xf32>, vector<16x64xf32> -> vector<16x64xf32>
    %577 = arith.addf %558, %576 : vector<16x64xf32>
    %c6_i32_272 = arith.constant 6 : i32
    %578 = tpu.dynamic_rotate %478 by %c6_i32_272 dim 1 : vector<2x8x32xf32>, i32 -> vector<2x8x32xf32>
    %c2_i32_273 = arith.constant 2 : i32
    %579 = vector.broadcast %c2_i32_273 : i32 to vector<1x8x1xi32>
    %580 = arith.addi %30, %579 : vector<1x8x1xi32>
    %c0_i32_274 = arith.constant 0 : i32
    %581 = vector.broadcast %c0_i32_274 : i32 to vector<1x8x1xi32>
    %582 = arith.cmpi sge, %580, %581 : vector<1x8x1xi32>
    %c2_i32_275 = arith.constant 2 : i32
    %583 = vector.broadcast %c2_i32_275 : i32 to vector<1x8x1xi32>
    %584 = arith.addi %30, %583 : vector<1x8x1xi32>
    %c8_i32_276 = arith.constant 8 : i32
    %585 = vector.broadcast %c8_i32_276 : i32 to vector<1x8x1xi32>
    %586 = arith.cmpi slt, %584, %585 : vector<1x8x1xi32>
    %587 = arith.andi %582, %586 : vector<1x8x1xi1>
    %cst_277 = arith.constant 0.000000e+00 : f32
    %588 = vector.shape_cast %587 : vector<1x8x1xi1> to vector<1x8x1xi1>
    %589 = vector.broadcast %588 : vector<1x8x1xi1> to vector<2x8x32xi1>
    %590 = vector.broadcast %cst_277 : f32 to vector<2x8x32xf32>
    %591 = arith.select %589, %578, %590 : vector<2x8x32xi1>, vector<2x8x32xf32>
    %592 = vector.shape_cast %591 : vector<2x8x32xf32> to vector<16x32xf32>
    %c15 = arith.constant 15 : index
    %c0_278 = arith.constant 0 : index
    %c0_279 = arith.constant 0 : index
    %593 = vector.load %arg5[%c15, %c0_278, %c0_279] : memref<18x32x64xf32, #tpu.memory_space<vmem>>, vector<1x32x64xf32>
    %594 = vector.shape_cast %593 : vector<1x32x64xf32> to vector<32x64xf32>
    %cst_280 = arith.constant dense<0.000000e+00> : vector<16x64xf32>
    %595 = tpu.matmul %592, %594, %cst_280 {dimension_numbers = #tpu.dot_dimension_numbers<[1], [0], [0], [1], [0, 0, 1, 1], [], []>} : vector<16x32xf32>, vector<32x64xf32>, vector<16x64xf32> -> vector<16x64xf32>
    %596 = arith.addf %577, %595 : vector<16x64xf32>
    %c5_i32_281 = arith.constant 5 : i32
    %597 = tpu.dynamic_rotate %478 by %c5_i32_281 dim 1 : vector<2x8x32xf32>, i32 -> vector<2x8x32xf32>
    %c3_i32_282 = arith.constant 3 : i32
    %598 = vector.broadcast %c3_i32_282 : i32 to vector<1x8x1xi32>
    %599 = arith.addi %30, %598 : vector<1x8x1xi32>
    %c0_i32_283 = arith.constant 0 : i32
    %600 = vector.broadcast %c0_i32_283 : i32 to vector<1x8x1xi32>
    %601 = arith.cmpi sge, %599, %600 : vector<1x8x1xi32>
    %c3_i32_284 = arith.constant 3 : i32
    %602 = vector.broadcast %c3_i32_284 : i32 to vector<1x8x1xi32>
    %603 = arith.addi %30, %602 : vector<1x8x1xi32>
    %c8_i32_285 = arith.constant 8 : i32
    %604 = vector.broadcast %c8_i32_285 : i32 to vector<1x8x1xi32>
    %605 = arith.cmpi slt, %603, %604 : vector<1x8x1xi32>
    %606 = arith.andi %601, %605 : vector<1x8x1xi1>
    %cst_286 = arith.constant 0.000000e+00 : f32
    %607 = vector.shape_cast %606 : vector<1x8x1xi1> to vector<1x8x1xi1>
    %608 = vector.broadcast %607 : vector<1x8x1xi1> to vector<2x8x32xi1>
    %609 = vector.broadcast %cst_286 : f32 to vector<2x8x32xf32>
    %610 = arith.select %608, %597, %609 : vector<2x8x32xi1>, vector<2x8x32xf32>
    %611 = vector.shape_cast %610 : vector<2x8x32xf32> to vector<16x32xf32>
    %c16 = arith.constant 16 : index
    %c0_287 = arith.constant 0 : index
    %c0_288 = arith.constant 0 : index
    %612 = vector.load %arg5[%c16, %c0_287, %c0_288] : memref<18x32x64xf32, #tpu.memory_space<vmem>>, vector<1x32x64xf32>
    %613 = vector.shape_cast %612 : vector<1x32x64xf32> to vector<32x64xf32>
    %cst_289 = arith.constant dense<0.000000e+00> : vector<16x64xf32>
    %614 = tpu.matmul %611, %613, %cst_289 {dimension_numbers = #tpu.dot_dimension_numbers<[1], [0], [0], [1], [0, 0, 1, 1], [], []>} : vector<16x32xf32>, vector<32x64xf32>, vector<16x64xf32> -> vector<16x64xf32>
    %615 = arith.addf %596, %614 : vector<16x64xf32>
    %c4_i32_290 = arith.constant 4 : i32
    %616 = tpu.dynamic_rotate %478 by %c4_i32_290 dim 1 : vector<2x8x32xf32>, i32 -> vector<2x8x32xf32>
    %c4_i32_291 = arith.constant 4 : i32
    %617 = vector.broadcast %c4_i32_291 : i32 to vector<1x8x1xi32>
    %618 = arith.addi %30, %617 : vector<1x8x1xi32>
    %c0_i32_292 = arith.constant 0 : i32
    %619 = vector.broadcast %c0_i32_292 : i32 to vector<1x8x1xi32>
    %620 = arith.cmpi sge, %618, %619 : vector<1x8x1xi32>
    %c4_i32_293 = arith.constant 4 : i32
    %621 = vector.broadcast %c4_i32_293 : i32 to vector<1x8x1xi32>
    %622 = arith.addi %30, %621 : vector<1x8x1xi32>
    %c8_i32_294 = arith.constant 8 : i32
    %623 = vector.broadcast %c8_i32_294 : i32 to vector<1x8x1xi32>
    %624 = arith.cmpi slt, %622, %623 : vector<1x8x1xi32>
    %625 = arith.andi %620, %624 : vector<1x8x1xi1>
    %cst_295 = arith.constant 0.000000e+00 : f32
    %626 = vector.shape_cast %625 : vector<1x8x1xi1> to vector<1x8x1xi1>
    %627 = vector.broadcast %626 : vector<1x8x1xi1> to vector<2x8x32xi1>
    %628 = vector.broadcast %cst_295 : f32 to vector<2x8x32xf32>
    %629 = arith.select %627, %616, %628 : vector<2x8x32xi1>, vector<2x8x32xf32>
    %630 = vector.shape_cast %629 : vector<2x8x32xf32> to vector<16x32xf32>
    %c17 = arith.constant 17 : index
    %c0_296 = arith.constant 0 : index
    %c0_297 = arith.constant 0 : index
    %631 = vector.load %arg5[%c17, %c0_296, %c0_297] : memref<18x32x64xf32, #tpu.memory_space<vmem>>, vector<1x32x64xf32>
    %632 = vector.shape_cast %631 : vector<1x32x64xf32> to vector<32x64xf32>
    %cst_298 = arith.constant dense<0.000000e+00> : vector<16x64xf32>
    %633 = tpu.matmul %630, %632, %cst_298 {dimension_numbers = #tpu.dot_dimension_numbers<[1], [0], [0], [1], [0, 0, 1, 1], [], []>} : vector<16x32xf32>, vector<32x64xf32>, vector<16x64xf32> -> vector<16x64xf32>
    %634 = arith.addf %615, %633 : vector<16x64xf32>
    %c1_299 = arith.constant 1 : index
    %c0_300 = arith.constant 0 : index
    %c0_301 = arith.constant 0 : index
    %635 = vector.load %arg6[%c1_299, %c0_300, %c0_301] : memref<2x1x64xf32, #tpu.memory_space<vmem>>, vector<1x1x64xf32>
    %636 = vector.shape_cast %635 : vector<1x1x64xf32> to vector<1x64xf32>
    %637 = vector.broadcast %636 : vector<1x64xf32> to vector<16x64xf32>
    %638 = arith.addf %634, %637 : vector<16x64xf32>
    %cst_302 = arith.constant 0.000000e+00 : f32
    %639 = vector.broadcast %cst_302 : f32 to vector<16x64xf32>
    %640 = arith.maximumf %638, %639 : vector<16x64xf32>
    %c1_303 = arith.constant 1 : index
    %c0_304 = arith.constant 0 : index
    %c0_305 = arith.constant 0 : index
    %641 = vector.load %arg7[%c1_303, %c0_304, %c0_305] : memref<2x64x32xf32, #tpu.memory_space<vmem>>, vector<1x64x32xf32>
    %642 = vector.shape_cast %641 : vector<1x64x32xf32> to vector<64x32xf32>
    %cst_306 = arith.constant dense<0.000000e+00> : vector<16x32xf32>
    %643 = tpu.matmul %640, %642, %cst_306 {dimension_numbers = #tpu.dot_dimension_numbers<[1], [0], [0], [1], [0, 0, 1, 1], [], []>} : vector<16x64xf32>, vector<64x32xf32>, vector<16x32xf32> -> vector<16x32xf32>
    %644 = vector.broadcast %355 : vector<1x32xf32> to vector<16x32xf32>
    %645 = arith.addf %643, %644 : vector<16x32xf32>
    %646 = arith.addf %645, %477 : vector<16x32xf32>
    %cst_307 = arith.constant dense<0.000000e+00> : vector<16xf32>
    %647 = vector.multi_reduction <add>, %646, %cst_307 [1] : vector<16x32xf32> to vector<16xf32>
    %648 = vector.shape_cast %647 : vector<16xf32> to vector<16x1xf32>
    %cst_308 = arith.constant 3.200000e+01 : f32
    %649 = vector.broadcast %cst_308 : f32 to vector<16x1xf32>
    %650 = arith.divf %648, %649 : vector<16x1xf32>
    %651 = arith.mulf %646, %646 : vector<16x32xf32>
    %cst_309 = arith.constant dense<0.000000e+00> : vector<16xf32>
    %652 = vector.multi_reduction <add>, %651, %cst_309 [1] : vector<16x32xf32> to vector<16xf32>
    %653 = vector.shape_cast %652 : vector<16xf32> to vector<16x1xf32>
    %cst_310 = arith.constant 3.200000e+01 : f32
    %654 = vector.broadcast %cst_310 : f32 to vector<16x1xf32>
    %655 = arith.divf %653, %654 : vector<16x1xf32>
    %656 = vector.broadcast %650 : vector<16x1xf32> to vector<16x32xf32>
    %657 = arith.subf %646, %656 : vector<16x32xf32>
    %658 = arith.mulf %650, %650 : vector<16x1xf32>
    %659 = arith.subf %655, %658 : vector<16x1xf32>
    %cst_311 = arith.constant 9.99999974E-6 : f32
    %660 = vector.broadcast %cst_311 : f32 to vector<16x1xf32>
    %661 = arith.addf %659, %660 : vector<16x1xf32>
    %662 = math.rsqrt %661 : vector<16x1xf32>
    %663 = vector.broadcast %662 : vector<16x1xf32> to vector<16x32xf32>
    %664 = arith.mulf %657, %663 : vector<16x32xf32>
    %665 = vector.broadcast %358 : vector<1x32xf32> to vector<16x32xf32>
    %666 = arith.mulf %664, %665 : vector<16x32xf32>
    %667 = vector.broadcast %359 : vector<1x32xf32> to vector<16x32xf32>
    %668 = arith.addf %666, %667 : vector<16x32xf32>
    %cst_312 = arith.constant 0.000000e+00 : f32
    %669 = vector.shape_cast %16 : vector<16x1xi1> to vector<16x1xi1>
    %670 = vector.broadcast %669 : vector<16x1xi1> to vector<16x32xi1>
    %671 = vector.broadcast %cst_312 : f32 to vector<16x32xf32>
    %672 = arith.select %670, %671, %668 : vector<16x32xi1>, vector<16x32xf32>
    %673 = vector.extract_strided_slice %672 {offsets = [0, 0], sizes = [4, 32], strides = [1, 1]} : vector<16x32xf32> to vector<4x32xf32>
    %674 = vector.extract_strided_slice %672 {offsets = [4, 0], sizes = [4, 32], strides = [1, 1]} : vector<16x32xf32> to vector<4x32xf32>
    %675 = vector.extract_strided_slice %672 {offsets = [8, 0], sizes = [4, 32], strides = [1, 1]} : vector<16x32xf32> to vector<4x32xf32>
    %676 = vector.extract_strided_slice %672 {offsets = [12, 0], sizes = [4, 32], strides = [1, 1]} : vector<16x32xf32> to vector<4x32xf32>
    %677 = tpu.concatenate %673, %674, %675, %676 in 1 : vector<4x32xf32>, vector<4x32xf32>, vector<4x32xf32>, vector<4x32xf32> -> vector<4x128xf32>
    %c0_313 = arith.constant 0 : index
    %c0_314 = arith.constant 0 : index
    %678 = vector.load %arg9[%c0_313, %c0_314] : memref<4x128xf32, #tpu.memory_space<vmem>>, vector<4x128xf32>
    tpu.vector_store %arg9[%c0_313, %c0_314], %677 {strides = array<i32>} : memref<4x128xf32, #tpu.memory_space<vmem>>, vector<4x128xf32>,
    return
  }
}

</mosaic_0001>

<bundles_post_ra>
// kernel: tpu_custom_call.1
= control target key start
LH: loop header
LB: loop body
LE: loop exit
PB: predicated region body
PF: predicated region fallthrough
CT: control target
= control target key end

     0   :  { %14 = vsyncpa [#allocation4], 0  ;;  %s7399_s0 = inlined_call_operand.vmem [shape: s32[2], index: 0, kind: input, shape index: {}]   ;;  %s7400_s1 = inlined_call_operand.vmem [shape: f32[4,128], index: 1, kind: input, shape index: {}]   ;;  %s7401_s2 = inlined_call_operand.vmem [shape: f32[12,32,16], index: 2, kind: input, shape index: {}]   ;;  %s7402_s3 = inlined_call_operand.vmem [shape: f32[12,1,16], index: 3, kind: input, shape index: {}]   ;;  %s7403_s4 = inlined_call_operand.vmem [shape: f32[4,16,32], index: 4, kind: input, shape index: {}]   ;;  %s7404_s5 = inlined_call_operand.vmem [shape: f32[18,32,64], index: 5, kind: input, shape index: {}]   ;;  %s7405_s6 = inlined_call_operand.vmem [shape: f32[2,1,64], index: 6, kind: input, shape index: {}]   ;;  %s7406_s7 = inlined_call_operand.vmem [shape: f32[2,64,32], index: 7, kind: input, shape index: {}]   ;;  %s7407_s8 = inlined_call_operand.vmem [shape: f32[2,6,32], index: 8, kind: input, shape index: {}]   ;;  %s7408_s9 = inlined_call_operand.hbm [shape: f32[4,128], index: 9, kind: output, shape index: {}]  }
   0x1   :  { %15 = vsyncpa [#allocation3], 0  ;;  %s22_s11 = sshll.u32 %s7399_s0, 4  ;;  %s23_s11 = int_to_ptr.vmem [resolvable:$true] %s22_s11 }
   0x2   :  { %s6278_s12 = scalar_lea.vmem %s23_s11, 16  ;;  %p6283_p1 = scmp.lt.s32.totalorder %s23_s11, %s23_s11 }
   0x3   :  { %p6279_p0 = scmp.ne.s32.totalorder %s23_s11, %s6278_s12  ;;  %p6284_p2 = scmp.lt.s32.totalorder %s6278_s12, %s6278_s12 }
   0x5   :  { %p6285_p3 = por %p6284_p2, %p6283_p1 }
   0x7   :  { %p6286_p4 = pnand %p6285_p3, %p6279_p0 }
   0x9   :  { %6289 = shalt.err (!%p6286_p4)
}
   0xa   :  { %s6316_s13 = smov [#allocation2]  }
   0xb   :  { %25 = dma.vmem_to_smem %s23_s11, 16, %s6316_s13, [#allocation4]  }
   0xc   :  { %6312 = dma.done.wait [#allocation4], 16  }
   0xd   :  { %6313 = vsyncadd [#allocation4], 4294967280 }
   0xe   :  { %45 = sfence }
   0xf   :  { %v46_v0 = vld [vmem:[%s7400_s1] sm:$0xf]  ;;  %v79_v2 = vld [vmem:[%s7401_s2 + $0x8] sm:$0xff]  ;;  %v80_v5 = vld [vmem:[%s7401_s2 + $0x10] sm:$0xff]  ;;  %s6317_s1 = smov 96   ;;  %s6318_s23 = smov 32   ;;  %v61_v41 = vlaneseq }
  0x10   :  { %v78_v1 = vld [vmem:[%s7401_s2] sm:$0xff]  ;;  %v48_v3 = vrot.slane %v46_v0, 4  ;;  %v81_v6 = vld [vmem:[%s7401_s2 + $0x18] sm:$0xff]  ;;  %v4927_v9 = vld [vmem:[%s7401_s2 + $0x48] sm:$0xff]  ;;  %s6319_s28 = smov 64   ;;  %vm58_vm0 = vcmask 1043456  }
  0x11   :  { %v5896_v4 = vpack.c.bf16 %v79_v2, %v78_v1  ;;  %v5900_v7 = vpack.c.bf16 %v81_v6, %v80_v5  ;;  %v4926_v8 = vld [vmem:[%s7401_s2 + $0x40] sm:$0xff]  ;;  %vm89_vm1 = vcmask 261120   ;;  %v4928_v13 = vld [vmem:[%s7401_s2 + $0x50] sm:$0xff]  ;;  %v4929_v14 = vld [vmem:[%s7401_s2 + $0x58] sm:$0xff]  ;;  %v6320_v25 = vmov 0.0   ;;  %s6461_s26 = sld [smem:[#allocation2]] }
  0x12   :  { %49 = vrot.lane.b32.xlu0 %v48_v3, %s6317_s1  ;;  %55 = vrot.lane.b32.xlu1 %v48_v3, %s6318_s23  ;;  %v5904_v10 = vpack.c.bf16 %v4927_v9, %v4926_v8  ;;  %v5908_v17 = vpack.c.bf16 %v4929_v14, %v4928_v13  ;;  %v4934_v19 = vld [vmem:[%s7401_s2 + $0x80] sm:$0xff]  ;;  %v4935_v20 = vld [vmem:[%s7401_s2 + $0x88] sm:$0xff]  ;;  %vm6321_vm2 = vmmov 0   ;;  %vm347_vm3 = vcmask 130048   ;;  %s6477_s27 = sld [smem:[#allocation2 + $0x1]] }
  0x13   :  { %5897 = vmatprep.subr.bf16.mxu0 %v5896_v4  ;;  %v5912_v21 = vpack.c.bf16 %v4935_v20, %v4934_v19  ;;  %v4936_v22 = vld [vmem:[%s7401_s2 + $0x90] sm:$0xff]  ;;  %v4937_v23 = vld [vmem:[%s7401_s2 + $0x98] sm:$0xff]  ;;  %5453 = vmatprep.subr.mxu1 %v6320_v25  ;;  %v4931_v28 = vld [vmem:[%s7402_s3 + $0x2] ss:$0 sm:$0xff]  ;;  %v64_v42 = vand.u32 127, %v61_v41  ;;  %v6464_v44 = vshrl.u32 %v61_v41, 7 }
  0x14   :  { %5899 = vmatpush3.bf16.msra.mxu0 %v5896_v4  ;;  %v5916_v24 = vpack.c.bf16 %v4937_v23, %v4936_v22  ;;  %5455 = vmatprep.mubr.msk.f32.mxu1 %vm6321_vm2, %v6320_v25  ;;  %v4923_v31 = vld [vmem:[%s7402_s3] ss:$0 sm:$0xff]  ;;  %v4939_v35 = vld [vmem:[%s7402_s3 + $0x4] ss:$0 sm:$0xff]  ;;  %vm512_vm5 = vcmask 64512   ;;  %v4949_v3 = vld [vmem:[%s7401_s2 + $0x28] sm:$0xff] }
  0x15   :  { %5901 = vmatprep.subr.bf16.mxu0 %v5900_v7  ;;  %v6469_v45 = vsub.s32 0, %v6464_v44  ;;  %v4948_v2 = vld [vmem:[%s7401_s2 + $0x20] sm:$0xff]  ;;  %v4950_v9 = vld [vmem:[%s7401_s2 + $0x30] sm:$0xff]  ;;  %v4959_v20 = vld [vmem:[%s7401_s2 + $0x78] sm:$0xff] }
  0x16   :  { %52 = vrot.lane.b32.xlu0 %v46_v0, %s6319_s28  ;;  %v5920_v4 = vpack.c.bf16 %v4949_v3, %v4948_v2  ;;  %v4958_v19 = vld [vmem:[%s7401_s2 + $0x70] sm:$0xff]  ;;  %v4953_v41 = vld [vmem:[%s7402_s3 + $0x1] ss:$0 sm:$0xff] }
  0x17   :  { %v66_v43 = vstv %s6461_s26  ;;  %v5932_v23 = vpack.c.bf16 %v4959_v20, %v4958_v19 }
  0x18   :  { %5903 = vmatpush3.bf16.msra.mxu0 %v5900_v7  ;;  %vm73_vm4 = vcmp.ge.s32.totalorder %v64_v42, %v66_v43  ;;  %v69_v58 = vstv %s6477_s27 }
  0x19   :  { %5905 = vmatprep.subr.bf16.mxu0 %v5904_v10  ;;  %v74_v46 = vsel %vm73_vm4, -1e+09, %v6320_v25  ;;  %vm75_vm6 = vcmp.ge.s32.totalorder %v64_v42, %v69_v58 }
  0x1a   :  { %v6473_v47 = vrot.slane %v74_v46, %v6469_v45  ;;  %v76_v59 = vsel %vm75_vm6, -1e+09, %v6320_v25 }
  0x1b   :  { %v6484_v61 = vrot.slane %v76_v59, %v6469_v45 }
  0x84   :  { %v50_v11 = vpop.permute.xlu0 %49  ;;  %v56_v15 = vpop.permute.xlu1 %55 }
  0x85   :  { %v6401_v12 = vsel %vm58_vm0, %v46_v0, %v50_v11 }
  0x86   :  { %5428 = vmatprep.mubr.msk.f32.mxu0 %vm89_vm1, %v6401_v12 }
  0x88   :  { %v53_v16 = vpop.permute.xlu0 %52 }
  0x89   :  { %v6411_v18 = vsel %vm58_vm0, %v53_v16, %v56_v15  ;;  %v4956_v15 = vld [vmem:[%s7401_s2 + $0x60] sm:$0xff]  ;;  %v4957_v16 = vld [vmem:[%s7401_s2 + $0x68] sm:$0xff] }
  0x8a   :  { %5429 = vmatmul.mubr.msk.f32.vlgmr.msra.gmra.mrb[0].mxu0 %vm89_vm1, %v6411_v18 }
  0x8b   :  { %5907 = vmatpush3.bf16.msra.mxu0 %v5904_v10  ;;  %5439 = vmatprep.mubr.msk.f32.mxu0 %vm89_vm1, %v6401_v12  ;;  %v4951_v10 = vld [vmem:[%s7401_s2 + $0x38] sm:$0xff] }
  0x8c   :  { %5909 = vmatprep.subr.bf16.mxu0 %v5908_v17  ;;  %v5924_v14 = vpack.c.bf16 %v4951_v10, %v4950_v9 }
  0x8f   :  { %5911 = vmatpush3.bf16.msra.mxu0 %v5908_v17  ;;  %v5928_v17 = vpack.c.bf16 %v4957_v16, %v4956_v15 }
  0x90   :  { %5913 = vmatprep.subr.bf16.mxu0 %v5912_v21 }
  0x92   :  { %5440 = vmatmul.mubr.msk.f32.vlgmr.msra.gmra.mrb[2].mxu0 %vm89_vm1, %v6411_v18 }
  0x93   :  { %5915 = vmatpush3.bf16.msra.mxu0 %v5912_v21  ;;  %5450 = vmatprep.mubr.msk.f32.mxu0 %vm89_vm1, %v6401_v12 }
  0x94   :  { %5917 = vmatprep.subr.bf16.mxu0 %v5916_v24 }
  0x97   :  { %5919 = vmatpush3.bf16.msra.mxu0 %v5916_v24  ;;  %v4964_v24 = vld [vmem:[%s7401_s2 + $0xa0] sm:$0xff] }
  0x98   :  { %5463 = vmatprep.subr.mxu0 %v6320_v25 }
  0x9a   :  { %5451 = vmatmul.mubr.msk.f32.vlgmr.msra.gmra.mrb[4].mxu0 %vm89_vm1, %v6411_v18 }
  0x9b   :  { %5465 = vmatprep.mubr.msk.f32.mxu0 %vm6321_vm2, %v6320_v25 }
 0x15d   :  { %v5430_v26 = vpop.f32.mrb[0].mxu0 }
 0x15e   :  { %v162_v27 = vpop.f32.mrb[1].mxu0  ;;  %v168_v37 = vadd.f32 %v5430_v26, %v4923_v31  ;;  %v4965_v26 = vld [vmem:[%s7401_s2 + $0xa8] sm:$0xff] }
 0x15f   :  { %v163_v33 = vadd.f32 %v4923_v31, %v162_v27  ;;  %v5936_v27 = vpack.c.bf16 %v4965_v26, %v4964_v24  ;;  %v4979_v24 = vld [vmem:[%s7403_s4 + $0x18] sm:$0xff] }
 0x165   :  { %v5441_v29 = vpop.f32.mrb[2].mxu0 }
 0x166   :  { %v250_v30 = vpop.f32.mrb[3].mxu0  ;;  %v256_v34 = vadd.f32 %v5441_v29, %v4931_v28  ;;  %v4967_v29 = vld [vmem:[%s7401_s2 + $0xb8] sm:$0xff] }
 0x167   :  { %v251_v32 = vadd.f32 %v4931_v28, %v250_v30  ;;  %v4966_v28 = vld [vmem:[%s7401_s2 + $0xb0] sm:$0xff] }
 0x168   :  { %v5940_v30 = vpack.c.bf16 %v4967_v29, %v4966_v28  ;;  %v682_v28 = vld [vmem:[%s7403_s4 + $0x8] sm:$0xff] }
 0x169   :  { %5454 = vmatpush3.xpose.msk.msra.mxu1 %vm347_vm3, %v251_v32 }
 0x16a   :  { %5458 = vmatprep.subr.mxu1 %v6320_v25 }
 0x16c   :  { %5456 = vmatmul.mubr.msk.f32.vlgmr.msra.gmra.mrb[0].mxu1 %vm347_vm3, %v163_v33 }
 0x16d   :  { %v5452_v36 = vpop.f32.mrb[4].mxu0  ;;  %5459 = vmatpush3.xpose.msk.msra.mxu1 %vm347_vm3, %v256_v34  ;;  %5460 = vmatprep.mubr.msk.f32.mxu1 %vm6321_vm2, %v6320_v25 }
 0x16e   :  { %v344_v38 = vadd.f32 %v5452_v36, %v4939_v35  ;;  %v338_v39 = vpop.f32.mrb[5].mxu0  ;;  %5468 = vmatprep.subr.mxu1 %v6320_v25 }
 0x16f   :  { %v339_v40 = vadd.f32 %v4939_v35, %v338_v39 }
 0x170   :  { %5461 = vmatmul.mubr.msk.f32.vlgmr.msra.gmra.mrb[2].mxu1 %vm347_vm3, %v168_v37 }
 0x171   :  { %5464 = vmatpush3.msra.mxu0 %v339_v40  ;;  %5469 = vmatpush3.msra.mxu1 %v344_v38  ;;  %v4961_v38 = vld [vmem:[%s7402_s3 + $0x3] ss:$0 sm:$0xff] }
 0x172   :  { %5470 = vmatprep.mubr.msk.f32.mxu1 %vm6321_vm2, %v6320_v25  ;;  %5506 = vmatprep.subr.mxu1 %v6320_v25 }
 0x173   :  { %5921 = vmatprep.subr.bf16.mxu0 %v5920_v4 }
 0x23f   :  { %v420_v48 = vpop.f32.mrb[0].mxu1 }
 0x240   :  { %v500_v49 = vmul.f32 0.25, %v420_v48  ;;  %v5457_v50 = vpop.f32.mrb[1].mxu1 }
 0x242   :  { %v510_v51 = vadd.f32 %v6473_v47, %v500_v49  ;;  %v4969_v49 = vld [vmem:[%s7402_s3 + $0x5] ss:$0 sm:$0xff] }
 0x243   :  { %v496_v52 = vpop.f32.mrb[2].mxu1 }
 0x244   :  { %v5462_v53 = vpop.f32.mrb[3].mxu1  ;;  %v513_v54 = vsel %vm512_vm5, %v510_v51, -inf  ;;  %v501_v60 = vmul.f32 0.25, %v496_v52 }
 0x245   :  { %514 = vmax.xlane.f32.xlu1 %v513_v54 }
 0x246   :  { %v511_v0 = vadd.f32 %v6484_v61, %v501_v60 }
 0x248   :  { %v516_v1 = vsel %vm512_vm5, %v511_v0, -inf }
 0x2d2   :  { %v515_v55 = vpop.xlane.xlu1 %514 }
 0x2d3   :  { %v519_v56 = vsub.f32 %v510_v51, %v515_v55 }
 0x2d5   :  { %v521_v57 = vmul.f32 1.442695, %v519_v56 }
 0x2d7   :  { %6230 = vpow2.f32 %v521_v57 }
 0x2e1   :  { %v6231_v62 = vpop.eup %6230 }
 0x2e2   :  { %v525_v63 = vsel %vm512_vm5, %v6231_v62, 0.0 }
 0x2e3   :  { %526 = vadd.xlane.f32.xlu0 %v525_v63 }
 0x2e7   :  { %517 = vmax.xlane.f32.xlu0 %v516_v1 }
 0x370   :  { %v527_v5 = vpop.xlane.xlu0 %526 }
 0x371   :  { %6232 = vrcp.f32 %v527_v5 }
 0x374   :  { %v518_v6 = vpop.xlane.xlu0 %517 }
 0x375   :  { %v520_v7 = vsub.f32 %v511_v0, %v518_v6 }
 0x377   :  { %v523_v8 = vmul.f32 1.442695, %v520_v7 }
 0x379   :  { %6234 = vpow2.f32 %v523_v8 }
 0x37b   :  { %v6233_v11 = vpop.eup %6232 }
 0x37c   :  { %v533_v13 = vmul.f32 %v6233_v11, %v6231_v62 }
 0x37e   :  { %5466 = vmatmul.mubr.msk.f32.vlgmr.msra.gmra.mrb[6].mxu0 %vm512_vm5, %v533_v13 }
 0x37f   :  { %5923 = vmatpush3.bf16.msra.mxu0 %v5920_v4  ;;  %5481 = vmatprep.mubr.msk.f32.mxu0 %vm89_vm1, %v6401_v12 }
 0x380   :  { %5925 = vmatprep.subr.bf16.mxu0 %v5924_v14 }
 0x383   :  { %v6235_v21 = vpop.eup %6234  ;;  %5927 = vmatpush3.bf16.msra.mxu0 %v5924_v14 }
 0x384   :  { %5929 = vmatprep.subr.bf16.mxu0 %v5928_v17  ;;  %v528_v22 = vsel %vm512_vm5, %v6235_v21, 0.0 }
 0x385   :  { %529 = vadd.xlane.f32.xlu1 %v528_v22 }
 0x386   :  { %5482 = vmatmul.mubr.msk.f32.vlgmr.msra.gmra.mrb[8].mxu0 %vm89_vm1, %v6411_v18 }
 0x387   :  { %5931 = vmatpush3.bf16.msra.mxu0 %v5928_v17  ;;  %5492 = vmatprep.mubr.msk.f32.mxu0 %vm89_vm1, %v6401_v12 }
 0x388   :  { %5933 = vmatprep.subr.bf16.mxu0 %v5932_v23 }
 0x38b   :  { %5935 = vmatpush3.bf16.msra.mxu0 %v5932_v23  ;;  %v4978_v23 = vld [vmem:[%s7403_s4 + $0x10] sm:$0xff] }
 0x38c   :  { %5937 = vmatprep.subr.bf16.mxu0 %v5936_v27  ;;  %v5944_v26 = vpack.c.bf16 %v4979_v24, %v4978_v23  ;;  %v1483_v23 = vsub.s32 3, %v6464_v44 }
 0x38e   :  { %5493 = vmatmul.mubr.msk.f32.vlgmr.msra.gmra.mrb[10].mxu0 %vm89_vm1, %v6411_v18 }
 0x38f   :  { %5939 = vmatpush3.bf16.msra.mxu0 %v5936_v27  ;;  %5503 = vmatprep.mubr.msk.f32.mxu0 %vm89_vm1, %v6401_v12  ;;  %v681_v27 = vld [vmem:[%s7403_s4] sm:$0xff] }
 0x390   :  { %5941 = vmatprep.subr.bf16.mxu0 %v5940_v30  ;;  %v5948_v29 = vpack.c.bf16 %v682_v28, %v681_v27 }
 0x393   :  { %5943 = vmatpush3.bf16.msra.mxu0 %v5940_v30 }
 0x394   :  { %5516 = vmatprep.subr.mxu0 %v6320_v25 }
 0x396   :  { %5504 = vmatmul.mubr.msk.f32.vlgmr.msra.gmra.mrb[12].mxu0 %vm89_vm1, %v6411_v18 }
 0x397   :  { %5518 = vmatprep.mubr.msk.f32.mxu0 %vm6321_vm2, %v6320_v25 }
 0x412   :  { %v530_v31 = vpop.xlane.xlu1 %529 }
 0x413   :  { %6236 = vrcp.f32 %v530_v31 }
 0x41d   :  { %v6237_v32 = vpop.eup %6236 }
 0x41e   :  { %v534_v33 = vmul.f32 %v6237_v32, %v6235_v21 }
 0x420   :  { %5471 = vmatmul.mubr.msk.f32.vlgmr.msra.gmra.mrb[4].mxu1 %vm512_vm5, %v534_v33 }
 0x421   :  { %5508 = vmatprep.mubr.msk.f32.mxu1 %vm6321_vm2, %v6320_v25 }
 0x451   :  { %v6545_v34 = vpop.f32.mrb[6].mxu0 }
 0x452   :  { %v5467_v35 = vpop.f32.mrb[7].mxu0 }
 0x453   :  { %v6322_v35 = vmov 0  }
 0x454   :  { %6229 = vset.pattern.permute.xlu1 %v6322_v35  ;;  %6228 = vset.pattern.permute.xlu0 %v6322_v35 }
 0x459   :  { %v5483_v36 = vpop.f32.mrb[8].mxu0 }
 0x45a   :  { %v762_v37 = vpop.f32.mrb[9].mxu0  ;;  %v768_v51 = vadd.f32 %v5483_v36, %v4953_v41  ;;  %v6594_v36 = vld [vmem:[%s7407_s8] sm:$0x3f] }
 0x45b   :  { %v763_v46 = vadd.f32 %v4953_v41, %v762_v37  ;;  %v1439_v37 = vrot.slane %v6594_v36, %v6469_v45 }
 0x461   :  { %v5494_v39 = vpop.f32.mrb[10].mxu0 }
 0x462   :  { %v850_v40 = vpop.f32.mrb[11].mxu0  ;;  %v856_v48 = vadd.f32 %v5494_v39, %v4961_v38 }
 0x463   :  { %v851_v42 = vadd.f32 %v4961_v38, %v850_v40 }
 0x465   :  { %5507 = vmatpush3.xpose.msk.msra.mxu1 %vm347_vm3, %v851_v42 }
 0x466   :  { %5511 = vmatprep.subr.mxu1 %v6320_v25 }
 0x468   :  { %5509 = vmatmul.mubr.msk.f32.vlgmr.msra.gmra.mrb[6].mxu1 %vm347_vm3, %v763_v46 }
 0x469   :  { %v5505_v50 = vpop.f32.mrb[12].mxu0  ;;  %5512 = vmatpush3.xpose.msk.msra.mxu1 %vm347_vm3, %v856_v48  ;;  %5513 = vmatprep.mubr.msk.f32.mxu1 %vm6321_vm2, %v6320_v25 }
 0x46a   :  { %v944_v52 = vadd.f32 %v5505_v50, %v4969_v49  ;;  %v938_v53 = vpop.f32.mrb[13].mxu0  ;;  %5521 = vmatprep.subr.mxu1 %v6320_v25 }
 0x46b   :  { %v939_v54 = vadd.f32 %v4969_v49, %v938_v53 }
 0x46c   :  { %5514 = vmatmul.mubr.msk.f32.vlgmr.msra.gmra.mrb[8].mxu1 %vm347_vm3, %v768_v51  ;;  %v70_v51 = vsub.s32 %v6464_v44, %v69_v58  ;;  %v1509_v58 = vld [vmem:[%s7404_s5] sm:$0xff] }
 0x46d   :  { %5517 = vmatpush3.msra.mxu0 %v939_v54  ;;  %5522 = vmatpush3.msra.mxu1 %v944_v52  ;;  %v67_v52 = vsub.s32 %v6464_v44, %v66_v43  ;;  %v1510_v43 = vld [vmem:[%s7404_s5 + $0x8] sm:$0xff] }
 0x46e   :  { %5523 = vmatprep.mubr.msk.f32.mxu1 %vm6321_vm2, %v6320_v25  ;;  %5945 = vmatprep.subr.bf16.mxu0 %v5944_v26  ;;  %vm72_vm7 = vcmp.ge.s32.totalorder %v70_v51, 0 }
 0x46f   :  { %v1488_v53 = vsel %vm72_vm7, 1, %v6322_v35  ;;  %vm71_vm8 = vcmp.ge.s32.totalorder %v67_v52, 0  ;;  %vm2387_vm7 = vcmask 523264  }
 0x470   :  { %v1487_v54 = vsel %vm71_vm8, 1, %v6322_v35 }
 0x4f3   :  { %v677_v55 = vpop.f32.mrb[4].mxu1 }
 0x4f4   :  { %v5472_v56 = vpop.f32.mrb[5].mxu1 }
 0x4f5   :  { %v4985_v56 = vld [vmem:[%s7404_s5 + $0x28] sm:$0xff] }
 0x53b   :  { %v1019_v57 = vpop.f32.mrb[6].mxu1 }
 0x53c   :  { %v1099_v59 = vmul.f32 0.25, %v1019_v57  ;;  %v5510_v60 = vpop.f32.mrb[7].mxu1 }
 0x53d   :  { %v4986_v60 = vld [vmem:[%s7404_s5 + $0x30] sm:$0xff] }
 0x53e   :  { %v1101_v62 = vadd.f32 %v1099_v59, %v6473_v47  ;;  %v5960_v59 = vpack.c.bf16 %v1510_v43, %v1509_v58  ;;  %v4998_v43 = vld [vmem:[%s7404_s5 + $0x60] sm:$0xff] }
 0x53f   :  { %v1095_v63 = vpop.f32.mrb[8].mxu1 }
 0x540   :  { %v1100_v0 = vmul.f32 0.25, %v1095_v63  ;;  %v5515_v1 = vpop.f32.mrb[9].mxu1  ;;  %v1103_v2 = vsel %vm512_vm5, %v1101_v62, -inf  ;;  %5961 = vmatprep.subr.bf16.mxu1 %v5960_v59  ;;  %v1511_v63 = vld [vmem:[%s7404_s5 + $0x10] sm:$0xff] }
 0x541   :  { %1104 = vmax.xlane.f32.xlu0 %v1103_v2  ;;  %v1512_v1 = vld [vmem:[%s7404_s5 + $0x18] sm:$0xff] }
 0x542   :  { %v1102_v3 = vadd.f32 %v1100_v0, %v6484_v61  ;;  %v5964_v2 = vpack.c.bf16 %v1512_v1, %v1511_v63  ;;  %v5000_v1 = vld [vmem:[%s7404_s5 + $0x70] sm:$0xff] }
 0x544   :  { %v1106_v4 = vsel %vm512_vm5, %v1102_v3, -inf }
 0x545   :  { %1107 = vmax.xlane.f32.xlu1 %v1106_v4  ;;  %v4993_v4 = vld [vmem:[%s7404_s5 + $0x48] sm:$0xff] }
 0x5ce   :  { %v1105_v5 = vpop.xlane.xlu0 %1104 }
 0x5cf   :  { %v1109_v6 = vsub.f32 %v1101_v62, %v1105_v5  ;;  %v4987_v62 = vld [vmem:[%s7404_s5 + $0x38] sm:$0xff] }
 0x5d0   :  { %v5956_v0 = vpack.c.bf16 %v4987_v62, %v4986_v60  ;;  %v6727_v62 = vadd.s32 4294967295, %v6464_v44 }
 0x5d1   :  { %v1111_v7 = vmul.f32 1.442695, %v1109_v6 }
 0x5d2   :  { %v1108_v8 = vpop.xlane.xlu1 %1107  ;;  %vm1791_vm14 = vcmp.ge.s32.totalorder %v6727_v62, 0  ;;  %v5138_v62 = vld [vmem:[%s7404_s5 + $0x1d0] sm:$0xff] }
 0x5d3   :  { %6238 = vpow2.f32 %v1111_v7  ;;  %v1110_v9 = vsub.f32 %v1102_v3, %v1108_v8  ;;  %v4992_v3 = vld [vmem:[%s7404_s5 + $0x40] sm:$0xff] }
 0x5d4   :  { %v6650_v5 = vpack.c.bf16 %v4993_v4, %v4992_v3 }
 0x5d5   :  { %v1113_v10 = vmul.f32 1.442695, %v1110_v9 }
 0x5d7   :  { %6240 = vpow2.f32 %v1113_v10 }
 0x5dd   :  { %v6239_v11 = vpop.eup %6238 }
 0x5de   :  { %v1115_v13 = vsel %vm512_vm5, %v6239_v11, 0.0 }
 0x5df   :  { %1116 = vadd.xlane.f32.xlu0 %v1115_v13 }
 0x5e1   :  { %v6241_v14 = vpop.eup %6240 }
 0x5e2   :  { %v1118_v15 = vsel %vm512_vm5, %v6241_v14, 0.0 }
 0x5e3   :  { %1119 = vadd.xlane.f32.xlu1 %v1118_v15 }
 0x66c   :  { %v1117_v16 = vpop.xlane.xlu0 %1116 }
 0x66d   :  { %6242 = vrcp.f32 %v1117_v16 }
 0x670   :  { %v1120_v17 = vpop.xlane.xlu1 %1119 }
 0x671   :  { %6244 = vrcp.f32 %v1120_v17 }
 0x677   :  { %v6243_v19 = vpop.eup %6242 }
 0x678   :  { %v1123_v20 = vmul.f32 %v6243_v19, %v6239_v11 }
 0x67a   :  { %5519 = vmatmul.mubr.msk.f32.vlgmr.msra.gmra.mrb[14].mxu0 %vm512_vm5, %v1123_v20 }
 0x67b   :  { %v6245_v21 = vpop.eup %6244  ;;  %5947 = vmatpush3.bf16.msra.mxu0 %v5944_v26 }
 0x67c   :  { %v1124_v22 = vmul.f32 %v6245_v21, %v6241_v14  ;;  %5949 = vmatprep.subr.bf16.mxu0 %v5948_v29 }
 0x67e   :  { %5524 = vmatmul.mubr.msk.f32.vlgmr.msra.gmra.mrb[10].mxu1 %vm512_vm5, %v1124_v22  ;;  %v1477_v22 = vsub.s32 2, %v6464_v44 }
 0x67f   :  { %5963 = vmatpush3.bf16.msra.mxu1 %v5960_v59  ;;  %v4999_v59 = vld [vmem:[%s7404_s5 + $0x68] sm:$0xff] }
 0x680   :  { %5965 = vmatprep.subr.bf16.mxu1 %v5964_v2  ;;  %v1478_v26 = vrot.slane %v6594_v36, %v1477_v22  ;;  %v5976_v63 = vpack.c.bf16 %v4999_v59, %v4998_v43 }
 0x683   :  { %5967 = vmatpush3.bf16.msra.mxu1 %v5964_v2  ;;  %v5001_v2 = vld [vmem:[%s7404_s5 + $0x78] sm:$0xff] }
 0x684   :  { %5969 = vmatprep.subr.bf16.mxu1 %v6650_v5  ;;  %v5980_v4 = vpack.c.bf16 %v5001_v2, %v5000_v1  ;;  %v6839_v2 = vadd.s32 4, %v6464_v44 }
 0x686   :  { %vm2270_vm6 = vcmp.lt.s32.totalorder %v6839_v2, 8 }
 0x74d   :  { %v1194_v30 = vpop.f32.mrb[14].mxu0 }
 0x74e   :  { %v5520_v31 = vpop.f32.mrb[15].mxu0  ;;  %5530 = vmatprep.mubr.msk.f32.mxu0 %vm347_vm3, %v1194_v30 }
 0x74f   :  { %v1484_v31 = vrot.slane %v6594_v36, %v1483_v23 }
 0x751   :  { %v1267_v32 = vpop.f32.mrb[10].mxu1 }
 0x752   :  { %v5525_v33 = vpop.f32.mrb[11].mxu1  ;;  %5531 = vmatmul.mubr.msk.f32.vlgmr.msra.gmra.mrb[16].mxu0 %vm347_vm3, %v1267_v32 }
 0x753   :  { %5951 = vmatpush3.bf16.msra.mxu0 %v5948_v29  ;;  %5537 = vmatprep.mubr.msk.f32.mxu0 %vm347_vm3, %v6545_v34 }
 0x75a   :  { %5538 = vmatmul.mubr.msk.f32.vlgmr.msra.gmra.mrb[16].mxu0 %vm347_vm3, %v677_v55  ;;  %v4984_v55 = vld [vmem:[%s7404_s5 + $0x20] sm:$0xff] }
 0x75b   :  { %v5952_v57 = vpack.c.bf16 %v4985_v56, %v4984_v55 }
 0x75d   :  { %5953 = vmatprep.subr.bf16.mxu0 %v5952_v57 }
 0x75e   :  { %5955 = vmatpush3.bf16.msra.mxu0 %v5952_v57 }
 0x75f   :  { %5957 = vmatprep.subr.bf16.mxu0 %v5956_v0 }
 0x762   :  { %5959 = vmatpush3.bf16.msra.mxu0 %v5956_v0 }
 0x82d   :  { %v5539_v38 = vpop.f32.mrb[16].mxu0 }
 0x82e   :  { %v1441_v39 = vadd.f32 %v5539_v38, %v1439_v37  ;;  %v1427_v40 = vpop.f32.mrb[17].mxu0  ;;  %v6668_v38 = vadd.s32 4294967293, %v6464_v44 }
 0x82f   :  { %v1440_v41 = vadd.f32 %v1439_v37, %v1427_v40  ;;  %v6672_v40 = vadd.s32 4294967292, %v6464_v44 }
 0x830   :  { %v6599_v34 = vadd.f32 %v1441_v39, %v6411_v18  ;;  %vm1516_vm11 = vcmp.ge.s32.totalorder %v6668_v38, 0 }
 0x831   :  { %v6602_v42 = vadd.f32 %v1440_v41, %v6401_v12  ;;  %vm1502_vm12 = vcmp.ge.s32.totalorder %v6672_v40, 0 }
 0x832   :  { %v1447_v46 = vsel %vm89_vm1, %v6599_v34, 0.0  ;;  %v1454_v48 = vmul.f32 %v6599_v34, %v6599_v34 }
 0x833   :  { %1448 = vadd.xlane.f32.xlu1 %v1447_v46  ;;  %v1444_v49 = vsel %vm89_vm1, %v6602_v42, 0.0  ;;  %v1453_v50 = vmul.f32 %v6602_v42, %v6602_v42 }
 0x834   :  { %1445 = vadd.xlane.f32.xlu0 %v1444_v49  ;;  %v1458_v18 = vsel %vm89_vm1, %v1454_v48, 0.0 }
 0x835   :  { %v1455_v12 = vsel %vm89_vm1, %v1453_v50, 0.0 }
 0x837   :  { %1459 = vadd.xlane.f32.xlu1 %v1458_v18  ;;  %v4994_v18 = vld [vmem:[%s7404_s5 + $0x50] sm:$0xff] }
 0x838   :  { %1456 = vadd.xlane.f32.xlu0 %v1455_v12  ;;  %v4995_v12 = vld [vmem:[%s7404_s5 + $0x58] sm:$0xff] }
 0x839   :  { %v5972_v56 = vpack.c.bf16 %v4995_v12, %v4994_v18  ;;  %v5022_v12 = vld [vmem:[%s7404_s5 + $0xe0] sm:$0xff] }
 0x848   :  { %1493 = vperm.xlu1 %6229, %v1488_v53  }
 0x84e   :  { %1490 = vperm.xlu0 %6228, %v1487_v54  }
 0x8c0   :  { %v1449_v6 = vpop.xlane.xlu1 %1448 }
 0x8c1   :  { %v1452_v7 = vmul.f32 0.03125, %v1449_v6  ;;  %v1446_v8 = vpop.xlane.xlu0 %1445  ;;  %v5004_v6 = vld [vmem:[%s7404_s5 + $0x80] sm:$0xff] }
 0x8c2   :  { %v1451_v9 = vmul.f32 0.03125, %v1446_v8 }
 0x8c3   :  { %v1466_v11 = vmul.f32 %v1452_v7, %v1452_v7  ;;  %v1464_v24 = vsub.f32 %v6599_v34, %v1452_v7  ;;  %v5005_v7 = vld [vmem:[%s7404_s5 + $0x88] sm:$0xff] }
 0x8c4   :  { %v1460_v10 = vpop.xlane.xlu1 %1459  ;;  %v1465_v15 = vmul.f32 %v1451_v9, %v1451_v9  ;;  %v1463_v28 = vsub.f32 %v6602_v42, %v1451_v9  ;;  %v6676_v42 = vadd.s32 4294967294, %v6464_v44  ;;  %v5984_v9 = vpack.c.bf16 %v5005_v7, %v5004_v6  ;;  %v5031_v6 = vld [vmem:[%s7404_s5 + $0x118] sm:$0xff] }
 0x8c5   :  { %v1462_v13 = vmul.f32 0.03125, %v1460_v10  ;;  %v1457_v14 = vpop.xlane.xlu0 %1456 }
 0x8c6   :  { %v1461_v16 = vmul.f32 0.03125, %v1457_v14  ;;  %vm1693_vm13 = vcmp.ge.s32.totalorder %v6676_v42, 0 }
 0x8c7   :  { %v1468_v17 = vsub.f32 %v1462_v13, %v1466_v11  ;;  %v5006_v11 = vld [vmem:[%s7404_s5 + $0x90] sm:$0xff]  ;;  %v5007_v13 = vld [vmem:[%s7404_s5 + $0x98] sm:$0xff] }
 0x8c8   :  { %v1467_v19 = vsub.f32 %v1461_v16, %v1465_v15  ;;  %v6663_v32 = vpop.permute.xlu1 %1493  ;;  %v5988_v14 = vpack.c.bf16 %v5007_v13, %v5006_v11  ;;  %v5010_v16 = vld [vmem:[%s7404_s5 + $0xa0] sm:$0xff]  ;;  %v2377_v13 = vld [vmem:[%s7406_s7 + $0x10] sm:$0xff] }
 0x8c9   :  { %v1470_v20 = vadd.f32 1e-05, %v1468_v17  ;;  %vm1496_vm9 = vcmp.eq.s32.totalorder %v6663_v32, 1  ;;  %v5011_v17 = vld [vmem:[%s7404_s5 + $0xa8] sm:$0xff]  ;;  %v2375_v11 = vld [vmem:[%s7406_s7] sm:$0xff] }
 0x8ca   :  { %v1469_v21 = vadd.f32 1e-05, %v1467_v19  ;;  %v6769_v19 = vadd.s32 1, %v6464_v44 }
 0x8cb   :  { %6246 = vrsqrt.f32 %v1470_v20  ;;  %v5992_v20 = vpack.c.bf16 %v5011_v17, %v5010_v16  ;;  %v2379_v16 = vld [vmem:[%s7406_s7 + $0x20] sm:$0xff]  ;;  %v2380_v17 = vld [vmem:[%s7406_s7 + $0x28] sm:$0xff] }
 0x8cc   :  { %6248 = vrsqrt.f32 %v1469_v21  ;;  %v5012_v21 = vld [vmem:[%s7404_s5 + $0xb0] sm:$0xff]  ;;  %vm1978_vm15 = vcmp.lt.s32.totalorder %v6769_v19, 8 }
 0x8cd   :  { %v6665_v35 = vpop.permute.xlu0 %1490 }
 0x8ce   :  { %vm1495_vm10 = vcmp.eq.s32.totalorder %v6665_v35, 1 }
 0x8d5   :  { %v6247_v27 = vpop.eup %6246 }
 0x8d6   :  { %v6249_v29 = vpop.eup %6248  ;;  %v1474_v30 = vmul.f32 %v6247_v27, %v1464_v24  ;;  %v5013_v24 = vld [vmem:[%s7404_s5 + $0xb8] sm:$0xff] }
 0x8d7   :  { %v1473_v33 = vmul.f32 %v6249_v29, %v1463_v28  ;;  %v5996_v27 = vpack.c.bf16 %v5013_v24, %v5012_v21  ;;  %v5016_v28 = vld [vmem:[%s7404_s5 + $0xc0] sm:$0xff]  ;;  %v5017_v29 = vld [vmem:[%s7404_s5 + $0xc8] sm:$0xff]  ;;  %v2381_v21 = vld [vmem:[%s7406_s7 + $0x30] sm:$0xff] }
 0x8d8   :  { %v1480_v37 = vmul.f32 %v1478_v26, %v1474_v30  ;;  %v2382_v24 = vld [vmem:[%s7406_s7 + $0x38] sm:$0xff] }
 0x8d9   :  { %v1479_v39 = vmul.f32 %v1478_v26, %v1473_v33  ;;  %v6000_v33 = vpack.c.bf16 %v5017_v29, %v5016_v28 }
 0x8da   :  { %v1486_v41 = vadd.f32 %v1484_v31, %v1480_v37 }
 0x8db   :  { %v1485_v34 = vadd.f32 %v1484_v31, %v1479_v39  ;;  %v6791_v31 = vadd.s32 2, %v6464_v44  ;;  %v5018_v39 = vld [vmem:[%s7404_s5 + $0xd0] sm:$0xff] }
 0x8dc   :  { %v6680_v46 = vsel %vm1496_vm9, 0.0, %v1486_v41  ;;  %v5019_v41 = vld [vmem:[%s7404_s5 + $0xd8] sm:$0xff] }
 0x8dd   :  { %v6685_v48 = vsel %vm1495_vm10, 0.0, %v1485_v34  ;;  %v1514_v49 = vrot.slane %v6680_v46, 5  ;;  %v1500_v50 = vrot.slane %v6680_v46, 4  ;;  %v1691_v0 = vrot.slane %v6680_v46, 6 }
 0x8de   :  { %v1513_v51 = vrot.slane %v6685_v48, 5  ;;  %v1499_v52 = vrot.slane %v6685_v48, 4  ;;  %v1690_v53 = vrot.slane %v6685_v48, 6  ;;  %v1788_v3 = vrot.slane %v6685_v48, 7 }
 0x8df   :  { %v1522_v58 = vsel %vm1516_vm11, %v1514_v49, 0.0  ;;  %v1508_v57 = vsel %vm1502_vm12, %v1500_v50, 0.0  ;;  %v1789_v10 = vrot.slane %v6680_v46, 7  ;;  %v1974_v26 = vrot.slane %v6685_v48, 1 }
 0x8e0   :  { %v1521_v54 = vsel %vm1516_vm11, %v1513_v51, 0.0  ;;  %v1507_v55 = vsel %vm1502_vm12, %v1499_v52, 0.0  ;;  %v1698_v60 = vsel %vm1693_vm13, %v1690_v53, 0.0  ;;  %v1796_v8 = vsel %vm1791_vm14, %v1788_v3, 0.0  ;;  %v5023_v51 = vld [vmem:[%s7404_s5 + $0xe8] sm:$0xff] }
 0x8e1   :  { %5548 = vmatprep.mubr.msk.f32.mxu0 %vm89_vm1, %v1521_v54  ;;  %5559 = vmatprep.mubr.msk.f32.mxu1 %vm89_vm1, %v1507_v55  ;;  %v1797_v15 = vsel %vm1791_vm14, %v1789_v10, 0.0  ;;  %v1982_v30 = vsel %vm1978_vm15, %v1974_v26, 0.0  ;;  %v1975_v37 = vrot.slane %v6680_v46, 1  ;;  %v2072_v34 = vrot.slane %v6685_v48, 2 }
 0x8e2   :  { %5549 = vmatmul.mubr.msk.f32.vlgmr.msra.gmra.mrb[18].mxu0 %vm89_vm1, %v1522_v58  ;;  %5560 = vmatmul.mubr.msk.f32.vlgmr.msra.gmra.mrb[12].mxu1 %vm89_vm1, %v1508_v57  ;;  %vm2076_vm0 = vcmp.lt.s32.totalorder %v6791_v31, 8  ;;  %v6004_v49 = vpack.c.bf16 %v5019_v41, %v5018_v39  ;;  %v6815_v54 = vadd.s32 3, %v6464_v44  ;;  %v6008_v55 = vpack.c.bf16 %v5023_v51, %v5022_v12  ;;  %v5024_v58 = vld [vmem:[%s7404_s5 + $0xf0] sm:$0xff]  ;;  %v5025_v57 = vld [vmem:[%s7404_s5 + $0xf8] sm:$0xff] }
 0x8e3   :  { %5971 = vmatpush3.bf16.msra.mxu1 %v6650_v5  ;;  %5570 = vmatprep.mubr.msk.f32.mxu1 %vm89_vm1, %v1698_v60  ;;  %v1699_v5 = vsel %vm1693_vm13, %v1691_v0, 0.0  ;;  %v1983_v18 = vsel %vm1978_vm15, %v1975_v37, 0.0  ;;  %v2080_v53 = vsel %vm2076_vm0, %v2072_v34, 0.0  ;;  %v2170_v43 = vrot.slane %v6685_v48, 3  ;;  %v5029_v0 = vld [vmem:[%s7404_s5 + $0x108] sm:$0xff] }
 0x8e4   :  { %5973 = vmatprep.subr.bf16.mxu1 %v5972_v56  ;;  %vm2174_vm4 = vcmp.lt.s32.totalorder %v6815_v54, 8  ;;  %v6012_v59 = vpack.c.bf16 %v5025_v57, %v5024_v58  ;;  %v2275_v10 = vsel %vm2270_vm6, %v1500_v50, 0.0  ;;  %v6036_v26 = vpack.c.bf16 %v2382_v24, %v2381_v21  ;;  %v5168_v54 = vld [vmem:[%s7406_s7 + $0x70] sm:$0xff] }
 0x8e5   :  { %v2178_v1 = vsel %vm2174_vm4, %v2170_v43, 0.0  ;;  %v2385_v12 = vsub.s32 1, %v6464_v44 }
 0x8e7   :  { %5975 = vmatpush3.bf16.msra.mxu1 %v5972_v56  ;;  %v2073_v56 = vrot.slane %v6680_v46, 2  ;;  %v2386_v51 = vrot.slane %v6594_v36, %v2385_v12 }
 0x8e8   :  { %5977 = vmatprep.subr.bf16.mxu1 %v5976_v63 }
 0x8e9   :  { %v2081_v60 = vsel %vm2076_vm0, %v2073_v56, 0.0 }
 0x8ea   :  { %5571 = vmatmul.mubr.msk.f32.vlgmr.msra.gmra.mrb[12].mxu1 %vm89_vm1, %v1699_v5  ;;  %v5030_v5 = vld [vmem:[%s7404_s5 + $0x110] sm:$0xff] }
 0x8eb   :  { %5979 = vmatpush3.bf16.msra.mxu1 %v5976_v63  ;;  %5581 = vmatprep.mubr.msk.f32.mxu1 %vm89_vm1, %v1796_v8  ;;  %v5028_v63 = vld [vmem:[%s7404_s5 + $0x100] sm:$0xff]  ;;  %v6020_v7 = vpack.c.bf16 %v5031_v6, %v5030_v5  ;;  %v5087_v6 = vld [vmem:[%s7401_s2 + $0x168] sm:$0xff] }
 0x8ec   :  { %5981 = vmatprep.subr.bf16.mxu1 %v5980_v4  ;;  %v6016_v3 = vpack.c.bf16 %v5029_v0, %v5028_v63 }
 0x8ef   :  { %5983 = vmatpush3.bf16.msra.mxu1 %v5980_v4  ;;  %v2171_v4 = vrot.slane %v6680_v46, 3 }
 0x8f0   :  { %5985 = vmatprep.subr.bf16.mxu1 %v5984_v9 }
 0x8f1   :  { %v2179_v8 = vsel %vm2174_vm4, %v2171_v4, 0.0  ;;  %v5086_v4 = vld [vmem:[%s7401_s2 + $0x160] sm:$0xff] }
 0x8f2   :  { %5582 = vmatmul.mubr.msk.f32.vlgmr.msra.gmra.mrb[12].mxu1 %vm89_vm1, %v1797_v15  ;;  %v2378_v15 = vld [vmem:[%s7406_s7 + $0x18] sm:$0xff] }
 0x8f3   :  { %5987 = vmatpush3.bf16.msra.mxu1 %v5984_v9  ;;  %5592 = vmatprep.mubr.msk.f32.mxu1 %vm89_vm1, %v6685_v48  ;;  %v2274_v9 = vsel %vm2270_vm6, %v1499_v52, 0.0  ;;  %v2376_v52 = vld [vmem:[%s7406_s7 + $0x8] sm:$0xff]  ;;  %v6028_v50 = vpack.c.bf16 %v2378_v15, %v2377_v13  ;;  %v5046_v13 = vld [vmem:[%s7401_s2 + $0x100] sm:$0xff] }
 0x8f4   :  { %5989 = vmatprep.subr.bf16.mxu1 %v5988_v14  ;;  %v5047_v15 = vld [vmem:[%s7401_s2 + $0x108] sm:$0xff] }
 0x8f7   :  { %5991 = vmatpush3.bf16.msra.mxu1 %v5988_v14  ;;  %v6024_v14 = vpack.c.bf16 %v2376_v52, %v2375_v11  ;;  %v5088_v11 = vld [vmem:[%s7401_s2 + $0x170] sm:$0xff]  ;;  %v5089_v52 = vld [vmem:[%s7401_s2 + $0x178] sm:$0xff] }
 0x8f8   :  { %5993 = vmatprep.subr.bf16.mxu1 %v5992_v20 }
 0x8f9   :  { %6025 = vmatprep.subr.bf16.mxu0 %v6024_v14 }
 0x8fa   :  { %5593 = vmatmul.mubr.msk.f32.vlgmr.msra.gmra.mrb[12].mxu1 %vm89_vm1, %v6680_v46  ;;  %6027 = vmatpush3.bf16.msra.mxu0 %v6024_v14  ;;  %v6084_v14 = vpack.c.bf16 %v5089_v52, %v5088_v11 }
 0x8fb   :  { %5995 = vmatpush3.bf16.msra.mxu1 %v5992_v20  ;;  %5603 = vmatprep.mubr.msk.f32.mxu1 %vm89_vm1, %v1982_v30  ;;  %v6032_v20 = vpack.c.bf16 %v2380_v17, %v2379_v16  ;;  %v5034_v30 = vld [vmem:[%s7405_s6] ss:$0 sm:$0xff] }
 0x8fc   :  { %5997 = vmatprep.subr.bf16.mxu1 %v5996_v27  ;;  %6029 = vmatprep.subr.bf16.mxu0 %v6028_v50 }
 0x8fe   :  { %6031 = vmatpush3.bf16.msra.mxu0 %v6028_v50  ;;  %v6048_v50 = vpack.c.bf16 %v5047_v15, %v5046_v13 }
 0x8ff   :  { %5999 = vmatpush3.bf16.msra.mxu1 %v5996_v27  ;;  %6033 = vmatprep.subr.bf16.mxu0 %v6032_v20 }
 0x900   :  { %6001 = vmatprep.subr.bf16.mxu1 %v6000_v33 }
 0x902   :  { %5604 = vmatmul.mubr.msk.f32.vlgmr.msra.gmra.mrb[12].mxu1 %vm89_vm1, %v1983_v18  ;;  %6035 = vmatpush3.bf16.msra.mxu0 %v6032_v20 }
 0x903   :  { %6003 = vmatpush3.bf16.msra.mxu1 %v6000_v33  ;;  %5614 = vmatprep.mubr.msk.f32.mxu1 %vm89_vm1, %v2080_v53 }
 0x904   :  { %6005 = vmatprep.subr.bf16.mxu1 %v6004_v49  ;;  %6037 = vmatprep.subr.bf16.mxu0 %v6036_v26 }
 0x906   :  { %6039 = vmatpush3.bf16.msra.mxu0 %v6036_v26 }
 0x907   :  { %6007 = vmatpush3.bf16.msra.mxu1 %v6004_v49 }
 0x908   :  { %6009 = vmatprep.subr.bf16.mxu1 %v6008_v55 }
 0x90a   :  { %5615 = vmatmul.mubr.msk.f32.vlgmr.msra.gmra.mrb[12].mxu1 %vm89_vm1, %v2081_v60 }
 0x90b   :  { %6011 = vmatpush3.bf16.msra.mxu1 %v6008_v55  ;;  %5625 = vmatprep.mubr.msk.f32.mxu1 %vm89_vm1, %v2178_v1 }
 0x90c   :  { %6013 = vmatprep.subr.bf16.mxu1 %v6012_v59 }
 0x90f   :  { %6015 = vmatpush3.bf16.msra.mxu1 %v6012_v59 }
 0x910   :  { %6017 = vmatprep.subr.bf16.mxu1 %v6016_v3 }
 0x912   :  { %5626 = vmatmul.mubr.msk.f32.vlgmr.msra.gmra.mrb[12].mxu1 %vm89_vm1, %v2179_v8  ;;  %v5041_v8 = vld [vmem:[%s7401_s2 + $0xd8] sm:$0xff] }
 0x913   :  { %6019 = vmatpush3.bf16.msra.mxu1 %v6016_v3  ;;  %5636 = vmatprep.mubr.msk.f32.mxu1 %vm89_vm1, %v2274_v9  ;;  %v6080_v9 = vpack.c.bf16 %v5087_v6, %v5086_v4  ;;  %v5054_v4 = vld [vmem:[%s7401_s2 + $0x140] sm:$0xff] }
 0x914   :  { %6021 = vmatprep.subr.bf16.mxu1 %v6020_v7 }
 0x917   :  { %6023 = vmatpush3.bf16.msra.mxu1 %v6020_v7  ;;  %v5040_v7 = vld [vmem:[%s7401_s2 + $0xd0] sm:$0xff] }
 0x918   :  { %6081 = vmatprep.subr.bf16.mxu1 %v6080_v9 }
 0x91a   :  { %5637 = vmatmul.mubr.msk.f32.vlgmr.msra.gmra.mrb[12].mxu1 %vm89_vm1, %v2275_v10  ;;  %v6044_v10 = vpack.c.bf16 %v5041_v8, %v5040_v7  ;;  %v5056_v7 = vld [vmem:[%s7401_s2 + $0x150] sm:$0xff]  ;;  %v5057_v8 = vld [vmem:[%s7401_s2 + $0x158] sm:$0xff] }
 0x91b   :  { %6083 = vmatpush3.bf16.msra.mxu1 %v6080_v9  ;;  %v6060_v9 = vpack.c.bf16 %v5057_v8, %v5056_v7  ;;  %v5070_v7 = vld [vmem:[%s7401_s2 + $0xe0] sm:$0xff]  ;;  %v5071_v8 = vld [vmem:[%s7401_s2 + $0xe8] sm:$0xff] }
 0x91c   :  { %6085 = vmatprep.subr.bf16.mxu1 %v6084_v14 }
 0x91f   :  { %6087 = vmatpush3.bf16.msra.mxu1 %v6084_v14  ;;  %v5051_v14 = vld [vmem:[%s7402_s3 + $0x8] ss:$0 sm:$0xff] }
 0x920   :  { %5749 = vmatprep.subr.mxu1 %v6320_v25 }
 0x9b5   :  { %v5550_v27 = vpop.f32.mrb[18].mxu0 }
 0x9b6   :  { %v1600_v28 = vpop.f32.mrb[19].mxu0 }
 0x9ed   :  { %v5638_v29 = vpop.f32.mrb[12].mxu1 }
 0x9ee   :  { %v6184_v33 = vadd.f32 %v5638_v29, %v5550_v27  ;;  %v2353_v37 = vpop.f32.mrb[13].mxu1 }
 0x9ef   :  { %v6185_v39 = vadd.f32 %v2353_v37, %v1600_v28 }
 0x9f0   :  { %v2372_v41 = vadd.f32 %v6184_v33, %v5034_v30 }
 0x9f1   :  { %v2371_v34 = vadd.f32 %v6185_v39, %v5034_v30 }
 0x9f2   :  { %v2374_v18 = vmax.f32 %v2372_v41, 0.0 }
 0x9f3   :  { %v2373_v49 = vmax.f32 %v2371_v34, 0.0  ;;  %v2503_v34 = vsub.s32 4, %v6464_v44 }
 0x9f5   :  { %5655 = vmatprep.mubr.msk.f32.mxu0 %vm2387_vm7, %v2373_v49  ;;  %v2509_v49 = vsub.s32 5, %v6464_v44 }
 0x9f6   :  { %5656 = vmatmul.mubr.msk.f32.vlgmr.msra.gmra.mrb[20].mxu0 %vm2387_vm7, %v2374_v18 }
 0xac9   :  { %v5657_v53 = vpop.f32.mrb[20].mxu0 }
 0xaca   :  { %v2466_v55 = vadd.f32 %v5657_v53, %v2386_v51  ;;  %v2460_v56 = vpop.f32.mrb[21].mxu0 }
 0xacb   :  { %v2461_v58 = vadd.f32 %v2460_v56, %v2386_v51  ;;  %v2504_v51 = vrot.slane %v6594_v36, %v2503_v34  ;;  %v2510_v56 = vrot.slane %v6594_v36, %v2509_v49 }
 0xacc   :  { %v6896_v57 = vadd.f32 %v2466_v55, %v6680_v46  ;;  %v5038_v46 = vld [vmem:[%s7401_s2 + $0xc0] sm:$0xff] }
 0xacd   :  { %v2469_v43 = vadd.f32 %v2461_v58, %v6685_v48  ;;  %v5039_v48 = vld [vmem:[%s7401_s2 + $0xc8] sm:$0xff] }
 0xace   :  { %v2474_v59 = vsel %vm89_vm1, %v6896_v57, 0.0  ;;  %v2480_v1 = vmul.f32 %v6896_v57, %v6896_v57  ;;  %v6040_v5 = vpack.c.bf16 %v5039_v48, %v5038_v46  ;;  %v5049_v46 = vld [vmem:[%s7401_s2 + $0x118] sm:$0xff] }
 0xacf   :  { %2475 = vadd.xlane.f32.xlu0 %v2474_v59  ;;  %v2471_v60 = vsel %vm89_vm1, %v2469_v43, 0.0  ;;  %v2479_v63 = vmul.f32 %v2469_v43, %v2469_v43 }
 0xad0   :  { %2472 = vadd.xlane.f32.xlu1 %v2471_v60  ;;  %v2484_v3 = vsel %vm89_vm1, %v2480_v1, 0.0  ;;  %6041 = vmatprep.subr.bf16.mxu0 %v6040_v5 }
 0xad1   :  { %v2481_v0 = vsel %vm89_vm1, %v2479_v63, 0.0  ;;  %6043 = vmatpush3.bf16.msra.mxu0 %v6040_v5  ;;  %v5055_v5 = vld [vmem:[%s7401_s2 + $0x148] sm:$0xff] }
 0xad2   :  { %6045 = vmatprep.subr.bf16.mxu0 %v6044_v10  ;;  %v6056_v6 = vpack.c.bf16 %v5055_v5, %v5054_v4 }
 0xad4   :  { %2482 = vadd.xlane.f32.xlu1 %v2481_v0 }
 0xad5   :  { %6047 = vmatpush3.bf16.msra.mxu0 %v6044_v10 }
 0xad6   :  { %6049 = vmatprep.subr.bf16.mxu0 %v6048_v50 }
 0xad8   :  { %2485 = vadd.xlane.f32.xlu1 %v2484_v3  ;;  %v5048_v3 = vld [vmem:[%s7401_s2 + $0x110] sm:$0xff] }
 0xb5c   :  { %v2476_v20 = vpop.xlane.xlu0 %2475 }
 0xb5d   :  { %v2473_v16 = vpop.xlane.xlu1 %2472  ;;  %v2478_v24 = vmul.f32 0.03125, %v2476_v20 }
 0xb5e   :  { %v2477_v17 = vmul.f32 0.03125, %v2473_v16  ;;  %v5043_v16 = vld [vmem:[%s7402_s3 + $0x6] ss:$0 sm:$0xff] }
 0xb5f   :  { %v2492_v30 = vmul.f32 %v2478_v24, %v2478_v24  ;;  %v2490_v58 = vsub.f32 %v6896_v57, %v2478_v24  ;;  %v6052_v57 = vpack.c.bf16 %v5049_v46, %v5048_v3  ;;  %v5059_v24 = vld [vmem:[%s7402_s3 + $0xa] ss:$0 sm:$0xff] }
 0xb60   :  { %v2491_v26 = vmul.f32 %v2477_v17, %v2477_v17  ;;  %v2489_v18 = vsub.f32 %v2469_v43, %v2477_v17 }
 0xb61   :  { %v2483_v21 = vpop.xlane.xlu1 %2482 }
 0xb62   :  { %v2487_v27 = vmul.f32 0.03125, %v2483_v21 }
 0xb64   :  { %v2493_v28 = vsub.f32 %v2487_v27, %v2491_v26 }
 0xb65   :  { %v2486_v29 = vpop.xlane.xlu1 %2485 }
 0xb66   :  { %v2495_v33 = vadd.f32 1e-05, %v2493_v28  ;;  %v2488_v37 = vmul.f32 0.03125, %v2486_v29 }
 0xb68   :  { %6250 = vrsqrt.f32 %v2495_v33  ;;  %v2494_v39 = vsub.f32 %v2488_v37, %v2492_v30 }
 0xb6a   :  { %v2496_v41 = vadd.f32 1e-05, %v2494_v39 }
 0xb6c   :  { %6252 = vrsqrt.f32 %v2496_v41 }
 0xb72   :  { %v6251_v53 = vpop.eup %6250 }
 0xb73   :  { %v2499_v55 = vmul.f32 %v6251_v53, %v2489_v18 }
 0xb75   :  { %v2505_v59 = vmul.f32 %v2504_v51, %v2499_v55 }
 0xb76   :  { %v6253_v60 = vpop.eup %6252 }
 0xb77   :  { %v2500_v63 = vmul.f32 %v6253_v60, %v2490_v58  ;;  %v2511_v0 = vadd.f32 %v2510_v56, %v2505_v59 }
 0xb79   :  { %v6948_v1 = vsel %vm1495_vm10, 0.0, %v2511_v0  ;;  %v2506_v43 = vmul.f32 %v2504_v51, %v2500_v63 }
 0xb7a   :  { %5666 = vmatprep.mubr.msk.f32.mxu0 %vm89_vm1, %v6948_v1  ;;  %5741 = vmatprep.mubr.msk.f32.mxu1 %vm89_vm1, %v6948_v1 }
 0xb7b   :  { %v2512_v36 = vadd.f32 %v2510_v56, %v2506_v43 }
 0xb7d   :  { %v6962_v48 = vsel %vm1496_vm9, 0.0, %v2512_v36 }
 0xb7e   :  { %5667 = vmatmul.mubr.msk.f32.vlgmr.msra.gmra.mrb[22].mxu0 %vm89_vm1, %v6962_v48  ;;  %5742 = vmatmul.mubr.msk.f32.vlgmr.msra.gmra.mrb[14].mxu1 %vm89_vm1, %v6962_v48 }
 0xb7f   :  { %6051 = vmatpush3.bf16.msra.mxu0 %v6048_v50  ;;  %5677 = vmatprep.mubr.msk.f32.mxu0 %vm89_vm1, %v6948_v1 }
 0xb80   :  { %6053 = vmatprep.subr.bf16.mxu0 %v6052_v57  ;;  %5751 = vmatprep.mubr.msk.f32.mxu1 %vm6321_vm2, %v6320_v25 }
 0xb83   :  { %6055 = vmatpush3.bf16.msra.mxu0 %v6052_v57 }
 0xb84   :  { %6057 = vmatprep.subr.bf16.mxu0 %v6056_v6 }
 0xb86   :  { %5678 = vmatmul.mubr.msk.f32.vlgmr.msra.gmra.mrb[24].mxu0 %vm89_vm1, %v6962_v48 }
 0xb87   :  { %6059 = vmatpush3.bf16.msra.mxu0 %v6056_v6  ;;  %5688 = vmatprep.mubr.msk.f32.mxu0 %vm89_vm1, %v6948_v1 }
 0xb88   :  { %6061 = vmatprep.subr.bf16.mxu0 %v6060_v9 }
 0xb8b   :  { %6063 = vmatpush3.bf16.msra.mxu0 %v6060_v9 }
 0xb8c   :  { %5691 = vmatprep.subr.mxu0 %v6320_v25 }
 0xb8e   :  { %5689 = vmatmul.mubr.msk.f32.vlgmr.msra.gmra.mrb[26].mxu0 %vm89_vm1, %v6962_v48 }
 0xb8f   :  { %5693 = vmatprep.mubr.msk.f32.mxu0 %vm6321_vm2, %v6320_v25 }
 0xc51   :  { %v5668_v10 = vpop.f32.mrb[22].mxu0  ;;  %v6993_v11 = vpop.f32.mrb[14].mxu1 }
 0xc52   :  { %v2602_v52 = vpop.f32.mrb[23].mxu0  ;;  %v6995_v13 = vpop.f32.mrb[15].mxu1  ;;  %v2608_v27 = vadd.f32 %v5668_v10, %v5043_v16 }
 0xc53   :  { %v2603_v20 = vadd.f32 %v5043_v16, %v2602_v52  ;;  %v6064_v52 = vpack.c.bf16 %v5071_v8, %v5070_v7 }
 0xc59   :  { %v5679_v15 = vpop.f32.mrb[24].mxu0 }
 0xc5a   :  { %v2690_v50 = vpop.f32.mrb[25].mxu0  ;;  %v2696_v21 = vadd.f32 %v5679_v15, %v5051_v14  ;;  %v5073_v15 = vld [vmem:[%s7401_s2 + $0xf8] sm:$0xff] }
 0xc5b   :  { %v2691_v17 = vadd.f32 %v5051_v14, %v2690_v50  ;;  %v5072_v14 = vld [vmem:[%s7401_s2 + $0xf0] sm:$0xff] }
 0xc5d   :  { %5692 = vmatpush3.xpose.msk.msra.mxu0 %vm347_vm3, %v2691_v17  ;;  %v6068_v17 = vpack.c.bf16 %v5073_v15, %v5072_v14 }
 0xc5e   :  { %5696 = vmatprep.subr.mxu0 %v6320_v25 }
 0xc60   :  { %5694 = vmatmul.mubr.msk.f32.vlgmr.msra.gmra.mrb[28].mxu0 %vm347_vm3, %v2603_v20  ;;  %v5078_v20 = vld [vmem:[%s7401_s2 + $0x120] sm:$0xff] }
 0xc61   :  { %v5690_v26 = vpop.f32.mrb[26].mxu0  ;;  %5697 = vmatpush3.xpose.msk.msra.mxu0 %vm347_vm3, %v2696_v21  ;;  %5698 = vmatprep.mubr.msk.f32.mxu0 %vm6321_vm2, %v6320_v25  ;;  %v5079_v21 = vld [vmem:[%s7401_s2 + $0x128] sm:$0xff] }
 0xc62   :  { %v2784_v28 = vadd.f32 %v5690_v26, %v5059_v24  ;;  %v2778_v29 = vpop.f32.mrb[27].mxu0  ;;  %5701 = vmatprep.subr.mxu0 %v6320_v25  ;;  %v5080_v26 = vld [vmem:[%s7401_s2 + $0x130] sm:$0xff] }
 0xc63   :  { %v2779_v30 = vadd.f32 %v5059_v24, %v2778_v29  ;;  %v6072_v24 = vpack.c.bf16 %v5079_v21, %v5078_v20 }
 0xc64   :  { %5699 = vmatmul.mubr.msk.f32.vlgmr.msra.gmra.mrb[30].mxu0 %vm347_vm3, %v2608_v27  ;;  %v5081_v27 = vld [vmem:[%s7401_s2 + $0x138] sm:$0xff] }
 0xc65   :  { %5702 = vmatpush3.msra.mxu0 %v2779_v30  ;;  %5703 = vmatprep.mubr.msk.f32.mxu0 %vm6321_vm2, %v6320_v25 }
 0xc66   :  { %5706 = vmatprep.subr.mxu0 %v6320_v25 }
 0xd33   :  { %v2859_v33 = vpop.f32.mrb[28].mxu0 }
 0xd34   :  { %v2939_v37 = vmul.f32 0.25, %v2859_v33  ;;  %v5695_v39 = vpop.f32.mrb[29].mxu0 }
 0xd36   :  { %v2941_v41 = vadd.f32 %v2939_v37, %v6473_v47 }
 0xd37   :  { %v2935_v18 = vpop.f32.mrb[30].mxu0 }
 0xd38   :  { %v2940_v51 = vmul.f32 0.25, %v2935_v18  ;;  %v5700_v53 = vpop.f32.mrb[31].mxu0  ;;  %v2943_v55 = vsel %vm512_vm5, %v2941_v41, -inf  ;;  %v5083_v18 = vld [vmem:[%s7402_s3 + $0x9] ss:$0 sm:$0xff] }
 0xd39   :  { %2944 = vmax.xlane.f32.xlu1 %v2943_v55  ;;  %v5075_v53 = vld [vmem:[%s7402_s3 + $0x7] ss:$0 sm:$0xff] }
 0xd3a   :  { %v2942_v56 = vadd.f32 %v2940_v51, %v6484_v61 }
 0xd3c   :  { %v2946_v58 = vsel %vm512_vm5, %v2942_v56, -inf }
 0xd3d   :  { %2947 = vmax.xlane.f32.xlu1 %v2946_v58  ;;  %v5091_v58 = vld [vmem:[%s7402_s3 + $0xb] ss:$0 sm:$0xff] }
 0xdc6   :  { %v2945_v59 = vpop.xlane.xlu1 %2944 }
 0xdc7   :  { %v2949_v60 = vsub.f32 %v2941_v41, %v2945_v59 }
 0xdc9   :  { %v2951_v63 = vmul.f32 1.442695, %v2949_v60 }
 0xdca   :  { %v2948_v0 = vpop.xlane.xlu1 %2947 }
 0xdcb   :  { %6254 = vpow2.f32 %v2951_v63  ;;  %v2950_v43 = vsub.f32 %v2942_v56, %v2948_v0  ;;  %v3375_v63 = vadd.f32 %v6993_v11, %v5091_v58 }
 0xdcd   :  { %v2953_v3 = vmul.f32 1.442695, %v2950_v43  ;;  %v3370_v43 = vadd.f32 %v5091_v58, %v6995_v13 }
 0xdcf   :  { %6256 = vpow2.f32 %v2953_v3 }
 0xdd5   :  { %v6255_v46 = vpop.eup %6254 }
 0xdd6   :  { %v2955_v36 = vsel %vm512_vm5, %v6255_v46, 0.0 }
 0xdd7   :  { %2956 = vadd.xlane.f32.xlu1 %v2955_v36 }
 0xdd9   :  { %v6257_v57 = vpop.eup %6256 }
 0xdda   :  { %v2958_v4 = vsel %vm512_vm5, %v6257_v57, 0.0 }
 0xddb   :  { %2959 = vadd.xlane.f32.xlu1 %v2958_v4 }
 0xe64   :  { %v2957_v5 = vpop.xlane.xlu1 %2956 }
 0xe65   :  { %6258 = vrcp.f32 %v2957_v5 }
 0xe68   :  { %v2960_v6 = vpop.xlane.xlu1 %2959 }
 0xe69   :  { %6260 = vrcp.f32 %v2960_v6 }
 0xe6f   :  { %v6259_v9 = vpop.eup %6258 }
 0xe70   :  { %v2963_v10 = vmul.f32 %v6259_v9, %v6255_v46 }
 0xe72   :  { %5704 = vmatmul.mubr.msk.f32.vlgmr.msra.gmra.mrb[32].mxu0 %vm512_vm5, %v2963_v10 }
 0xe73   :  { %v6261_v50 = vpop.eup %6260  ;;  %5707 = vmatpush3.msra.mxu0 %v2784_v28  ;;  %5708 = vmatprep.mubr.msk.f32.mxu0 %vm6321_vm2, %v6320_v25  ;;  %v6076_v28 = vpack.c.bf16 %v5081_v27, %v5080_v26 }
 0xe74   :  { %v2964_v16 = vmul.f32 %v6261_v50, %v6257_v57  ;;  %6065 = vmatprep.subr.bf16.mxu0 %v6064_v52 }
 0xe76   :  { %5709 = vmatmul.mubr.msk.f32.vlgmr.msra.gmra.mrb[34].mxu0 %vm512_vm5, %v2964_v16  ;;  %v5100_v16 = vld [vmem:[%s7403_s4 + $0x30] sm:$0xff] }
 0xe77   :  { %6067 = vmatpush3.bf16.msra.mxu0 %v6064_v52  ;;  %5719 = vmatprep.mubr.msk.f32.mxu0 %vm89_vm1, %v6948_v1 }
 0xe78   :  { %6069 = vmatprep.subr.bf16.mxu0 %v6068_v17 }
 0xe7b   :  { %6071 = vmatpush3.bf16.msra.mxu0 %v6068_v17  ;;  %v5101_v17 = vld [vmem:[%s7403_s4 + $0x38] sm:$0xff] }
 0xe7c   :  { %6073 = vmatprep.subr.bf16.mxu0 %v6072_v24  ;;  %v6088_v20 = vpack.c.bf16 %v5101_v17, %v5100_v16 }
 0xe7e   :  { %5720 = vmatmul.mubr.msk.f32.vlgmr.msra.gmra.mrb[36].mxu0 %vm89_vm1, %v6962_v48 }
 0xe7f   :  { %6075 = vmatpush3.bf16.msra.mxu0 %v6072_v24  ;;  %5730 = vmatprep.mubr.msk.f32.mxu0 %vm89_vm1, %v6948_v1 }
 0xe80   :  { %6077 = vmatprep.subr.bf16.mxu0 %v6076_v28 }
 0xe83   :  { %6079 = vmatpush3.bf16.msra.mxu0 %v6076_v28 }
 0xe84   :  { %5744 = vmatprep.subr.mxu0 %v6320_v25 }
 0xe86   :  { %5731 = vmatmul.mubr.msk.f32.vlgmr.msra.gmra.mrb[38].mxu0 %vm89_vm1, %v6962_v48 }
 0xe87   :  { %5746 = vmatprep.mubr.msk.f32.mxu0 %vm6321_vm2, %v6320_v25 }
 0xf45   :  { %v7062_v29 = vpop.f32.mrb[32].mxu0 }
 0xf46   :  { %v5705_v30 = vpop.f32.mrb[33].mxu0 }
 0xf49   :  { %v7064_v33 = vpop.f32.mrb[34].mxu0 }
 0xf4a   :  { %v5710_v37 = vpop.f32.mrb[35].mxu0 }
 0xf4b   :  { %v5068_v37 = vld [vmem:[%s7403_s4 + $0x20] sm:$0xff] }
 0xf51   :  { %v5721_v39 = vpop.f32.mrb[36].mxu0 }
 0xf52   :  { %v3193_v41 = vpop.f32.mrb[37].mxu0  ;;  %v3199_v60 = vadd.f32 %v5721_v39, %v5075_v53  ;;  %v5069_v39 = vld [vmem:[%s7403_s4 + $0x28] sm:$0xff] }
 0xf53   :  { %v3194_v0 = vadd.f32 %v5075_v53, %v3193_v41  ;;  %v6092_v41 = vpack.c.bf16 %v5069_v39, %v5068_v37 }
 0xf59   :  { %v5732_v51 = vpop.f32.mrb[38].mxu0 }
 0xf5a   :  { %v3287_v55 = vadd.f32 %v5732_v51, %v5083_v18  ;;  %v3281_v56 = vpop.f32.mrb[39].mxu0 }
 0xf5b   :  { %v3282_v59 = vadd.f32 %v5083_v18, %v3281_v56  ;;  %v7116_v56 = vld [vmem:[%s7407_s8 + $0x8] sm:$0x3f] }
 0xf5c   :  { %5750 = vmatpush3.xpose.msk.msra.mxu1 %vm347_vm3, %v3287_v55  ;;  %v3870_v58 = vrot.slane %v7116_v56, %v6469_v45 }
 0xf5d   :  { %5745 = vmatpush3.xpose.msk.msra.mxu0 %vm347_vm3, %v3282_v59  ;;  %5759 = vmatprep.subr.mxu1 %v6320_v25 }
 0xf5e   :  { %5754 = vmatprep.subr.mxu0 %v6320_v25 }
 0xf5f   :  { %5752 = vmatmul.mubr.msk.f32.vlgmr.msra.gmra.mrb[16].mxu1 %vm347_vm3, %v3199_v60 }
 0xf60   :  { %5747 = vmatmul.mubr.msk.f32.vlgmr.msra.gmra.mrb[40].mxu0 %vm347_vm3, %v3194_v0  ;;  %5760 = vmatpush3.msra.mxu1 %v3375_v63 }
 0xf61   :  { %5755 = vmatpush3.msra.mxu0 %v3370_v43  ;;  %5761 = vmatprep.mubr.msk.f32.mxu1 %vm6321_vm2, %v6320_v25 }
 0xf62   :  { %5756 = vmatprep.mubr.msk.f32.mxu0 %vm6321_vm2, %v6320_v25  ;;  %6089 = vmatprep.subr.bf16.mxu0 %v6088_v20  ;;  %vm4904_vm2 = vcmask 785408  }
0x1032   :  { %v3526_v3 = vpop.f32.mrb[16].mxu1 }
0x1033   :  { %v3531_v46 = vmul.f32 0.25, %v3526_v3  ;;  %v3450_v11 = vpop.f32.mrb[40].mxu0  ;;  %v5753_v36 = vpop.f32.mrb[17].mxu1 }
0x1034   :  { %v3530_v57 = vmul.f32 0.25, %v3450_v11  ;;  %v5748_v4 = vpop.f32.mrb[41].mxu0  ;;  %v5110_v11 = vld [vmem:[%s7404_s5 + $0x140] sm:$0xff]  ;;  %v5111_v36 = vld [vmem:[%s7404_s5 + $0x148] sm:$0xff] }
0x1035   :  { %v3533_v13 = vadd.f32 %v3531_v46, %v6484_v61  ;;  %v5112_v4 = vld [vmem:[%s7404_s5 + $0x150] sm:$0xff] }
0x1036   :  { %v3532_v5 = vadd.f32 %v3530_v57, %v6473_v47  ;;  %v6096_v57 = vpack.c.bf16 %v5111_v36, %v5110_v11 }
0x1037   :  { %v3537_v6 = vsel %vm512_vm5, %v3533_v13, -inf }
0x1038   :  { %3538 = vmax.xlane.f32.xlu1 %v3537_v6  ;;  %v3534_v7 = vsel %vm512_vm5, %v3532_v5, -inf  ;;  %6097 = vmatprep.subr.bf16.mxu1 %v6096_v57  ;;  %v5106_v6 = vld [vmem:[%s7404_s5 + $0x120] sm:$0xff] }
0x1039   :  { %3535 = vmax.xlane.f32.xlu0 %v3534_v7  ;;  %v5107_v7 = vld [vmem:[%s7404_s5 + $0x128] sm:$0xff] }
0x10c5   :  { %v3539_v8 = vpop.xlane.xlu1 %3538 }
0x10c6   :  { %v3541_v9 = vsub.f32 %v3533_v13, %v3539_v8  ;;  %v3536_v10 = vpop.xlane.xlu0 %3535  ;;  %v5113_v13 = vld [vmem:[%s7404_s5 + $0x158] sm:$0xff]  ;;  %v6104_v8 = vpack.c.bf16 %v5107_v7, %v5106_v6  ;;  %v5119_v6 = vld [vmem:[%s7404_s5 + $0x168] sm:$0xff] }
0x10c7   :  { %v3540_v25 = vsub.f32 %v3532_v5, %v3536_v10  ;;  %v6100_v5 = vpack.c.bf16 %v5113_v13, %v5112_v4  ;;  %v5163_v10 = vld [vmem:[%s7406_s7 + $0x48] sm:$0xff] }
0x10c8   :  { %v3544_v52 = vmul.f32 1.442695, %v3541_v9  ;;  %v5162_v9 = vld [vmem:[%s7406_s7 + $0x40] sm:$0xff] }
0x10c9   :  { %v3542_v14 = vmul.f32 1.442695, %v3540_v25  ;;  %v5164_v25 = vld [vmem:[%s7406_s7 + $0x50] sm:$0xff] }
0x10ca   :  { %6262 = vpow2.f32 %v3544_v52  ;;  %v6168_v52 = vpack.c.bf16 %v5163_v10, %v5162_v9  ;;  %v5120_v10 = vld [vmem:[%s7404_s5 + $0x170] sm:$0xff] }
0x10cb   :  { %6264 = vpow2.f32 %v3542_v14  ;;  %v5165_v14 = vld [vmem:[%s7406_s7 + $0x58] sm:$0xff] }
0x10d4   :  { %v6263_v15 = vpop.eup %6262 }
0x10d5   :  { %v6265_v50 = vpop.eup %6264  ;;  %v3549_v61 = vsel %vm512_vm5, %v6263_v15, 0.0 }
0x10d6   :  { %3550 = vadd.xlane.f32.xlu1 %v3549_v61  ;;  %v3546_v47 = vsel %vm512_vm5, %v6265_v50, 0.0  ;;  %v5167_v61 = vld [vmem:[%s7406_s7 + $0x68] sm:$0xff] }
0x10d7   :  { %3547 = vadd.xlane.f32.xlu0 %v3546_v47 }
0x1163   :  { %v3551_v21 = vpop.xlane.xlu1 %3550 }
0x1164   :  { %6266 = vrcp.f32 %v3551_v21  ;;  %v3548_v24 = vpop.xlane.xlu0 %3547 }
0x1165   :  { %6268 = vrcp.f32 %v3548_v24 }
0x116e   :  { %v6267_v26 = vpop.eup %6266 }
0x116f   :  { %v6269_v27 = vpop.eup %6268  ;;  %v3555_v28 = vmul.f32 %v6267_v26, %v6263_v15  ;;  %v6172_v15 = vpack.c.bf16 %v5165_v14, %v5164_v25  ;;  %v5121_v25 = vld [vmem:[%s7404_s5 + $0x178] sm:$0xff] }
0x1170   :  { %v3554_v30 = vmul.f32 %v6269_v27, %v6265_v50  ;;  %v5166_v50 = vld [vmem:[%s7406_s7 + $0x60] sm:$0xff]  ;;  %v6116_v14 = vpack.c.bf16 %v5121_v25, %v5120_v10 }
0x1171   :  { %5762 = vmatmul.mubr.msk.f32.vlgmr.msra.gmra.mrb[18].mxu1 %vm512_vm5, %v3555_v28  ;;  %v6176_v47 = vpack.c.bf16 %v5167_v61, %v5166_v50  ;;  %v5125_v50 = vld [vmem:[%s7404_s5 + $0x188] sm:$0xff]  ;;  %v5154_v25 = vld [vmem:[%s7404_s5 + $0x220] sm:$0xff] }
0x1172   :  { %5757 = vmatmul.mubr.msk.f32.vlgmr.msra.gmra.mrb[42].mxu0 %vm512_vm5, %v3554_v30  ;;  %6099 = vmatpush3.bf16.msra.mxu1 %v6096_v57 }
0x1173   :  { %6091 = vmatpush3.bf16.msra.mxu0 %v6088_v20  ;;  %6101 = vmatprep.subr.bf16.mxu1 %v6100_v5 }
0x1174   :  { %6093 = vmatprep.subr.bf16.mxu0 %v6092_v41 }
0x1176   :  { %6103 = vmatpush3.bf16.msra.mxu1 %v6100_v5  ;;  %v5118_v5 = vld [vmem:[%s7404_s5 + $0x160] sm:$0xff] }
0x1177   :  { %6105 = vmatprep.subr.bf16.mxu1 %v6104_v8  ;;  %v6112_v38 = vpack.c.bf16 %v5119_v6, %v5118_v5  ;;  %v5150_v5 = vld [vmem:[%s7404_s5 + $0x210] sm:$0xff]  ;;  %v5151_v6 = vld [vmem:[%s7404_s5 + $0x218] sm:$0xff] }
0x1244   :  { %v3698_v18 = vpop.f32.mrb[18].mxu1 }
0x1245   :  { %v3625_v51 = vpop.f32.mrb[42].mxu0  ;;  %v5763_v53 = vpop.f32.mrb[19].mxu1 }
0x1246   :  { %v5758_v55 = vpop.f32.mrb[43].mxu0  ;;  %5768 = vmatprep.mubr.msk.f32.mxu0 %vm347_vm3, %v3625_v51 }
0x1247   :  { %5769 = vmatmul.mubr.msk.f32.vlgmr.msra.gmra.mrb[44].mxu0 %vm347_vm3, %v3698_v18  ;;  %v3908_v55 = vrot.slane %v7116_v56, %v1477_v22 }
0x1248   :  { %6095 = vmatpush3.bf16.msra.mxu0 %v6092_v41  ;;  %5775 = vmatprep.mubr.msk.f32.mxu0 %vm347_vm3, %v7062_v29 }
0x1249   :  { %6169 = vmatprep.subr.bf16.mxu0 %v6168_v52 }
0x124f   :  { %5776 = vmatmul.mubr.msk.f32.vlgmr.msra.gmra.mrb[44].mxu0 %vm347_vm3, %v7064_v33 }
0x1250   :  { %6171 = vmatpush3.bf16.msra.mxu0 %v6168_v52 }
0x1251   :  { %6173 = vmatprep.subr.bf16.mxu0 %v6172_v15 }
0x1254   :  { %6175 = vmatpush3.bf16.msra.mxu0 %v6172_v15  ;;  %v5124_v15 = vld [vmem:[%s7404_s5 + $0x180] sm:$0xff] }
0x1255   :  { %6177 = vmatprep.subr.bf16.mxu0 %v6176_v47 }
0x1258   :  { %6179 = vmatpush3.bf16.msra.mxu0 %v6176_v47  ;;  %v6120_v47 = vpack.c.bf16 %v5125_v50, %v5124_v15  ;;  %v5156_v15 = vld [vmem:[%s7404_s5 + $0x230] sm:$0xff]  ;;  %v5157_v50 = vld [vmem:[%s7404_s5 + $0x238] sm:$0xff] }
0x1322   :  { %v5777_v59 = vpop.f32.mrb[44].mxu0 }
0x1323   :  { %v3872_v60 = vadd.f32 %v5777_v59, %v3870_v58  ;;  %v3858_v63 = vpop.f32.mrb[45].mxu0 }
0x1324   :  { %v3871_v0 = vadd.f32 %v3870_v58, %v3858_v63  ;;  %v3914_v63 = vrot.slane %v7116_v56, %v1483_v23  ;;  %v5108_v23 = vld [vmem:[%s7404_s5 + $0x130] sm:$0xff] }
0x1325   :  { %v7121_v43 = vadd.f32 %v3872_v60, %v6962_v48 }
0x1326   :  { %v7124_v29 = vadd.f32 %v3871_v0, %v6948_v1 }
0x1327   :  { %v3878_v33 = vsel %vm89_vm1, %v7121_v43, 0.0  ;;  %v3884_v3 = vmul.f32 %v7121_v43, %v7121_v43 }
0x1328   :  { %3879 = vadd.xlane.f32.xlu1 %v3878_v33  ;;  %v3875_v45 = vsel %vm89_vm1, %v7124_v29, 0.0  ;;  %v3883_v46 = vmul.f32 %v7124_v29, %v7124_v29 }
0x1329   :  { %3876 = vadd.xlane.f32.xlu0 %v3875_v45  ;;  %v3888_v48 = vsel %vm89_vm1, %v3884_v3, 0.0 }
0x132a   :  { %v3885_v1 = vsel %vm89_vm1, %v3883_v46, 0.0 }
0x132c   :  { %3889 = vadd.xlane.f32.xlu1 %v3888_v48 }
0x132d   :  { %3886 = vadd.xlane.f32.xlu0 %v3885_v1  ;;  %v5109_v1 = vld [vmem:[%s7404_s5 + $0x138] sm:$0xff] }
0x132e   :  { %v6108_v4 = vpack.c.bf16 %v5109_v1, %v5108_v23 }
0x13b5   :  { %v3880_v16 = vpop.xlane.xlu1 %3879 }
0x13b6   :  { %v3882_v17 = vmul.f32 0.03125, %v3880_v16  ;;  %v3877_v20 = vpop.xlane.xlu0 %3876  ;;  %v5126_v16 = vld [vmem:[%s7404_s5 + $0x190] sm:$0xff] }
0x13b7   :  { %v3881_v21 = vmul.f32 0.03125, %v3877_v20 }
0x13b8   :  { %v3896_v26 = vmul.f32 %v3882_v17, %v3882_v17  ;;  %v3894_v53 = vsub.f32 %v7121_v43, %v3882_v17  ;;  %v5127_v17 = vld [vmem:[%s7404_s5 + $0x198] sm:$0xff] }
0x13b9   :  { %v3890_v24 = vpop.xlane.xlu1 %3889  ;;  %v3895_v30 = vmul.f32 %v3881_v21, %v3881_v21  ;;  %v3893_v59 = vsub.f32 %v7124_v29, %v3881_v21  ;;  %v6124_v21 = vpack.c.bf16 %v5127_v17, %v5126_v16 }
0x13ba   :  { %v3892_v27 = vmul.f32 0.03125, %v3890_v24  ;;  %v3887_v28 = vpop.xlane.xlu0 %3886 }
0x13bb   :  { %v3891_v37 = vmul.f32 0.03125, %v3887_v28 }
0x13bc   :  { %v3898_v39 = vsub.f32 %v3892_v27, %v3896_v26  ;;  %v5130_v26 = vld [vmem:[%s7404_s5 + $0x1a0] sm:$0xff]  ;;  %v5131_v27 = vld [vmem:[%s7404_s5 + $0x1a8] sm:$0xff] }
0x13bd   :  { %v3897_v41 = vsub.f32 %v3891_v37, %v3895_v30  ;;  %v6128_v30 = vpack.c.bf16 %v5131_v27, %v5130_v26  ;;  %v5132_v37 = vld [vmem:[%s7404_s5 + $0x1b0] sm:$0xff] }
0x13be   :  { %v3900_v18 = vadd.f32 1e-05, %v3898_v39  ;;  %v5133_v39 = vld [vmem:[%s7404_s5 + $0x1b8] sm:$0xff] }
0x13bf   :  { %v3899_v51 = vadd.f32 1e-05, %v3897_v41  ;;  %v6132_v41 = vpack.c.bf16 %v5133_v39, %v5132_v37 }
0x13c0   :  { %6270 = vrsqrt.f32 %v3900_v18 }
0x13c1   :  { %6272 = vrsqrt.f32 %v3899_v51  ;;  %v5136_v51 = vld [vmem:[%s7404_s5 + $0x1c0] sm:$0xff] }
0x13ca   :  { %v6271_v58 = vpop.eup %6270 }
0x13cb   :  { %v6273_v60 = vpop.eup %6272  ;;  %v3904_v0 = vmul.f32 %v6271_v58, %v3894_v53  ;;  %v5137_v53 = vld [vmem:[%s7404_s5 + $0x1c8] sm:$0xff]  ;;  %v5139_v58 = vld [vmem:[%s7404_s5 + $0x1d8] sm:$0xff] }
0x13cc   :  { %v3903_v33 = vmul.f32 %v6273_v60, %v3893_v59  ;;  %v6140_v60 = vpack.c.bf16 %v5139_v58, %v5138_v62 }
0x13cd   :  { %v3910_v3 = vmul.f32 %v3908_v55, %v3904_v0  ;;  %v5143_v0 = vld [vmem:[%s7404_s5 + $0x1e8] sm:$0xff] }
0x13ce   :  { %v3909_v45 = vmul.f32 %v3908_v55, %v3903_v33  ;;  %v6136_v55 = vpack.c.bf16 %v5137_v53, %v5136_v51 }
0x13cf   :  { %v3916_v46 = vadd.f32 %v3914_v63, %v3910_v3 }
0x13d0   :  { %v3915_v48 = vadd.f32 %v3914_v63, %v3909_v45  ;;  %v5142_v63 = vld [vmem:[%s7404_s5 + $0x1e0] sm:$0xff] }
0x13d1   :  { %v7182_v43 = vsel %vm1496_vm9, 0.0, %v3916_v46  ;;  %v6144_v3 = vpack.c.bf16 %v5143_v0, %v5142_v63  ;;  %v5144_v46 = vld [vmem:[%s7404_s5 + $0x1f0] sm:$0xff] }
0x13d2   :  { %v7186_v22 = vsel %vm1495_vm10, 0.0, %v3915_v48  ;;  %v3929_v29 = vrot.slane %v7182_v43, 5  ;;  %v3920_v9 = vrot.slane %v7182_v43, 4  ;;  %v4100_v40 = vrot.slane %v7182_v43, 6  ;;  %v5145_v48 = vld [vmem:[%s7404_s5 + $0x1f8] sm:$0xff] }
0x13d3   :  { %v3928_v11 = vrot.slane %v7186_v22, 5  ;;  %v3919_v36 = vrot.slane %v7186_v22, 4  ;;  %v4099_v52 = vrot.slane %v7186_v22, 6  ;;  %v4191_v20 = vrot.slane %v7186_v22, 7 }
0x13d4   :  { %v3931_v13 = vsel %vm1516_vm11, %v3929_v29, 0.0  ;;  %v4102_v24 = vsel %vm1693_vm13, %v4100_v40, 0.0  ;;  %v4192_v42 = vrot.slane %v7182_v43, 7  ;;  %v4371_v59 = vrot.slane %v7186_v22, 1 }
0x13d5   :  { %v3930_v57 = vsel %vm1516_vm11, %v3928_v11, 0.0  ;;  %v3921_v7 = vsel %vm1502_vm12, %v3919_v36, 0.0  ;;  %v4101_v61 = vsel %vm1693_vm13, %v4099_v52, 0.0  ;;  %v4193_v28 = vsel %vm1791_vm14, %v4191_v20, 0.0  ;;  %v5148_v11 = vld [vmem:[%s7404_s5 + $0x200] sm:$0xff]  ;;  %v5155_v52 = vld [vmem:[%s7404_s5 + $0x228] sm:$0xff] }
0x13d6   :  { %5786 = vmatprep.mubr.msk.f32.mxu1 %vm89_vm1, %v3930_v57  ;;  %v4194_v18 = vsel %vm1791_vm14, %v4192_v42, 0.0  ;;  %v4373_v33 = vsel %vm1978_vm15, %v4371_v59, 0.0  ;;  %v4372_v45 = vrot.slane %v7182_v43, 1  ;;  %v4463_v29 = vrot.slane %v7186_v22, 2  ;;  %v5149_v57 = vld [vmem:[%s7404_s5 + $0x208] sm:$0xff] }
0x13d7   :  { %5787 = vmatmul.mubr.msk.f32.vlgmr.msra.gmra.mrb[20].mxu1 %vm89_vm1, %v3931_v13  ;;  %v6148_v23 = vpack.c.bf16 %v5145_v48, %v5144_v46  ;;  %v6152_v13 = vpack.c.bf16 %v5149_v57, %v5148_v11  ;;  %v4464_v19 = vrot.slane %v7182_v43, 2  ;;  %v4556_v31 = vrot.slane %v7182_v43, 3  ;;  %v5161_v20 = vld [vmem:[%s7405_s6 + $0x1] ss:$0 sm:$0xff]  ;;  %s6323_s6 = smov [#allocation5]  }
0x13d8   :  { %6107 = vmatpush3.bf16.msra.mxu1 %v6104_v8  ;;  %5797 = vmatprep.mubr.msk.f32.mxu1 %vm89_vm1, %v3921_v7  ;;  %v3922_v8 = vsel %vm1502_vm12, %v3920_v9, 0.0  ;;  %v4374_v1 = vsel %vm1978_vm15, %v4372_v45, 0.0  ;;  %v4555_v7 = vrot.slane %v7186_v22, 3  ;;  %v4647_v40 = vsel %vm2270_vm6, %v3919_v36, 0.0  ;;  %v5169_v36 = vld [vmem:[%s7406_s7 + $0x78] sm:$0xff]  ;;  %s4913_s7 = sshll.u32 %s6323_s6, 4  ;;  %s4914_s7 = int_to_ptr.vmem [resolvable:$true] %s4913_s7 }
0x13d9   :  { %6109 = vmatprep.subr.bf16.mxu1 %v6108_v4  ;;  %v4466_v10 = vsel %vm2076_vm0, %v4464_v19, 0.0  ;;  %v4648_v16 = vsel %vm2270_vm6, %v3920_v9, 0.0  ;;  %v6180_v17 = vpack.c.bf16 %v5169_v36, %v5168_v54  ;;  %v4878_v57 = vrot.slane %v7116_v56, %v2503_v34  ;;  %p6295_p6 = scmp.lt.s32.totalorder %s4914_s7, %s4914_s7 }
0x13db   :  { %6181 = vmatprep.subr.bf16.mxu0 %v6180_v17 }
0x13dc   :  { %6111 = vmatpush3.bf16.msra.mxu1 %v6108_v4  ;;  %v4465_v4 = vsel %vm2076_vm0, %v4463_v29, 0.0  ;;  %6183 = vmatpush3.bf16.msra.mxu0 %v6180_v17 }
0x13dd   :  { %6113 = vmatprep.subr.bf16.mxu1 %v6112_v38 }
0x13df   :  { %5798 = vmatmul.mubr.msk.f32.vlgmr.msra.gmra.mrb[20].mxu1 %vm89_vm1, %v3922_v8  ;;  %v6160_v8 = vpack.c.bf16 %v5155_v52, %v5154_v25 }
0x13e0   :  { %6115 = vmatpush3.bf16.msra.mxu1 %v6112_v38  ;;  %5808 = vmatprep.mubr.msk.f32.mxu1 %vm89_vm1, %v4101_v61  ;;  %v6156_v38 = vpack.c.bf16 %v5151_v6, %v5150_v5  ;;  %v6164_v61 = vpack.c.bf16 %v5157_v50, %v5156_v15  ;;  %v4884_v6 = vrot.slane %v7116_v56, %v2509_v49 }
0x13e1   :  { %6117 = vmatprep.subr.bf16.mxu1 %v6116_v14 }
0x13e4   :  { %6119 = vmatpush3.bf16.msra.mxu1 %v6116_v14  ;;  %v4557_v14 = vsel %vm2174_vm4, %v4555_v7, 0.0 }
0x13e5   :  { %6121 = vmatprep.subr.bf16.mxu1 %v6120_v47 }
0x13e7   :  { %5809 = vmatmul.mubr.msk.f32.vlgmr.msra.gmra.mrb[20].mxu1 %vm89_vm1, %v4102_v24 }
0x13e8   :  { %6123 = vmatpush3.bf16.msra.mxu1 %v6120_v47  ;;  %5819 = vmatprep.mubr.msk.f32.mxu1 %vm89_vm1, %v4193_v28  ;;  %v4558_v47 = vsel %vm2174_vm4, %v4556_v31, 0.0  ;;  %v4761_v28 = vrot.slane %v7116_v56, %v2385_v12 }
0x13e9   :  { %6125 = vmatprep.subr.bf16.mxu1 %v6124_v21 }
0x13ec   :  { %6127 = vmatpush3.bf16.msra.mxu1 %v6124_v21 }
0x13ed   :  { %6129 = vmatprep.subr.bf16.mxu1 %v6128_v30 }
0x13ef   :  { %5820 = vmatmul.mubr.msk.f32.vlgmr.msra.gmra.mrb[20].mxu1 %vm89_vm1, %v4194_v18 }
0x13f0   :  { %6131 = vmatpush3.bf16.msra.mxu1 %v6128_v30  ;;  %5830 = vmatprep.mubr.msk.f32.mxu1 %vm89_vm1, %v7186_v22 }
0x13f1   :  { %6133 = vmatprep.subr.bf16.mxu1 %v6132_v41 }
0x13f4   :  { %6135 = vmatpush3.bf16.msra.mxu1 %v6132_v41 }
0x13f5   :  { %6137 = vmatprep.subr.bf16.mxu1 %v6136_v55 }
0x13f7   :  { %5831 = vmatmul.mubr.msk.f32.vlgmr.msra.gmra.mrb[20].mxu1 %vm89_vm1, %v7182_v43 }
0x13f8   :  { %6139 = vmatpush3.bf16.msra.mxu1 %v6136_v55  ;;  %5841 = vmatprep.mubr.msk.f32.mxu1 %vm89_vm1, %v4373_v33 }
0x13f9   :  { %6141 = vmatprep.subr.bf16.mxu1 %v6140_v60 }
0x13fc   :  { %6143 = vmatpush3.bf16.msra.mxu1 %v6140_v60 }
0x13fd   :  { %6145 = vmatprep.subr.bf16.mxu1 %v6144_v3 }
0x13ff   :  { %5842 = vmatmul.mubr.msk.f32.vlgmr.msra.gmra.mrb[20].mxu1 %vm89_vm1, %v4374_v1 }
0x1400   :  { %6147 = vmatpush3.bf16.msra.mxu1 %v6144_v3  ;;  %5852 = vmatprep.mubr.msk.f32.mxu1 %vm89_vm1, %v4465_v4 }
0x1401   :  { %6149 = vmatprep.subr.bf16.mxu1 %v6148_v23 }
0x1404   :  { %6151 = vmatpush3.bf16.msra.mxu1 %v6148_v23 }
0x1405   :  { %6153 = vmatprep.subr.bf16.mxu1 %v6152_v13 }
0x1407   :  { %5853 = vmatmul.mubr.msk.f32.vlgmr.msra.gmra.mrb[20].mxu1 %vm89_vm1, %v4466_v10 }
0x1408   :  { %6155 = vmatpush3.bf16.msra.mxu1 %v6152_v13  ;;  %5863 = vmatprep.mubr.msk.f32.mxu1 %vm89_vm1, %v4557_v14 }
0x1409   :  { %6157 = vmatprep.subr.bf16.mxu1 %v6156_v38 }
0x140c   :  { %6159 = vmatpush3.bf16.msra.mxu1 %v6156_v38 }
0x140d   :  { %6161 = vmatprep.subr.bf16.mxu1 %v6160_v8 }
0x140f   :  { %5864 = vmatmul.mubr.msk.f32.vlgmr.msra.gmra.mrb[20].mxu1 %vm89_vm1, %v4558_v47 }
0x1410   :  { %6163 = vmatpush3.bf16.msra.mxu1 %v6160_v8  ;;  %5874 = vmatprep.mubr.msk.f32.mxu1 %vm89_vm1, %v4647_v40 }
0x1411   :  { %6165 = vmatprep.subr.bf16.mxu1 %v6164_v61 }
0x1414   :  { %6167 = vmatpush3.bf16.msra.mxu1 %v6164_v61 }
0x1417   :  { %5875 = vmatmul.mubr.msk.f32.vlgmr.msra.gmra.mrb[20].mxu1 %vm89_vm1, %v4648_v16 }
0x14ea   :  { %v5876_v21 = vpop.f32.mrb[20].mxu1 }
0x14eb   :  { %v4746_v2 = vadd.f32 %v5876_v21, %v5161_v20  ;;  %v4726_v9 = vpop.f32.mrb[21].mxu1 }
0x14ec   :  { %v4745_v24 = vadd.f32 %v5161_v20, %v4726_v9 }
0x14ed   :  { %v4748_v27 = vmax.f32 %v4746_v2, 0.0 }
0x14ee   :  { %v4747_v26 = vmax.f32 %v4745_v24, 0.0 }
0x14f0   :  { %5893 = vmatprep.mubr.msk.f32.mxu0 %vm2387_vm7, %v4747_v26 }
0x14f1   :  { %5894 = vmatmul.mubr.msk.f32.vlgmr.msra.gmra.mrb[46].mxu0 %vm2387_vm7, %v4748_v27 }
0x15c4   :  { %v5895_v30 = vpop.f32.mrb[46].mxu0 }
0x15c5   :  { %v4840_v42 = vadd.f32 %v5895_v30, %v4761_v28  ;;  %v4834_v37 = vpop.f32.mrb[47].mxu0 }
0x15c6   :  { %v4835_v39 = vadd.f32 %v4834_v37, %v4761_v28 }
0x15c7   :  { %v4844_v41 = vadd.f32 %v4840_v42, %v7182_v43 }
0x15c8   :  { %v4843_v18 = vadd.f32 %v4835_v39, %v7186_v22 }
0x15c9   :  { %v4848_v51 = vsel %vm89_vm1, %v4844_v41, 0.0  ;;  %v4854_v53 = vmul.f32 %v4844_v41, %v4844_v41 }
0x15ca   :  { %4849 = vadd.xlane.f32.xlu1 %v4848_v51  ;;  %v4845_v55 = vsel %vm89_vm1, %v4843_v18, 0.0  ;;  %v4853_v62 = vmul.f32 %v4843_v18, %v4843_v18 }
0x15cb   :  { %4846 = vadd.xlane.f32.xlu0 %v4845_v55  ;;  %v4858_v58 = vsel %vm89_vm1, %v4854_v53, 0.0 }
0x15cc   :  { %v4855_v12 = vsel %vm89_vm1, %v4853_v62, 0.0 }
0x15ce   :  { %4859 = vadd.xlane.f32.xlu1 %v4858_v58 }
0x15cf   :  { %4856 = vadd.xlane.f32.xlu0 %v4855_v12 }
0x1657   :  { %v4850_v59 = vpop.xlane.xlu1 %4849 }
0x1658   :  { %v4852_v60 = vmul.f32 0.03125, %v4850_v59  ;;  %v4847_v63 = vpop.xlane.xlu0 %4846 }
0x1659   :  { %v4851_v43 = vmul.f32 0.03125, %v4847_v63 }
0x165a   :  { %v4866_v22 = vmul.f32 %v4852_v60, %v4852_v60  ;;  %v4864_v11 = vsub.f32 %v4844_v41, %v4852_v60 }
0x165b   :  { %v4860_v0 = vpop.xlane.xlu1 %4859  ;;  %v4865_v45 = vmul.f32 %v4851_v43, %v4851_v43  ;;  %v4863_v13 = vsub.f32 %v4843_v18, %v4851_v43 }
0x165c   :  { %v4862_v33 = vmul.f32 0.03125, %v4860_v0  ;;  %v4857_v3 = vpop.xlane.xlu0 %4856 }
0x165d   :  { %v4861_v46 = vmul.f32 0.03125, %v4857_v3 }
0x165e   :  { %v4868_v48 = vsub.f32 %v4862_v33, %v4866_v22 }
0x165f   :  { %v4867_v29 = vsub.f32 %v4861_v46, %v4865_v45 }
0x1660   :  { %v4870_v23 = vadd.f32 1e-05, %v4868_v48 }
0x1661   :  { %v4869_v1 = vadd.f32 1e-05, %v4867_v29 }
0x1662   :  { %6274 = vrsqrt.f32 %v4870_v23 }
0x1663   :  { %6276 = vrsqrt.f32 %v4869_v1 }
0x166c   :  { %v6275_v4 = vpop.eup %6274 }
0x166d   :  { %v6277_v19 = vpop.eup %6276  ;;  %v4874_v5 = vmul.f32 %v6275_v4, %v4864_v11 }
0x166e   :  { %v4873_v7 = vmul.f32 %v6277_v19, %v4863_v13 }
0x166f   :  { %v4880_v38 = vmul.f32 %v4878_v57, %v4874_v5 }
0x1670   :  { %v4879_v10 = vmul.f32 %v4878_v57, %v4873_v7 }
0x1671   :  { %v4886_v25 = vadd.f32 %v4884_v6, %v4880_v38 }
0x1672   :  { %v4885_v52 = vadd.f32 %v4884_v6, %v4879_v10 }
0x1673   :  { %v4888_v14 = vsel %vm1496_vm9, 0.0, %v4886_v25 }
0x1674   :  { %4895 = vrot.lane.b32.xlu1 %v4888_v14, %s6319_s28  ;;  %v4887_v34 = vsel %vm1495_vm10, 0.0, %v4885_v52  ;;  %v4898_v31 = vrot.slane %v4888_v14, 4  ;;  %s6290_s28 = scalar_lea.vmem %s4914_s7, 64 }
0x1675   :  { %v4890_v8 = vrot.slane %v4887_v34, 4  ;;  %p6291_p5 = scmp.ne.s32.totalorder %s4914_s7, %s6290_s28  ;;  %p6296_p7 = scmp.lt.s32.totalorder %s6290_s28, %s6290_s28 }
0x1677   :  { %4891 = vrot.lane.b32.xlu0 %v4890_v8, %s6318_s23  ;;  %p6297_p8 = por %p6296_p7, %p6295_p6 }
0x1678   :  { %4899 = vrot.lane.b32.xlu1 %v4898_v31, %s6317_s1 }
0x1679   :  { %p6298_p9 = pnand %p6297_p8, %p6291_p5 }
0x16e6   :  { %v4896_v44 = vpop.permute.xlu1 %4895 }
0x16e9   :  { %v4892_v49 = vpop.permute.xlu0 %4891 }
0x16ea   :  { %v4902_v56 = vsel %vm89_vm1, %v4887_v34, %v4892_v49  ;;  %v4900_v32 = vpop.permute.xlu1 %4899 }
0x16eb   :  { %v4903_v15 = vsel %vm2387_vm7, %v4902_v56, %v4896_v44 }
0x16ec   :  { %v4905_v50 = vsel %vm4904_vm2, %v4903_v15, %v4900_v32 }
0x16ed   :  { %4906 = vst [vmem:[#allocation5] sm:$0xf] %v4905_v50 }
0x16ee   :  { %6301 = shalt.err (!%p6298_p9)
}
0x16ef   :  { %s6302_s20 = scalar_lea.hbm %s7408_s9, 64 }
0x16f0   :  { %p6303_p10 = scmp.ne.s32.totalorder %s7408_s9, %s6302_s20  ;;  %p6306_p11 = scmp.lt.u32.totalorder %s6302_s20, %s7408_s9 }
0x16f2   :  { %p6308_p12 = pnand %p6306_p11, %p6303_p10 }
0x16f4   :  { %6311 = shalt.err (!%p6308_p12)
}
0x16f5   :  { %4916 = dma.vmem_to_hbm [thread:$0]  %s4914_s7, 64, %s7408_s9, [#allocation3]  }
0x16f6   :  { %6314 = dma.done.wait [#allocation3], 64  }
0x16f7   :  { %6315 = vsyncadd [#allocation3], 4294967232 }
0x16f8   :  { %4920 = vsyncpa [#allocation3], 1 }
0x16f9   :  { %4921 = vsyncpa [#allocation4], 1 }

</bundles_post_ra>
